<compile_context>
chip_gen: v7x
topology: tpu7x:2x2x1
jax: 0.10.0
libtpu: 0.0.40
codegen_flags: <defaults>
</compile_context>

<pallas_src>
import jax
import jax.numpy as jnp
from jax import lax
from jax.experimental import pallas as pl
from jax.experimental.pallas import tpu as pltpu


def classifier_kernel(x_ref, wt_ref, b_ref, o_ref):
    # x_ref : (n_t, K)  f32  flattened input block (K = C*H*W)
    # wt_ref: (10, K)   f32  transposed, 49x-expanded, 1/49-scaled Linear weight
    # b_ref : (1, 10)   f32  bias
    # o_ref : (n_t, 10) f32
    x = jnp.maximum(x_ref[...], 0.0)                         # ReLU (VPU)
    # NT matmul (contract the last dim of both operands): the 1/49 pooling sum and the
    # Linear layer both happen inside this single MXU contraction over K.
    acc = lax.dot_general(
        x, wt_ref[...],
        dimension_numbers=(((1,), (1,)), ((), ())),
        preferred_element_type=jnp.float32,
    )
    o_ref[...] = acc + b_ref[...]                            # bias broadcast over rows


def _round_up(v, m):
    return ((v + m - 1) // m) * m


def classifier_forward(x_nchw, weight, bias, *, n_block=64):
    """x_nchw: (N, 1056, 7, 7) f32; weight: (10, 1056) f32; bias: (10,) f32."""
    N, C, H, W = x_nchw.shape
    # AvgPool2d(7, stride=1, pad=0) == global spatial mean only for 7x7 inputs.
    assert (H, W) == (7, 7), "Classifier expects 7x7 spatial input"
    assert weight.shape[1] == C
    HW = H * W
    K = C * HW
    n_out = weight.shape[0]

    # Free reshape of contiguous NCHW -> (N, K): fully contiguous x DMA, no lane padding.
    x = x_nchw.reshape(N, K)

    # Fold AvgPool into the Linear weight: repeat each input-channel column HW times and
    # scale by 1/HW.  Keep it transposed (n_out, K): padded footprint is 16 sublanes x K
    # (~3.3 MiB) instead of K x 128 lanes (~26.5 MiB).
    wt = jnp.repeat(weight.astype(jnp.float32) * (1.0 / HW), HW, axis=1)   # (n_out, K)
    b2d = bias.reshape(1, n_out).astype(jnp.float32)                       # (1, n_out)

    # Batch tile: collapse to a single grid step for small N; otherwise a multiple of 8
    # (keeps the (8,128) block constraint safe; trailing partial block is masked).
    n_block = max(8, _round_up(n_block, 8))
    n_t = N if N <= n_block else n_block
    grid = (pl.cdiv(N, n_t),)
    # NOTE: at tiny N (e.g. N=2) the single grid step leaves v7x's second TensorCore
    # idle; the saved per-step overhead outweighs that at this problem size.

    # Right-sized VMEM budget from (sublane/lane padded, double-buffered) tiles.
    x_tile = _round_up(n_t, 8) * K * 4
    w_tile = _round_up(n_out, 8) * K * 4
    b_tile = 8 * 128 * 4
    o_tile = _round_up(n_t, 8) * 128 * 4
    vmem_limit = 2 * (x_tile + w_tile + b_tile + o_tile) + (4 << 20)
    vmem_limit = max(vmem_limit, 16 << 20)

    out = pl.pallas_call(
        classifier_kernel,
        out_shape=jax.ShapeDtypeStruct((N, n_out), jnp.float32),
        grid_spec=pltpu.PrefetchScalarGridSpec(
            num_scalar_prefetch=0,
            grid=grid,
            in_specs=[
                pl.BlockSpec((n_t, K), lambda i: (i, 0)),        # x block (contiguous)
                pl.BlockSpec((n_out, K), lambda i: (0, 0)),      # weight: constant block
                pl.BlockSpec((1, n_out), lambda i: (0, 0)),      # bias:   constant block
            ],
            out_specs=pl.BlockSpec((n_t, n_out), lambda i: (i, 0)),
        ),
        compiler_params=pltpu.CompilerParams(
            dimension_semantics=("parallel",),
            vmem_limit_bytes=vmem_limit,
        ),
    )(x, wt, b2d)
    return out


if __name__ == "__main__":
    key = jax.random.PRNGKey(0)
    k_x, k_w, k_b = jax.random.split(key, 3)

    N, C, H, W = 2, 1056, 7, 7            # batch=2; C/H/W fixed by Linear(1056, 10) + pool(7)
    x = jax.random.normal(k_x, (N, C, H, W), dtype=jnp.float32)

    # Deterministic parameter init mimicking nn.Linear: U(-1/sqrt(in), 1/sqrt(in))
    bound = 1.0 / jnp.sqrt(jnp.float32(C))
    weight = jax.random.uniform(k_w, (10, C), minval=-bound, maxval=bound,
                                dtype=jnp.float32)
    bias = jax.random.uniform(k_b, (10,), minval=-bound, maxval=bound,
                              dtype=jnp.float32)

    out = classifier_forward(x, weight, bias)
    jax.block_until_ready(out)

    # Pure-JAX reference of the same forward pass (eval-mode dropout == identity).
    ref = jnp.mean(jnp.maximum(x, 0.0), axis=(2, 3)) @ weight.T + bias
    assert out.shape == (N, 10)
    assert jnp.allclose(out, ref, atol=1e-3, rtol=1e-3)

    print("KERNEL_OK")
</pallas_src>

<mosaic_0001>
module attributes {stable_mosaic.version = 11 : i64} {
  func.func @classifier_kernel(%arg0: i32, %arg1: memref<2x51744xf32, #tpu.memory_space<vmem>>, %arg2: memref<10x51744xf32, #tpu.memory_space<vmem>>, %arg3: memref<1x10xf32, #tpu.memory_space<vmem>>, %arg4: memref<2x10xf32, #tpu.memory_space<vmem>>) attributes {dimension_semantics = [#tpu.dimension_semantics<parallel>], iteration_bounds = array<i64: 1>, scalar_prefetch = 0 : i64, scratch_operands = 0 : i64, tpu.core_type = #tpu.core_type<tc>, window_params = [{transform_indices = @transform_0, window_bounds = array<i64: 2, 51744>}, {pipeline_mode = #tpu.pipeline_mode<synchronous>, transform_indices = @transform_1, window_bounds = array<i64: 10, 51744>}, {pipeline_mode = #tpu.pipeline_mode<synchronous>, transform_indices = @transform_2, window_bounds = array<i64: 1, 10>}, {transform_indices = @transform_3, window_bounds = array<i64: 2, 10>}]} {
    %c0 = arith.constant 0 : index
    %c0_0 = arith.constant 0 : index
    %0 = vector.load %arg1[%c0, %c0_0] : memref<2x51744xf32, #tpu.memory_space<vmem>>, vector<2x51744xf32>
    %cst = arith.constant 0.000000e+00 : f32
    %1 = vector.broadcast %cst : f32 to vector<2x51744xf32>
    %2 = arith.maximumf %0, %1 : vector<2x51744xf32>
    %c0_1 = arith.constant 0 : index
    %c0_2 = arith.constant 0 : index
    %3 = vector.load %arg2[%c0_1, %c0_2] : memref<10x51744xf32, #tpu.memory_space<vmem>>, vector<10x51744xf32>
    %cst_3 = arith.constant dense<0.000000e+00> : vector<2x10xf32>
    %4 = tpu.matmul %2, %3, %cst_3 {dimension_numbers = #tpu.dot_dimension_numbers<[1], [1], [0], [0], [0, 0, 1, 0], [], []>} : vector<2x51744xf32>, vector<10x51744xf32>, vector<2x10xf32> -> vector<2x10xf32>
    %c0_4 = arith.constant 0 : index
    %c0_5 = arith.constant 0 : index
    %5 = vector.load %arg3[%c0_4, %c0_5] : memref<1x10xf32, #tpu.memory_space<vmem>>, vector<1x10xf32>
    %6 = vector.broadcast %5 : vector<1x10xf32> to vector<2x10xf32>
    %7 = arith.addf %4, %6 : vector<2x10xf32>
    %c0_6 = arith.constant 0 : index
    %c0_7 = arith.constant 0 : index
    %8 = vector.load %arg4[%c0_6, %c0_7] : memref<2x10xf32, #tpu.memory_space<vmem>>, vector<2x10xf32>
    tpu.vector_store %arg4[%c0_6, %c0_7], %7 {strides = array<i32>} : memref<2x10xf32, #tpu.memory_space<vmem>>, vector<2x10xf32>,
    return
  }
  func.func @transform_0(%arg0: i32) -> (i32, i32) {
    %c0_i32 = arith.constant 0 : i32
    %c0_i32_0 = arith.constant 0 : i32
    return %arg0, %c0_i32 : i32, i32
  }
  func.func @transform_1(%arg0: i32) -> (i32, i32) {
    %c0_i32 = arith.constant 0 : i32
    %c0_i32_0 = arith.constant 0 : i32
    %c0_i32_1 = arith.constant 0 : i32
    return %c0_i32, %c0_i32_0 : i32, i32
  }
  func.func @transform_2(%arg0: i32) -> (i32, i32) {
    %c0_i32 = arith.constant 0 : i32
    %c0_i32_0 = arith.constant 0 : i32
    %c0_i32_1 = arith.constant 0 : i32
    return %c0_i32, %c0_i32_0 : i32, i32
  }
  func.func @transform_3(%arg0: i32) -> (i32, i32) {
    %c0_i32 = arith.constant 0 : i32
    %c0_i32_0 = arith.constant 0 : i32
    return %arg0, %c0_i32 : i32, i32
  }
}

</mosaic_0001>

<bundles_post_ra>
// kernel: tpu_custom_call.1
= control target key start
LH: loop header
LB: loop body
LE: loop exit
PB: predicated region body
PF: predicated region fallthrough
CT: control target
= control target key end

     0   :  { %8 = vsyncpa [#allocation3], 0  ;;  %s19162_s0 = inlined_call_operand.hbm [shape: f32[2,51744], index: 0, kind: input, shape index: {}]   ;;  %s19163_s1 = inlined_call_operand.hbm [shape: f32[10,51744], index: 1, kind: input, shape index: {}]   ;;  %s19164_s2 = inlined_call_operand.hbm [shape: f32[1,10], index: 2, kind: input, shape index: {}]   ;;  %s19165_s3 = inlined_call_operand.hbm [shape: f32[2,10], index: 3, kind: output, shape index: {}]  }
   0x1   :  { %9 = vsyncpa [#allocation6], 0 }
   0x2   :  { %10 = vsyncpa [#allocation4], 0  ;;  %s18874_s12 = smov [#allocation5]   ;;  %s18780_s16 = scalar_lea.hbm %s19163_s1, 103680 }
   0x3   :  { %s26_s13 = sshll.u32 %s18874_s12, 4  ;;  %p18781_p0 = scmp.ne.s32.totalorder %s19163_s1, %s18780_s16  ;;  %s27_s13 = int_to_ptr.vmem [resolvable:$true] %s26_s13 }
   0x4   :  { %p18784_p1 = scmp.lt.u32.totalorder %s18780_s16, %s19163_s1 }
   0x6   :  { %p18786_p2 = pnand %p18784_p1, %p18781_p0 }
   0x8   :  { %18789 = shalt.err (!%p18786_p2)
}
   0x9   :  { %s18790_s21 = scalar_lea.vmem %s27_s13, 103680  ;;  %p18795_p4 = scmp.lt.s32.totalorder %s27_s13, %s27_s13 }
   0xa   :  { %p18791_p3 = scmp.ne.s32.totalorder %s27_s13, %s18790_s21  ;;  %p18796_p5 = scmp.lt.s32.totalorder %s18790_s21, %s18790_s21 }
   0xc   :  { %p18797_p6 = por %p18796_p5, %p18795_p4 }
   0xe   :  { %p18798_p7 = pnand %p18797_p6, %p18791_p3 }
  0x10   :  { %18801 = shalt.err (!%p18798_p7)
}
  0x11   :  { %s18875_s22 = smov 51840   ;;  %s18876_s23 = smov 3240  }
  0x12   :  { %32 = dma.hbm_to_vmem [thread:$0]  %s19163_s1, 103680, %s27_s13, [#allocation6], %s18875_s22, %s18875_s22, %s18876_s23  }
  0x13   :  { %s18877_s26 = smov [#allocation2]   ;;  %s18878_s28 = smov [#allocation7]  }
  0x14   :  { %s17_s27 = sshll.u32 %s18877_s26, 4  ;;  %s39_s29 = sshll.u32 %s18878_s28, 4  ;;  %s18_s27 = int_to_ptr.vmem [resolvable:$true] %s17_s27  ;;  %s40_s29 = int_to_ptr.vmem [resolvable:$true] %s39_s29 }
  0x15   :  { %s18802_s5 = scalar_lea.hbm %s19162_s0, 12960 }
  0x16   :  { %p18803_p8 = scmp.ne.s32.totalorder %s19162_s0, %s18802_s5  ;;  %p18806_p9 = scmp.lt.u32.totalorder %s18802_s5, %s19162_s0 }
  0x18   :  { %p18808_p10 = pnand %p18806_p9, %p18803_p8 }
  0x1a   :  { %18811 = shalt.err (!%p18808_p10)
}
  0x1b   :  { %s18812_s1 = scalar_lea.vmem %s18_s27, 12960  ;;  %p18817_p12 = scmp.lt.s32.totalorder %s18_s27, %s18_s27 }
  0x1c   :  { %p18813_p11 = scmp.ne.s32.totalorder %s18_s27, %s18812_s1  ;;  %p18818_p13 = scmp.lt.s32.totalorder %s18812_s1, %s18812_s1 }
  0x1e   :  { %p18819_p0 = por %p18818_p13, %p18817_p12 }
  0x20   :  { %p18820_p1 = pnand %p18819_p0, %p18813_p11 }
  0x22   :  { %18823 = shalt.err (!%p18820_p1)
}
  0x23   :  { %20 = dma.hbm_to_vmem [thread:$0]  %s19162_s0, 12960, %s18_s27, [#allocation3]  }
  0x24   :  { %s18824_s14 = scalar_lea.hbm %s19164_s2, 16 }
  0x25   :  { %p18825_p2 = scmp.ne.s32.totalorder %s19164_s2, %s18824_s14  ;;  %p18828_p3 = scmp.lt.u32.totalorder %s18824_s14, %s19164_s2 }
  0x27   :  { %p18830_p4 = pnand %p18828_p3, %p18825_p2 }
  0x29   :  { %18833 = shalt.err (!%p18830_p4)
}
  0x2a   :  { %s18834_s19 = scalar_lea.vmem %s40_s29, 16  ;;  %s18838_s20 = scalar_lea.vmem %s40_s29, 32 }
  0x2b   :  { %p18835_p5 = scmp.ne.s32.totalorder %s40_s29, %s18834_s19  ;;  %p18839_p6 = scmp.lt.s32.totalorder %s40_s29, %s40_s29 }
  0x2c   :  { %p18840_p7 = scmp.lt.s32.totalorder %s18838_s20, %s18834_s19 }
  0x2e   :  { %p18841_p8 = por %p18840_p7, %p18839_p6 }
  0x30   :  { %p18842_p9 = pnand %p18841_p8, %p18835_p5 }
  0x32   :  { %18845 = shalt.err (!%p18842_p9)
}
  0x33   :  { %42 = dma.hbm_to_vmem [thread:$0]  %s19164_s2, 16, %s40_s29, [#allocation6]  }
  0x34   :  { %18868 = dma.done.wait [#allocation3], 12960  }
  0x35   :  { %18869 = vsyncadd [#allocation3], 4294954336 }
  0x36   :  { %18870 = dma.done.wait [#allocation6], 103696  }
  0x37   :  { %18871 = vsyncadd [#allocation6], 4294863600  ;;  %v1179_v0 = vlaneseq  ;;  %v18879_v1 = vmov 1983009808   ;;  %v257_v5 = vld [vmem:[#allocation5 + $0x8] sm:$0xff]  ;;  %v459_v7 = vld [vmem:[#allocation5 + $0x658] sm:$0xff] }
  0x38   :  { %v1177_v2 = vunpack.c.l.s4 %v18879_v1  ;;  %v662_v6 = vld [vmem:[#allocation5 + $0xcb0] sm:$0x3]  ;;  %v864_v9 = vld [vmem:[#allocation5 + $0x1300] sm:$0x3]  ;;  %v661_v11 = vld [vmem:[#allocation5 + $0xca8] sm:$0x3] }
  0x39   :  { %v1180_v4 = vshrl.u32 %v1179_v0, 7  ;;  %v17554_v8 = vpack.c.bf16 %v662_v6, %v257_v5  ;;  %v256_v10 = vld [vmem:[#allocation5] sm:$0xff]  ;;  %v17958_v13 = vpack.c.bf16 %v864_v9, %v459_v7  ;;  %v458_v15 = vld [vmem:[#allocation5 + $0x650] sm:$0xff]  ;;  %v863_v16 = vld [vmem:[#allocation5 + $0x12f8] sm:$0x3]  ;;  %vm3303_vm0 = vcmask 261120  }
  0x3a   :  { %v1178_v3 = vunpack.c.0.s8 %v1177_v2  ;;  %v17556_v14 = vpack.c.bf16 %v661_v11, %v256_v10  ;;  %v52_v17 = vld [vmem:[#allocation2] sm:$0xff]  ;;  %v17960_v18 = vpack.c.bf16 %v863_v16, %v458_v15  ;;  %v102_v20 = vld [vmem:[#allocation2 + $0x190] sm:$0xff]  ;;  %v664_v22 = vld [vmem:[#allocation5 + $0xcc0] sm:$0x3]  ;;  %vm18881_vm2 = vmmov 0   ;;  %s18883_s2 = smov [#allocation8]  }
  0x3b   :  { %17555 = vmatprep.subr.bf16.mxu1 %v17554_v8  ;;  %v154_v19 = vmax.f32 %v52_v17, 0.0  ;;  %v259_v21 = vld [vmem:[#allocation5 + $0x18] sm:$0xff]  ;;  %17959 = vmatprep.subr.bf16.mxu0 %v17958_v13  ;;  %v18942_v23 = vmax.f32 %v102_v20, 0.0  ;;  %v461_v25 = vld [vmem:[#allocation5 + $0x668] sm:$0xff]  ;;  %v866_v26 = vld [vmem:[#allocation5 + $0x1310] sm:$0x3] }
  0x3c   :  { %v18940_v12 = vsub.s32 %v1178_v3, %v1180_v4  ;;  %17557 = vmatpush1.bf16.xpose.msra.mxu1 %v17556_v14  ;;  %v17558_v24 = vpack.c.bf16 %v664_v22, %v259_v21  ;;  %17961 = vmatpush1.bf16.xpose.msra.mxu0 %v17960_v18  ;;  %v17962_v29 = vpack.c.bf16 %v866_v26, %v461_v25  ;;  %v258_v30 = vld [vmem:[#allocation5 + $0x10] sm:$0xff]  ;;  %v663_v31 = vld [vmem:[#allocation5 + $0xcb8] sm:$0x3]  ;;  %v460_v35 = vld [vmem:[#allocation5 + $0x660] sm:$0xff]  ;;  %s17530_s22 = sshll.u32 %s18883_s2, 4  ;;  %vm17522_vm3 = vcmask 74752   ;;  %s17531_s22 = int_to_ptr.vmem [resolvable:$true] %s17530_s22 }
  0x3d   :  { %v1175_v27 = vcombine.high %v154_v19, %v154_v19  ;;  %v2025_v32 = vcombine.high %v18942_v23, %v18942_v23  ;;  %v103_v33 = vld [vmem:[#allocation2 + $0x198] sm:$0xff]  ;;  %v865_v36 = vld [vmem:[#allocation5 + $0x1308] sm:$0x3]  ;;  %v17560_v41 = vpack.c.bf16 %v663_v31, %v258_v30  ;;  %v463_v43 = vld [vmem:[#allocation5 + $0x678] sm:$0xff]  ;;  %s18846_s23 = scalar_lea.vmem %s17531_s22, 32  ;;  %p18851_p11 = scmp.lt.s32.totalorder %s17531_s22, %s17531_s22 }
  0x3e   :  { %v1182_v28 = vrot.slane %v154_v19, %v18940_v12  ;;  %17559 = vmatprep.subr.bf16.mxu1 %v17558_v24  ;;  %17963 = vmatprep.subr.bf16.mxu0 %v17962_v29  ;;  %v205_v38 = vmax.f32 %v103_v33, 0.0  ;;  %v261_v39 = vld [vmem:[#allocation5 + $0x28] sm:$0xff]  ;;  %v666_v42 = vld [vmem:[#allocation5 + $0xcd0] sm:$0x3]  ;;  %v868_v44 = vld [vmem:[#allocation5 + $0x1320] sm:$0x3]  ;;  %v17964_v49 = vpack.c.bf16 %v865_v36, %v460_v35  ;;  %p18847_p10 = scmp.ne.s32.totalorder %s17531_s22, %s18846_s23  ;;  %p18852_p12 = scmp.lt.s32.totalorder %s18846_s23, %s18846_s23 }
  0x3f   :  { %v1189_v37 = vrot.slane %v1175_v27, %v18940_v12  ;;  %v2039_v40 = vrot.slane %v2025_v32, %v18940_v12  ;;  %v53_v47 = vld [vmem:[#allocation2 + $0x8] sm:$0xff]  ;;  %v17562_v53 = vpack.c.bf16 %v666_v42, %v261_v39  ;;  %v17966_v54 = vpack.c.bf16 %v868_v44, %v463_v43  ;;  %v665_v57 = vld [vmem:[#allocation5 + $0xcc8] sm:$0x3]  ;;  %v462_v61 = vld [vmem:[#allocation5 + $0x670] sm:$0xff] }
  0x40   :  { %v1190_v34 = vcombine.high %v1182_v28, %v1182_v28  ;;  %v2049_v46 = vrot.slane %v205_v38, %v18940_v12  ;;  %v155_v50 = vmax.f32 %v53_v47, 0.0  ;;  %v2042_v51 = vcombine.high %v205_v38, %v205_v38  ;;  %v260_v56 = vld [vmem:[#allocation5 + $0x20] sm:$0xff]  ;;  %v263_v59 = vld [vmem:[#allocation5 + $0x38] sm:$0xff]  ;;  %v465_v2 = vld [vmem:[#allocation5 + $0x688] sm:$0xff]  ;;  %p18853_p13 = por %p18852_p12, %p18851_p11 }
  0x41   :  { %v1191_v45 = vcombine.high %v1189_v37, %v1189_v37  ;;  %v2041_v48 = vcombine.high %v2039_v40, %v2039_v40  ;;  %v668_v60 = vld [vmem:[#allocation5 + $0xce0] sm:$0x3]  ;;  %v867_v62 = vld [vmem:[#allocation5 + $0x1318] sm:$0x3]  ;;  %v17564_v0 = vpack.c.bf16 %v665_v57, %v260_v56  ;;  %v870_v3 = vld [vmem:[#allocation5 + $0x1330] sm:$0x3] }
  0x42   :  { %3376 = vmatprep.mubr.f32.mxu1 %v1190_v34  ;;  %v2057_v52 = vcombine.high %v2049_v46, %v2049_v46  ;;  %v1199_v55 = vrot.slane %v155_v50, %v18940_v12  ;;  %v2056_v58 = vrot.slane %v2042_v51, %v18940_v12  ;;  %v104_v63 = vld [vmem:[#allocation2 + $0x1a0] sm:$0xff]  ;;  %v1192_v4 = vcombine.high %v155_v50, %v155_v50  ;;  %v54_v14 = vld [vmem:[#allocation2 + $0x10] sm:$0xff]  ;;  %v670_v17 = vld [vmem:[#allocation5 + $0xcf0] sm:$0x3]  ;;  %p18854_p0 = pnand %p18853_p13, %p18847_p10 }
  0x43   :  { %3377 = vmatmul.mubr.f32.vlgmr.msra.gmra.mrb[0].mxu1 %v1182_v28  ;;  %10446 = vmatprep.mubr.f32.mxu0 %v2041_v48  ;;  %v17566_v5 = vpack.c.bf16 %v668_v60, %v263_v59  ;;  %v17968_v6 = vpack.c.bf16 %v867_v62, %v462_v61  ;;  %v206_v8 = vmax.f32 %v104_v63, 0.0  ;;  %v17970_v9 = vpack.c.bf16 %v870_v3, %v465_v2  ;;  %v262_v11 = vld [vmem:[#allocation5 + $0x30] sm:$0xff]  ;;  %v667_v13 = vld [vmem:[#allocation5 + $0xcd8] sm:$0x3]  ;;  %v265_v16 = vld [vmem:[#allocation5 + $0x48] sm:$0xff] }
  0x44   :  { %17561 = vmatpush1.bf16.xpose.msra.mxu1 %v17560_v41  ;;  %10447 = vmatmul.mubr.f32.vlgmr.msra.gmra.mrb[0].mxu0 %v2039_v40  ;;  %v1207_v1 = vcombine.high %v1199_v55, %v1199_v55  ;;  %v2058_v7 = vcombine.high %v2056_v58, %v2056_v58  ;;  %v1206_v10 = vrot.slane %v1192_v4, %v18940_v12  ;;  %v464_v18 = vld [vmem:[#allocation5 + $0x680] sm:$0xff]  ;;  %v869_v19 = vld [vmem:[#allocation5 + $0x1328] sm:$0x3]  ;;  %v467_v22 = vld [vmem:[#allocation5 + $0x698] sm:$0xff]  ;;  %v156_v25 = vmax.f32 %v54_v14, 0.0 }
  0x45   :  { %3446 = vmatprep.mubr.f32.mxu1 %v1191_v45  ;;  %17965 = vmatpush1.bf16.xpose.msra.mxu0 %v17964_v49  ;;  %v2066_v15 = vrot.slane %v206_v8, %v18940_v12  ;;  %v17568_v20 = vpack.c.bf16 %v667_v13, %v262_v11  ;;  %v872_v24 = vld [vmem:[#allocation5 + $0x1340] sm:$0x3]  ;;  %v17570_v26 = vpack.c.bf16 %v670_v17, %v265_v16  ;;  %v669_v33 = vld [vmem:[#allocation5 + $0xce8] sm:$0x3]  ;;  %v267_v35 = vld [vmem:[#allocation5 + $0x58] sm:$0xff] }
  0x46   :  { %10516 = vmatprep.mubr.f32.mxu0 %v2057_v52  ;;  %17563 = vmatprep.subr.bf16.mxu1 %v17562_v53  ;;  %v1208_v21 = vcombine.high %v1206_v10, %v1206_v10  ;;  %v17972_v27 = vpack.c.bf16 %v869_v19, %v464_v18  ;;  %v2059_v29 = vcombine.high %v206_v8, %v206_v8  ;;  %v264_v32 = vld [vmem:[#allocation5 + $0x40] sm:$0xff]  ;;  %v871_v38 = vld [vmem:[#allocation5 + $0x1338] sm:$0x3]  ;;  %v469_v42 = vld [vmem:[#allocation5 + $0x6a8] sm:$0xff] }
  0x47   :  { %17967 = vmatprep.subr.bf16.mxu0 %v17966_v54  ;;  %v2074_v28 = vcombine.high %v2066_v15, %v2066_v15  ;;  %v17974_v30 = vpack.c.bf16 %v872_v24, %v467_v22  ;;  %v1216_v31 = vrot.slane %v156_v25, %v18940_v12  ;;  %v672_v36 = vld [vmem:[#allocation5 + $0xd00] sm:$0x3]  ;;  %v17572_v40 = vpack.c.bf16 %v669_v33, %v264_v32  ;;  %v874_v43 = vld [vmem:[#allocation5 + $0x1350] sm:$0x3]  ;;  %v671_v52 = vld [vmem:[#allocation5 + $0xcf8] sm:$0x3] }
  0x48   :  { %v2073_v34 = vrot.slane %v2059_v29, %v18940_v12  ;;  %v105_v39 = vld [vmem:[#allocation2 + $0x1a8] sm:$0xff]  ;;  %v1209_v44 = vcombine.high %v156_v25, %v156_v25  ;;  %v17574_v45 = vpack.c.bf16 %v672_v36, %v267_v35  ;;  %v17978_v49 = vpack.c.bf16 %v874_v43, %v469_v42  ;;  %v266_v51 = vld [vmem:[#allocation5 + $0x50] sm:$0xff]  ;;  %v875_v13 = vld [vmem:[#allocation5 + $0x1358] sm:$0x3] }
  0x49   :  { %v1224_v41 = vcombine.high %v1216_v31, %v1216_v31  ;;  %v207_v48 = vmax.f32 %v105_v39, 0.0  ;;  %v55_v53 = vld [vmem:[#allocation2 + $0x18] sm:$0xff]  ;;  %v468_v57 = vld [vmem:[#allocation5 + $0x6a0] sm:$0xff]  ;;  %v17576_v59 = vpack.c.bf16 %v671_v52, %v266_v51  ;;  %v471_v61 = vld [vmem:[#allocation5 + $0x6b8] sm:$0xff] }
  0x4a   :  { %v2075_v47 = vcombine.high %v2073_v34, %v2073_v34  ;;  %v1223_v50 = vrot.slane %v1209_v44, %v18940_v12  ;;  %v674_v56 = vld [vmem:[#allocation5 + $0xd10] sm:$0x3]  ;;  %v876_v62 = vld [vmem:[#allocation5 + $0x1360] sm:$0x3]  ;;  %v157_v63 = vmax.f32 %v55_v53, 0.0  ;;  %v106_v14 = vld [vmem:[#allocation2 + $0x1b0] sm:$0xff] }
  0x4b   :  { %3447 = vmatmul.mubr.f32.vlgmr.msra.gmra.mrb[0].mxu1 %v1189_v37  ;;  %v466_v37 = vld [vmem:[#allocation5 + $0x690] sm:$0xff]  ;;  %v2083_v54 = vrot.slane %v207_v48, %v18940_v12  ;;  %v2076_v3 = vcombine.high %v207_v48, %v207_v48  ;;  %v17982_v4 = vpack.c.bf16 %v876_v62, %v471_v61  ;;  %v473_v17 = vld [vmem:[#allocation5 + $0x6c8] sm:$0xff]  ;;  %v208_v24 = vmax.f32 %v106_v14, 0.0  ;;  %v472_v33 = vld [vmem:[#allocation5 + $0x6c0] sm:$0xff] }
  0x4c   :  { %17565 = vmatpush1.bf16.xpose.msra.mxu1 %v17564_v0  ;;  %3516 = vmatprep.mubr.f32.mxu1 %v1207_v1  ;;  %v1225_v60 = vcombine.high %v1223_v50, %v1223_v50  ;;  %v470_v11 = vld [vmem:[#allocation5 + $0x6b0] sm:$0xff]  ;;  %v1226_v19 = vcombine.high %v157_v63, %v157_v63  ;;  %v879_v52 = vld [vmem:[#allocation5 + $0x1378] sm:$0x3]  ;;  %vm18364_vm1 = vmpackc.low %vm3303_vm0, %vm3303_vm0 }
  0x4d   :  { %10517 = vmatmul.mubr.f32.vlgmr.msra.gmra.mrb[0].mxu0 %v2049_v46  ;;  %17567 = vmatprep.subr.bf16.mxu1 %v17566_v5  ;;  %v17976_v46 = vpack.c.bf16 %v871_v38, %v466_v37  ;;  %v2091_v2 = vcombine.high %v2083_v54, %v2083_v54  ;;  %v1233_v5 = vrot.slane %v157_v63, %v18940_v12  ;;  %v878_v18 = vld [vmem:[#allocation5 + $0x1370] sm:$0x3]  ;;  %v56_v29 = vld [vmem:[#allocation2 + $0x20] sm:$0xff]  ;;  %v880_v38 = vld [vmem:[#allocation5 + $0x1380] sm:$0x3] }
  0x4e   :  { %17969 = vmatpush1.bf16.xpose.msra.mxu0 %v17968_v6  ;;  %10586 = vmatprep.mubr.f32.mxu0 %v2058_v7  ;;  %v268_v6 = vld [vmem:[#allocation5 + $0x60] sm:$0xff]  ;;  %v673_v7 = vld [vmem:[#allocation5 + $0xd08] sm:$0x3]  ;;  %v2090_v8 = vrot.slane %v2076_v3, %v18940_v12  ;;  %v17986_v25 = vpack.c.bf16 %v878_v18, %v473_v17  ;;  %v678_v32 = vld [vmem:[#allocation5 + $0xd30] sm:$0x3]  ;;  %v158_v39 = vmax.f32 %v56_v29, 0.0  ;;  %v2093_v43 = vcombine.high %v208_v24, %v208_v24 }
  0x4f   :  { %17971 = vmatprep.subr.bf16.mxu0 %v17970_v9  ;;  %v271_v9 = vld [vmem:[#allocation5 + $0x78] sm:$0xff]  ;;  %v1241_v16 = vcombine.high %v1233_v5, %v1233_v5  ;;  %v474_v51 = vld [vmem:[#allocation5 + $0x6d0] sm:$0xff] }
  0x50   :  { %v2092_v22 = vcombine.high %v2090_v8, %v2090_v8  ;;  %v475_v37 = vld [vmem:[#allocation5 + $0x6d8] sm:$0xff]  ;;  %v2107_v48 = vrot.slane %v2093_v43, %v18940_v12  ;;  %v107_v53 = vld [vmem:[#allocation2 + $0x1b8] sm:$0xff]  ;;  %v58_v43 = vld [vmem:[#allocation2 + $0x30] sm:$0xff] }
  0x51   :  { %v17990_v44 = vpack.c.bf16 %v880_v38, %v475_v37  ;;  %v209_v62 = vmax.f32 %v107_v53, 0.0  ;;  %v57_v3 = vld [vmem:[#allocation2 + $0x28] sm:$0xff]  ;;  %v108_v29 = vld [vmem:[#allocation2 + $0x1c0] sm:$0xff]  ;;  %v160_v53 = vmax.f32 %v58_v43, 0.0  ;;  %v110_v43 = vld [vmem:[#allocation2 + $0x1d0] sm:$0xff] }
  0x52   :  { %v2109_v61 = vcombine.high %v2107_v48, %v2107_v48  ;;  %v159_v14 = vmax.f32 %v57_v3, 0.0  ;;  %v210_v38 = vmax.f32 %v108_v29, 0.0  ;;  %v109_v3 = vld [vmem:[#allocation2 + $0x1c8] sm:$0xff] }
  0x53   :  { %3517 = vmatmul.mubr.f32.vlgmr.msra.gmra.mrb[0].mxu1 %v1199_v55  ;;  %v269_v55 = vld [vmem:[#allocation5 + $0x68] sm:$0xff]  ;;  %v2110_v18 = vcombine.high %v209_v62, %v209_v62 }
  0x54   :  { %17569 = vmatpush1.bf16.xpose.msra.mxu1 %v17568_v20  ;;  %3586 = vmatprep.mubr.f32.mxu1 %v1208_v21  ;;  %v17578_v0 = vpack.c.bf16 %v674_v56, %v269_v55  ;;  %v17984_v21 = vpack.c.bf16 %v875_v13, %v470_v11  ;;  %v477_v56 = vld [vmem:[#allocation5 + $0x6e8] sm:$0xff]  ;;  %v479_v11 = vld [vmem:[#allocation5 + $0x6f8] sm:$0xff]  ;;  %v884_v13 = vld [vmem:[#allocation5 + $0x13a0] sm:$0x3] }
  0x55   :  { %10587 = vmatmul.mubr.f32.vlgmr.msra.gmra.mrb[0].mxu0 %v2056_v58  ;;  %17571 = vmatprep.subr.bf16.mxu1 %v17570_v26  ;;  %v873_v58 = vld [vmem:[#allocation5 + $0x1348] sm:$0x3]  ;;  %v1240_v26 = vrot.slane %v1226_v19, %v18940_v12  ;;  %v17998_v19 = vpack.c.bf16 %v884_v13, %v479_v11  ;;  %v211_v13 = vmax.f32 %v109_v3, 0.0 }
  0x56   :  { %17973 = vmatpush1.bf16.xpose.msra.mxu0 %v17972_v27  ;;  %10656 = vmatprep.mubr.f32.mxu0 %v2074_v28  ;;  %v17980_v1 = vpack.c.bf16 %v873_v58, %v468_v57  ;;  %v270_v27 = vld [vmem:[#allocation5 + $0x70] sm:$0xff]  ;;  %v675_v28 = vld [vmem:[#allocation5 + $0xd18] sm:$0x3]  ;;  %v1243_v58 = vcombine.high %v158_v39, %v158_v39 }
  0x57   :  { %17975 = vmatprep.subr.bf16.mxu0 %v17974_v30  ;;  %v2100_v30 = vrot.slane %v208_v24, %v18940_v12  ;;  %v17584_v35 = vpack.c.bf16 %v675_v28, %v270_v27  ;;  %v1242_v36 = vcombine.high %v1240_v26, %v1240_v26  ;;  %v882_v57 = vld [vmem:[#allocation5 + $0x1390] sm:$0x3]  ;;  %v2124_v24 = vrot.slane %v2110_v18, %v18940_v12  ;;  %v883_v28 = vld [vmem:[#allocation5 + $0x1398] sm:$0x3] }
  0x58   :  { %v17994_v63 = vpack.c.bf16 %v882_v57, %v477_v56  ;;  %v478_v27 = vld [vmem:[#allocation5 + $0x6f0] sm:$0xff]  ;;  %v2127_v57 = vcombine.high %v210_v38, %v210_v38 }
  0x59   :  { %v2108_v42 = vcombine.high %v2100_v30, %v2100_v30  ;;  %v2126_v37 = vcombine.high %v2124_v24, %v2124_v24  ;;  %v59_v18 = vld [vmem:[#allocation2 + $0x38] sm:$0xff] }
  0x5a   :  { %v161_v29 = vmax.f32 %v59_v18, 0.0  ;;  %v111_v18 = vld [vmem:[#allocation2 + $0x1d8] sm:$0xff] }
  0x5b   :  { %3587 = vmatmul.mubr.f32.vlgmr.msra.gmra.mrb[0].mxu1 %v1206_v10  ;;  %v676_v10 = vld [vmem:[#allocation5 + $0xd20] sm:$0x3] }
  0x5c   :  { %17573 = vmatpush1.bf16.xpose.msra.mxu1 %v17572_v40  ;;  %3656 = vmatprep.mubr.f32.mxu1 %v1224_v41  ;;  %v17582_v20 = vpack.c.bf16 %v676_v10, %v271_v9 }
  0x5d   :  { %10657 = vmatmul.mubr.f32.vlgmr.msra.gmra.mrb[0].mxu0 %v2066_v15  ;;  %17575 = vmatprep.subr.bf16.mxu1 %v17574_v45  ;;  %v17580_v15 = vpack.c.bf16 %v673_v7, %v268_v6  ;;  %v1250_v45 = vrot.slane %v158_v39, %v18940_v12  ;;  %v682_v6 = vld [vmem:[#allocation5 + $0xd50] sm:$0x3]  ;;  %v476_v7 = vld [vmem:[#allocation5 + $0x6e0] sm:$0xff] }
  0x5e   :  { %17977 = vmatpush1.bf16.xpose.msra.mxu0 %v17976_v46  ;;  %10726 = vmatprep.mubr.f32.mxu0 %v2075_v47  ;;  %v272_v46 = vld [vmem:[#allocation5 + $0x80] sm:$0xff]  ;;  %v677_v47 = vld [vmem:[#allocation5 + $0xd28] sm:$0x3] }
  0x5f   :  { %17979 = vmatprep.subr.bf16.mxu0 %v17978_v49  ;;  %v275_v49 = vld [vmem:[#allocation5 + $0x98] sm:$0xff]  ;;  %v1258_v55 = vcombine.high %v1250_v45, %v1250_v45 }
  0x63   :  { %3657 = vmatmul.mubr.f32.vlgmr.msra.gmra.mrb[0].mxu1 %v1216_v31  ;;  %v273_v31 = vld [vmem:[#allocation5 + $0x88] sm:$0xff] }
  0x64   :  { %17577 = vmatpush1.bf16.xpose.msra.mxu1 %v17576_v59  ;;  %3726 = vmatprep.mubr.f32.mxu1 %v1225_v60  ;;  %v17586_v40 = vpack.c.bf16 %v678_v32, %v273_v31  ;;  %v17992_v60 = vpack.c.bf16 %v879_v52, %v474_v51  ;;  %v481_v32 = vld [vmem:[#allocation5 + $0x708] sm:$0xff]  ;;  %v483_v51 = vld [vmem:[#allocation5 + $0x718] sm:$0xff]  ;;  %v888_v52 = vld [vmem:[#allocation5 + $0x13c0] sm:$0x3] }
  0x65   :  { %10727 = vmatmul.mubr.f32.vlgmr.msra.gmra.mrb[0].mxu0 %v2073_v34  ;;  %17579 = vmatprep.subr.bf16.mxu1 %v17578_v0  ;;  %v877_v34 = vld [vmem:[#allocation5 + $0x1368] sm:$0x3]  ;;  %v1257_v0 = vrot.slane %v1243_v58, %v18940_v12  ;;  %v18006_v58 = vpack.c.bf16 %v888_v52, %v483_v51  ;;  %v212_v52 = vmax.f32 %v110_v43, 0.0 }
  0x66   :  { %17981 = vmatpush1.bf16.xpose.msra.mxu0 %v17980_v1  ;;  %10796 = vmatprep.mubr.f32.mxu0 %v2091_v2  ;;  %v17988_v41 = vpack.c.bf16 %v877_v34, %v472_v33  ;;  %v274_v1 = vld [vmem:[#allocation5 + $0x90] sm:$0xff]  ;;  %v679_v2 = vld [vmem:[#allocation5 + $0xd38] sm:$0x3]  ;;  %v1260_v34 = vcombine.high %v159_v14, %v159_v14 }
  0x67   :  { %17983 = vmatprep.subr.bf16.mxu0 %v17982_v4  ;;  %v2117_v4 = vrot.slane %v209_v62, %v18940_v12  ;;  %v17592_v9 = vpack.c.bf16 %v679_v2, %v274_v1  ;;  %v1259_v10 = vcombine.high %v1257_v0, %v1257_v0  ;;  %v886_v33 = vld [vmem:[#allocation5 + $0x13b0] sm:$0x3]  ;;  %v2141_v62 = vrot.slane %v2127_v57, %v18940_v12  ;;  %v887_v2 = vld [vmem:[#allocation5 + $0x13b8] sm:$0x3] }
  0x68   :  { %v18002_v39 = vpack.c.bf16 %v886_v33, %v481_v32  ;;  %v482_v1 = vld [vmem:[#allocation5 + $0x710] sm:$0xff]  ;;  %v2144_v33 = vcombine.high %v211_v13, %v211_v13 }
  0x69   :  { %v2125_v17 = vcombine.high %v2117_v4, %v2117_v4  ;;  %v2143_v11 = vcombine.high %v2141_v62, %v2141_v62  ;;  %v60_v57 = vld [vmem:[#allocation2 + $0x40] sm:$0xff] }
  0x6a   :  { %v162_v3 = vmax.f32 %v60_v57, 0.0  ;;  %v112_v57 = vld [vmem:[#allocation2 + $0x1e0] sm:$0xff] }
  0x6b   :  { %3727 = vmatmul.mubr.f32.vlgmr.msra.gmra.mrb[0].mxu1 %v1223_v50  ;;  %v680_v50 = vld [vmem:[#allocation5 + $0xd40] sm:$0x3] }
  0x6c   :  { %17581 = vmatpush1.bf16.xpose.msra.mxu1 %v17580_v15  ;;  %3796 = vmatprep.mubr.f32.mxu1 %v1241_v16  ;;  %v17590_v59 = vpack.c.bf16 %v680_v50, %v275_v49 }
  0x6d   :  { %10797 = vmatmul.mubr.f32.vlgmr.msra.gmra.mrb[0].mxu0 %v2083_v54  ;;  %17583 = vmatprep.subr.bf16.mxu1 %v17582_v20  ;;  %v17588_v54 = vpack.c.bf16 %v677_v47, %v272_v46  ;;  %v1267_v20 = vrot.slane %v159_v14, %v18940_v12  ;;  %v686_v46 = vld [vmem:[#allocation5 + $0xd70] sm:$0x3]  ;;  %v480_v47 = vld [vmem:[#allocation5 + $0x700] sm:$0xff] }
  0x6e   :  { %17985 = vmatpush1.bf16.xpose.msra.mxu0 %v17984_v21  ;;  %10866 = vmatprep.mubr.f32.mxu0 %v2092_v22  ;;  %v276_v21 = vld [vmem:[#allocation5 + $0xa0] sm:$0xff]  ;;  %v681_v22 = vld [vmem:[#allocation5 + $0xd48] sm:$0x3] }
  0x6f   :  { %17987 = vmatprep.subr.bf16.mxu0 %v17986_v25  ;;  %v279_v25 = vld [vmem:[#allocation5 + $0xb8] sm:$0xff]  ;;  %v1275_v31 = vcombine.high %v1267_v20, %v1267_v20 }
  0x73   :  { %3797 = vmatmul.mubr.f32.vlgmr.msra.gmra.mrb[0].mxu1 %v1233_v5  ;;  %v277_v5 = vld [vmem:[#allocation5 + $0xa8] sm:$0xff] }
  0x74   :  { %17585 = vmatpush1.bf16.xpose.msra.mxu1 %v17584_v35  ;;  %3866 = vmatprep.mubr.f32.mxu1 %v1242_v36  ;;  %v17594_v15 = vpack.c.bf16 %v682_v6, %v277_v5  ;;  %v18000_v36 = vpack.c.bf16 %v883_v28, %v478_v27  ;;  %v485_v6 = vld [vmem:[#allocation5 + $0x728] sm:$0xff]  ;;  %v487_v27 = vld [vmem:[#allocation5 + $0x738] sm:$0xff]  ;;  %v892_v28 = vld [vmem:[#allocation5 + $0x13e0] sm:$0x3] }
  0x75   :  { %10867 = vmatmul.mubr.f32.vlgmr.msra.gmra.mrb[0].mxu0 %v2090_v8  ;;  %17587 = vmatprep.subr.bf16.mxu1 %v17586_v40  ;;  %v881_v8 = vld [vmem:[#allocation5 + $0x1388] sm:$0x3]  ;;  %v1274_v40 = vrot.slane %v1260_v34, %v18940_v12  ;;  %v18014_v34 = vpack.c.bf16 %v892_v28, %v487_v27  ;;  %v213_v28 = vmax.f32 %v111_v18, 0.0 }
  0x76   :  { %17989 = vmatpush1.bf16.xpose.msra.mxu0 %v17988_v41  ;;  %10936 = vmatprep.mubr.f32.mxu0 %v2108_v42  ;;  %v17996_v16 = vpack.c.bf16 %v881_v8, %v476_v7  ;;  %v278_v41 = vld [vmem:[#allocation5 + $0xb0] sm:$0xff]  ;;  %v683_v42 = vld [vmem:[#allocation5 + $0xd58] sm:$0x3]  ;;  %v1277_v8 = vcombine.high %v160_v53, %v160_v53 }
  0x77   :  { %17991 = vmatprep.subr.bf16.mxu0 %v17990_v44  ;;  %v2134_v44 = vrot.slane %v210_v38, %v18940_v12  ;;  %v17600_v49 = vpack.c.bf16 %v683_v42, %v278_v41  ;;  %v1276_v50 = vcombine.high %v1274_v40, %v1274_v40  ;;  %v890_v7 = vld [vmem:[#allocation5 + $0x13d0] sm:$0x3]  ;;  %v2158_v38 = vrot.slane %v2144_v33, %v18940_v12  ;;  %v891_v42 = vld [vmem:[#allocation5 + $0x13d8] sm:$0x3]  ;;  %v61_v33 = vld [vmem:[#allocation2 + $0x48] sm:$0xff] }
  0x78   :  { %v18010_v14 = vpack.c.bf16 %v890_v7, %v485_v6  ;;  %v486_v41 = vld [vmem:[#allocation5 + $0x730] sm:$0xff]  ;;  %v2161_v7 = vcombine.high %v212_v52, %v212_v52  ;;  %v163_v43 = vmax.f32 %v61_v33, 0.0  ;;  %v113_v33 = vld [vmem:[#allocation2 + $0x1e8] sm:$0xff] }
  0x79   :  { %v2142_v56 = vcombine.high %v2134_v44, %v2134_v44  ;;  %v2160_v51 = vcombine.high %v2158_v38, %v2158_v38 }
  0x7b   :  { %3867 = vmatmul.mubr.f32.vlgmr.msra.gmra.mrb[0].mxu1 %v1240_v26  ;;  %v684_v26 = vld [vmem:[#allocation5 + $0xd60] sm:$0x3] }
  0x7c   :  { %17589 = vmatpush1.bf16.xpose.msra.mxu1 %v17588_v54  ;;  %3936 = vmatprep.mubr.f32.mxu1 %v1258_v55  ;;  %v17598_v35 = vpack.c.bf16 %v684_v26, %v279_v25 }
  0x7d   :  { %10937 = vmatmul.mubr.f32.vlgmr.msra.gmra.mrb[0].mxu0 %v2100_v30  ;;  %17591 = vmatprep.subr.bf16.mxu1 %v17590_v59  ;;  %v17596_v30 = vpack.c.bf16 %v681_v22, %v276_v21  ;;  %v1284_v59 = vrot.slane %v160_v53, %v18940_v12  ;;  %v690_v21 = vld [vmem:[#allocation5 + $0xd90] sm:$0x3]  ;;  %v484_v22 = vld [vmem:[#allocation5 + $0x720] sm:$0xff] }
  0x7e   :  { %17993 = vmatpush1.bf16.xpose.msra.mxu0 %v17992_v60  ;;  %11006 = vmatprep.mubr.f32.mxu0 %v2109_v61  ;;  %v280_v60 = vld [vmem:[#allocation5 + $0xc0] sm:$0xff]  ;;  %v685_v61 = vld [vmem:[#allocation5 + $0xd68] sm:$0x3] }
  0x7f   :  { %17995 = vmatprep.subr.bf16.mxu0 %v17994_v63  ;;  %v283_v63 = vld [vmem:[#allocation5 + $0xd8] sm:$0xff]  ;;  %v1292_v5 = vcombine.high %v1284_v59, %v1284_v59 }
  0x83   :  { %3937 = vmatmul.mubr.f32.vlgmr.msra.gmra.mrb[0].mxu1 %v1250_v45  ;;  %v281_v45 = vld [vmem:[#allocation5 + $0xc8] sm:$0xff] }
  0x84   :  { %17593 = vmatpush1.bf16.xpose.msra.mxu1 %v17592_v9  ;;  %4006 = vmatprep.mubr.f32.mxu1 %v1259_v10  ;;  %v17602_v54 = vpack.c.bf16 %v686_v46, %v281_v45  ;;  %v18008_v10 = vpack.c.bf16 %v887_v2, %v482_v1  ;;  %v489_v46 = vld [vmem:[#allocation5 + $0x748] sm:$0xff]  ;;  %v491_v1 = vld [vmem:[#allocation5 + $0x758] sm:$0xff]  ;;  %v896_v2 = vld [vmem:[#allocation5 + $0x1400] sm:$0x3] }
  0x85   :  { %11007 = vmatmul.mubr.f32.vlgmr.msra.gmra.mrb[0].mxu0 %v2107_v48  ;;  %17595 = vmatprep.subr.bf16.mxu1 %v17594_v15  ;;  %v885_v48 = vld [vmem:[#allocation5 + $0x13a8] sm:$0x3]  ;;  %v1291_v15 = vrot.slane %v1277_v8, %v18940_v12  ;;  %v18022_v8 = vpack.c.bf16 %v896_v2, %v491_v1  ;;  %v214_v2 = vmax.f32 %v112_v57, 0.0 }
  0x86   :  { %17997 = vmatpush1.bf16.xpose.msra.mxu0 %v17996_v16  ;;  %11076 = vmatprep.mubr.f32.mxu0 %v2125_v17  ;;  %v18004_v55 = vpack.c.bf16 %v885_v48, %v480_v47  ;;  %v282_v16 = vld [vmem:[#allocation5 + $0xd0] sm:$0xff]  ;;  %v687_v17 = vld [vmem:[#allocation5 + $0xd78] sm:$0x3]  ;;  %v1294_v48 = vcombine.high %v161_v29, %v161_v29 }
  0x87   :  { %17999 = vmatprep.subr.bf16.mxu0 %v17998_v19  ;;  %v2151_v19 = vrot.slane %v211_v13, %v18940_v12  ;;  %v17608_v25 = vpack.c.bf16 %v687_v17, %v282_v16  ;;  %v1293_v26 = vcombine.high %v1291_v15, %v1291_v15  ;;  %v894_v47 = vld [vmem:[#allocation5 + $0x13f0] sm:$0x3]  ;;  %v2175_v13 = vrot.slane %v2161_v7, %v18940_v12  ;;  %v895_v17 = vld [vmem:[#allocation5 + $0x13f8] sm:$0x3]  ;;  %v62_v7 = vld [vmem:[#allocation2 + $0x50] sm:$0xff] }
  0x88   :  { %v18018_v53 = vpack.c.bf16 %v894_v47, %v489_v46  ;;  %v490_v16 = vld [vmem:[#allocation5 + $0x750] sm:$0xff]  ;;  %v2178_v47 = vcombine.high %v213_v28, %v213_v28  ;;  %v164_v18 = vmax.f32 %v62_v7, 0.0  ;;  %v114_v7 = vld [vmem:[#allocation2 + $0x1f0] sm:$0xff] }
  0x89   :  { %v2159_v32 = vcombine.high %v2151_v19, %v2151_v19  ;;  %v2177_v27 = vcombine.high %v2175_v13, %v2175_v13 }
  0x8b   :  { %4007 = vmatmul.mubr.f32.vlgmr.msra.gmra.mrb[0].mxu1 %v1257_v0  ;;  %v688_v0 = vld [vmem:[#allocation5 + $0xd80] sm:$0x3] }
  0x8c   :  { %17597 = vmatpush1.bf16.xpose.msra.mxu1 %v17596_v30  ;;  %4076 = vmatprep.mubr.f32.mxu1 %v1275_v31  ;;  %v17606_v9 = vpack.c.bf16 %v688_v0, %v283_v63 }
  0x8d   :  { %11077 = vmatmul.mubr.f32.vlgmr.msra.gmra.mrb[0].mxu0 %v2117_v4  ;;  %17599 = vmatprep.subr.bf16.mxu1 %v17598_v35  ;;  %v17604_v4 = vpack.c.bf16 %v685_v61, %v280_v60  ;;  %v1301_v35 = vrot.slane %v161_v29, %v18940_v12  ;;  %v694_v60 = vld [vmem:[#allocation5 + $0xdb0] sm:$0x3]  ;;  %v488_v61 = vld [vmem:[#allocation5 + $0x740] sm:$0xff] }
  0x8e   :  { %18001 = vmatpush1.bf16.xpose.msra.mxu0 %v18000_v36  ;;  %11146 = vmatprep.mubr.f32.mxu0 %v2126_v37  ;;  %v284_v36 = vld [vmem:[#allocation5 + $0xe0] sm:$0xff]  ;;  %v689_v37 = vld [vmem:[#allocation5 + $0xd88] sm:$0x3] }
  0x8f   :  { %18003 = vmatprep.subr.bf16.mxu0 %v18002_v39  ;;  %v287_v39 = vld [vmem:[#allocation5 + $0xf8] sm:$0xff]  ;;  %v1309_v45 = vcombine.high %v1301_v35, %v1301_v35 }
  0x93   :  { %4077 = vmatmul.mubr.f32.vlgmr.msra.gmra.mrb[0].mxu1 %v1267_v20  ;;  %v285_v20 = vld [vmem:[#allocation5 + $0xe8] sm:$0xff] }
  0x94   :  { %17601 = vmatpush1.bf16.xpose.msra.mxu1 %v17600_v49  ;;  %4146 = vmatprep.mubr.f32.mxu1 %v1276_v50  ;;  %v17610_v30 = vpack.c.bf16 %v690_v21, %v285_v20  ;;  %v18016_v50 = vpack.c.bf16 %v891_v42, %v486_v41  ;;  %v493_v21 = vld [vmem:[#allocation5 + $0x768] sm:$0xff]  ;;  %v495_v41 = vld [vmem:[#allocation5 + $0x778] sm:$0xff]  ;;  %v900_v42 = vld [vmem:[#allocation5 + $0x1420] sm:$0x3] }
  0x95   :  { %11147 = vmatmul.mubr.f32.vlgmr.msra.gmra.mrb[0].mxu0 %v2124_v24  ;;  %17603 = vmatprep.subr.bf16.mxu1 %v17602_v54  ;;  %v889_v24 = vld [vmem:[#allocation5 + $0x13c8] sm:$0x3]  ;;  %v1308_v54 = vrot.slane %v1294_v48, %v18940_v12  ;;  %v18030_v48 = vpack.c.bf16 %v900_v42, %v495_v41  ;;  %v215_v42 = vmax.f32 %v113_v33, 0.0 }
  0x96   :  { %18005 = vmatpush1.bf16.xpose.msra.mxu0 %v18004_v55  ;;  %11216 = vmatprep.mubr.f32.mxu0 %v2142_v56  ;;  %v18012_v31 = vpack.c.bf16 %v889_v24, %v484_v22  ;;  %v286_v55 = vld [vmem:[#allocation5 + $0xf0] sm:$0xff]  ;;  %v691_v56 = vld [vmem:[#allocation5 + $0xd98] sm:$0x3]  ;;  %v1311_v24 = vcombine.high %v162_v3, %v162_v3 }
  0x97   :  { %18007 = vmatprep.subr.bf16.mxu0 %v18006_v58  ;;  %v2168_v58 = vrot.slane %v212_v52, %v18940_v12  ;;  %v17616_v63 = vpack.c.bf16 %v691_v56, %v286_v55  ;;  %v1310_v0 = vcombine.high %v1308_v54, %v1308_v54  ;;  %v898_v22 = vld [vmem:[#allocation5 + $0x1410] sm:$0x3]  ;;  %v2192_v52 = vrot.slane %v2178_v47, %v18940_v12  ;;  %v899_v56 = vld [vmem:[#allocation5 + $0x1418] sm:$0x3] }
  0x98   :  { %v18026_v29 = vpack.c.bf16 %v898_v22, %v493_v21  ;;  %v494_v55 = vld [vmem:[#allocation5 + $0x770] sm:$0xff]  ;;  %v2195_v22 = vcombine.high %v214_v2, %v214_v2 }
  0x99   :  { %v2176_v6 = vcombine.high %v2168_v58, %v2168_v58  ;;  %v2194_v1 = vcombine.high %v2192_v52, %v2192_v52  ;;  %v63_v47 = vld [vmem:[#allocation2 + $0x58] sm:$0xff] }
  0x9a   :  { %v165_v57 = vmax.f32 %v63_v47, 0.0  ;;  %v115_v47 = vld [vmem:[#allocation2 + $0x1f8] sm:$0xff] }
  0x9b   :  { %4147 = vmatmul.mubr.f32.vlgmr.msra.gmra.mrb[0].mxu1 %v1274_v40  ;;  %v692_v40 = vld [vmem:[#allocation5 + $0xda0] sm:$0x3] }
  0x9c   :  { %17605 = vmatpush1.bf16.xpose.msra.mxu1 %v17604_v4  ;;  %4216 = vmatprep.mubr.f32.mxu1 %v1292_v5  ;;  %v17614_v49 = vpack.c.bf16 %v692_v40, %v287_v39 }
  0x9d   :  { %11217 = vmatmul.mubr.f32.vlgmr.msra.gmra.mrb[0].mxu0 %v2134_v44  ;;  %17607 = vmatprep.subr.bf16.mxu1 %v17606_v9  ;;  %v17612_v44 = vpack.c.bf16 %v689_v37, %v284_v36  ;;  %v1318_v9 = vrot.slane %v162_v3, %v18940_v12  ;;  %v698_v36 = vld [vmem:[#allocation5 + $0xdd0] sm:$0x3]  ;;  %v492_v37 = vld [vmem:[#allocation5 + $0x760] sm:$0xff] }
  0x9e   :  { %18009 = vmatpush1.bf16.xpose.msra.mxu0 %v18008_v10  ;;  %11286 = vmatprep.mubr.f32.mxu0 %v2143_v11  ;;  %v288_v10 = vld [vmem:[#allocation5 + $0x100] sm:$0xff]  ;;  %v693_v11 = vld [vmem:[#allocation5 + $0xda8] sm:$0x3] }
  0x9f   :  { %18011 = vmatprep.subr.bf16.mxu0 %v18010_v14  ;;  %v291_v14 = vld [vmem:[#allocation5 + $0x118] sm:$0xff]  ;;  %v1326_v20 = vcombine.high %v1318_v9, %v1318_v9 }
  0xa3   :  { %4217 = vmatmul.mubr.f32.vlgmr.msra.gmra.mrb[0].mxu1 %v1284_v59  ;;  %v289_v59 = vld [vmem:[#allocation5 + $0x108] sm:$0xff] }
  0xa4   :  { %17609 = vmatpush1.bf16.xpose.msra.mxu1 %v17608_v25  ;;  %4286 = vmatprep.mubr.f32.mxu1 %v1293_v26  ;;  %v17618_v4 = vpack.c.bf16 %v694_v60, %v289_v59  ;;  %v18024_v26 = vpack.c.bf16 %v895_v17, %v490_v16  ;;  %v497_v60 = vld [vmem:[#allocation5 + $0x788] sm:$0xff]  ;;  %v499_v16 = vld [vmem:[#allocation5 + $0x798] sm:$0xff]  ;;  %v904_v17 = vld [vmem:[#allocation5 + $0x1440] sm:$0x3] }
  0xa5   :  { %11287 = vmatmul.mubr.f32.vlgmr.msra.gmra.mrb[0].mxu0 %v2141_v62  ;;  %17611 = vmatprep.subr.bf16.mxu1 %v17610_v30  ;;  %v893_v62 = vld [vmem:[#allocation5 + $0x13e8] sm:$0x3]  ;;  %v1325_v30 = vrot.slane %v1311_v24, %v18940_v12  ;;  %v18038_v24 = vpack.c.bf16 %v904_v17, %v499_v16  ;;  %v216_v17 = vmax.f32 %v114_v7, 0.0 }
  0xa6   :  { %18013 = vmatpush1.bf16.xpose.msra.mxu0 %v18012_v31  ;;  %11356 = vmatprep.mubr.f32.mxu0 %v2159_v32  ;;  %v18020_v5 = vpack.c.bf16 %v893_v62, %v488_v61  ;;  %v290_v31 = vld [vmem:[#allocation5 + $0x110] sm:$0xff]  ;;  %v695_v32 = vld [vmem:[#allocation5 + $0xdb8] sm:$0x3]  ;;  %v1328_v62 = vcombine.high %v163_v43, %v163_v43 }
  0xa7   :  { %18015 = vmatprep.subr.bf16.mxu0 %v18014_v34  ;;  %v2185_v34 = vrot.slane %v213_v28, %v18940_v12  ;;  %v17624_v39 = vpack.c.bf16 %v695_v32, %v290_v31  ;;  %v1327_v40 = vcombine.high %v1325_v30, %v1325_v30  ;;  %v902_v61 = vld [vmem:[#allocation5 + $0x1430] sm:$0x3]  ;;  %v2209_v28 = vrot.slane %v2195_v22, %v18940_v12  ;;  %v903_v32 = vld [vmem:[#allocation5 + $0x1438] sm:$0x3] }
  0xa8   :  { %v18034_v3 = vpack.c.bf16 %v902_v61, %v497_v60  ;;  %v498_v31 = vld [vmem:[#allocation5 + $0x790] sm:$0xff]  ;;  %v2212_v61 = vcombine.high %v215_v42, %v215_v42 }
  0xa9   :  { %v2193_v46 = vcombine.high %v2185_v34, %v2185_v34  ;;  %v2211_v41 = vcombine.high %v2209_v28, %v2209_v28  ;;  %v64_v22 = vld [vmem:[#allocation2 + $0x60] sm:$0xff] }
  0xaa   :  { %v166_v33 = vmax.f32 %v64_v22, 0.0  ;;  %v116_v22 = vld [vmem:[#allocation2 + $0x200] sm:$0xff] }
  0xab   :  { %4287 = vmatmul.mubr.f32.vlgmr.msra.gmra.mrb[0].mxu1 %v1291_v15  ;;  %v696_v15 = vld [vmem:[#allocation5 + $0xdc0] sm:$0x3] }
  0xac   :  { %17613 = vmatpush1.bf16.xpose.msra.mxu1 %v17612_v44  ;;  %4356 = vmatprep.mubr.f32.mxu1 %v1309_v45  ;;  %v17622_v25 = vpack.c.bf16 %v696_v15, %v291_v14 }
  0xad   :  { %11357 = vmatmul.mubr.f32.vlgmr.msra.gmra.mrb[0].mxu0 %v2151_v19  ;;  %17615 = vmatprep.subr.bf16.mxu1 %v17614_v49  ;;  %v17620_v19 = vpack.c.bf16 %v693_v11, %v288_v10  ;;  %v1335_v49 = vrot.slane %v163_v43, %v18940_v12  ;;  %v702_v10 = vld [vmem:[#allocation5 + $0xdf0] sm:$0x3]  ;;  %v496_v11 = vld [vmem:[#allocation5 + $0x780] sm:$0xff] }
  0xae   :  { %18017 = vmatpush1.bf16.xpose.msra.mxu0 %v18016_v50  ;;  %11426 = vmatprep.mubr.f32.mxu0 %v2160_v51  ;;  %v292_v50 = vld [vmem:[#allocation5 + $0x120] sm:$0xff]  ;;  %v697_v51 = vld [vmem:[#allocation5 + $0xdc8] sm:$0x3] }
  0xaf   :  { %18019 = vmatprep.subr.bf16.mxu0 %v18018_v53  ;;  %v295_v53 = vld [vmem:[#allocation5 + $0x138] sm:$0xff]  ;;  %v1343_v59 = vcombine.high %v1335_v49, %v1335_v49 }
  0xb3   :  { %4357 = vmatmul.mubr.f32.vlgmr.msra.gmra.mrb[0].mxu1 %v1301_v35  ;;  %v293_v35 = vld [vmem:[#allocation5 + $0x128] sm:$0xff] }
  0xb4   :  { %17617 = vmatpush1.bf16.xpose.msra.mxu1 %v17616_v63  ;;  %4426 = vmatprep.mubr.f32.mxu1 %v1310_v0  ;;  %v17626_v44 = vpack.c.bf16 %v698_v36, %v293_v35  ;;  %v18032_v0 = vpack.c.bf16 %v899_v56, %v494_v55  ;;  %v501_v36 = vld [vmem:[#allocation5 + $0x7a8] sm:$0xff]  ;;  %v503_v55 = vld [vmem:[#allocation5 + $0x7b8] sm:$0xff]  ;;  %v908_v56 = vld [vmem:[#allocation5 + $0x1460] sm:$0x3] }
  0xb5   :  { %11427 = vmatmul.mubr.f32.vlgmr.msra.gmra.mrb[0].mxu0 %v2158_v38  ;;  %17619 = vmatprep.subr.bf16.mxu1 %v17618_v4  ;;  %v897_v38 = vld [vmem:[#allocation5 + $0x1408] sm:$0x3]  ;;  %v1342_v4 = vrot.slane %v1328_v62, %v18940_v12  ;;  %v18046_v62 = vpack.c.bf16 %v908_v56, %v503_v55  ;;  %v217_v56 = vmax.f32 %v115_v47, 0.0 }
  0xb6   :  { %18021 = vmatpush1.bf16.xpose.msra.mxu0 %v18020_v5  ;;  %11496 = vmatprep.mubr.f32.mxu0 %v2176_v6  ;;  %v18028_v45 = vpack.c.bf16 %v897_v38, %v492_v37  ;;  %v294_v5 = vld [vmem:[#allocation5 + $0x130] sm:$0xff]  ;;  %v699_v6 = vld [vmem:[#allocation5 + $0xdd8] sm:$0x3]  ;;  %v1345_v38 = vcombine.high %v164_v18, %v164_v18 }
  0xb7   :  { %18023 = vmatprep.subr.bf16.mxu0 %v18022_v8  ;;  %v2202_v8 = vrot.slane %v214_v2, %v18940_v12  ;;  %v17632_v14 = vpack.c.bf16 %v699_v6, %v294_v5  ;;  %v1344_v15 = vcombine.high %v1342_v4, %v1342_v4  ;;  %v906_v37 = vld [vmem:[#allocation5 + $0x1450] sm:$0x3]  ;;  %v2226_v2 = vrot.slane %v2212_v61, %v18940_v12  ;;  %v907_v6 = vld [vmem:[#allocation5 + $0x1458] sm:$0x3]  ;;  %v65_v61 = vld [vmem:[#allocation2 + $0x68] sm:$0xff] }
  0xb8   :  { %v18042_v43 = vpack.c.bf16 %v906_v37, %v501_v36  ;;  %v502_v5 = vld [vmem:[#allocation5 + $0x7b0] sm:$0xff]  ;;  %v2229_v37 = vcombine.high %v216_v17, %v216_v17  ;;  %v167_v7 = vmax.f32 %v65_v61, 0.0  ;;  %v117_v61 = vld [vmem:[#allocation2 + $0x208] sm:$0xff] }
  0xb9   :  { %v2210_v21 = vcombine.high %v2202_v8, %v2202_v8  ;;  %v2228_v16 = vcombine.high %v2226_v2, %v2226_v2 }
  0xbb   :  { %4427 = vmatmul.mubr.f32.vlgmr.msra.gmra.mrb[0].mxu1 %v1308_v54  ;;  %v700_v54 = vld [vmem:[#allocation5 + $0xde0] sm:$0x3] }
  0xbc   :  { %17621 = vmatpush1.bf16.xpose.msra.mxu1 %v17620_v19  ;;  %4496 = vmatprep.mubr.f32.mxu1 %v1326_v20  ;;  %v17630_v63 = vpack.c.bf16 %v700_v54, %v295_v53 }
  0xbd   :  { %11497 = vmatmul.mubr.f32.vlgmr.msra.gmra.mrb[0].mxu0 %v2168_v58  ;;  %17623 = vmatprep.subr.bf16.mxu1 %v17622_v25  ;;  %v17628_v58 = vpack.c.bf16 %v697_v51, %v292_v50  ;;  %v1352_v25 = vrot.slane %v164_v18, %v18940_v12  ;;  %v706_v50 = vld [vmem:[#allocation5 + $0xe10] sm:$0x3]  ;;  %v500_v51 = vld [vmem:[#allocation5 + $0x7a0] sm:$0xff] }
  0xbe   :  { %18025 = vmatpush1.bf16.xpose.msra.mxu0 %v18024_v26  ;;  %11566 = vmatprep.mubr.f32.mxu0 %v2177_v27  ;;  %v296_v26 = vld [vmem:[#allocation5 + $0x140] sm:$0xff]  ;;  %v701_v27 = vld [vmem:[#allocation5 + $0xde8] sm:$0x3] }
  0xbf   :  { %18027 = vmatprep.subr.bf16.mxu0 %v18026_v29  ;;  %v299_v29 = vld [vmem:[#allocation5 + $0x158] sm:$0xff]  ;;  %v1360_v35 = vcombine.high %v1352_v25, %v1352_v25 }
  0xc3   :  { %4497 = vmatmul.mubr.f32.vlgmr.msra.gmra.mrb[0].mxu1 %v1318_v9  ;;  %v297_v9 = vld [vmem:[#allocation5 + $0x148] sm:$0xff] }
  0xc4   :  { %17625 = vmatpush1.bf16.xpose.msra.mxu1 %v17624_v39  ;;  %4566 = vmatprep.mubr.f32.mxu1 %v1327_v40  ;;  %v17634_v19 = vpack.c.bf16 %v702_v10, %v297_v9  ;;  %v18040_v40 = vpack.c.bf16 %v903_v32, %v498_v31  ;;  %v505_v10 = vld [vmem:[#allocation5 + $0x7c8] sm:$0xff]  ;;  %v507_v31 = vld [vmem:[#allocation5 + $0x7d8] sm:$0xff]  ;;  %v912_v32 = vld [vmem:[#allocation5 + $0x1480] sm:$0x3] }
  0xc5   :  { %11567 = vmatmul.mubr.f32.vlgmr.msra.gmra.mrb[0].mxu0 %v2175_v13  ;;  %17627 = vmatprep.subr.bf16.mxu1 %v17626_v44  ;;  %v901_v13 = vld [vmem:[#allocation5 + $0x1428] sm:$0x3]  ;;  %v1359_v44 = vrot.slane %v1345_v38, %v18940_v12  ;;  %v18054_v38 = vpack.c.bf16 %v912_v32, %v507_v31  ;;  %v218_v32 = vmax.f32 %v116_v22, 0.0 }
  0xc6   :  { %18029 = vmatpush1.bf16.xpose.msra.mxu0 %v18028_v45  ;;  %11636 = vmatprep.mubr.f32.mxu0 %v2193_v46  ;;  %v18036_v20 = vpack.c.bf16 %v901_v13, %v496_v11  ;;  %v298_v45 = vld [vmem:[#allocation5 + $0x150] sm:$0xff]  ;;  %v703_v46 = vld [vmem:[#allocation5 + $0xdf8] sm:$0x3]  ;;  %v1362_v13 = vcombine.high %v165_v57, %v165_v57 }
  0xc7   :  { %18031 = vmatprep.subr.bf16.mxu0 %v18030_v48  ;;  %v2219_v48 = vrot.slane %v215_v42, %v18940_v12  ;;  %v17640_v53 = vpack.c.bf16 %v703_v46, %v298_v45  ;;  %v1361_v54 = vcombine.high %v1359_v44, %v1359_v44  ;;  %v910_v11 = vld [vmem:[#allocation5 + $0x1470] sm:$0x3]  ;;  %v2243_v42 = vrot.slane %v2229_v37, %v18940_v12  ;;  %v911_v46 = vld [vmem:[#allocation5 + $0x1478] sm:$0x3]  ;;  %v66_v37 = vld [vmem:[#allocation2 + $0x70] sm:$0xff] }
  0xc8   :  { %v18050_v18 = vpack.c.bf16 %v910_v11, %v505_v10  ;;  %v506_v45 = vld [vmem:[#allocation5 + $0x7d0] sm:$0xff]  ;;  %v2246_v11 = vcombine.high %v217_v56, %v217_v56  ;;  %v168_v47 = vmax.f32 %v66_v37, 0.0  ;;  %v118_v37 = vld [vmem:[#allocation2 + $0x210] sm:$0xff] }
  0xc9   :  { %v2227_v60 = vcombine.high %v2219_v48, %v2219_v48  ;;  %v2245_v55 = vcombine.high %v2243_v42, %v2243_v42 }
  0xcb   :  { %4567 = vmatmul.mubr.f32.vlgmr.msra.gmra.mrb[0].mxu1 %v1325_v30  ;;  %v704_v30 = vld [vmem:[#allocation5 + $0xe00] sm:$0x3] }
  0xcc   :  { %17629 = vmatpush1.bf16.xpose.msra.mxu1 %v17628_v58  ;;  %4636 = vmatprep.mubr.f32.mxu1 %v1343_v59  ;;  %v17638_v39 = vpack.c.bf16 %v704_v30, %v299_v29 }
  0xcd   :  { %11637 = vmatmul.mubr.f32.vlgmr.msra.gmra.mrb[0].mxu0 %v2185_v34  ;;  %17631 = vmatprep.subr.bf16.mxu1 %v17630_v63  ;;  %v17636_v34 = vpack.c.bf16 %v701_v27, %v296_v26  ;;  %v1369_v63 = vrot.slane %v165_v57, %v18940_v12  ;;  %v710_v26 = vld [vmem:[#allocation5 + $0xe30] sm:$0x3]  ;;  %v504_v27 = vld [vmem:[#allocation5 + $0x7c0] sm:$0xff] }
  0xce   :  { %18033 = vmatpush1.bf16.xpose.msra.mxu0 %v18032_v0  ;;  %11706 = vmatprep.mubr.f32.mxu0 %v2194_v1  ;;  %v300_v0 = vld [vmem:[#allocation5 + $0x160] sm:$0xff]  ;;  %v705_v1 = vld [vmem:[#allocation5 + $0xe08] sm:$0x3] }
  0xcf   :  { %18035 = vmatprep.subr.bf16.mxu0 %v18034_v3  ;;  %v303_v3 = vld [vmem:[#allocation5 + $0x178] sm:$0xff]  ;;  %v1377_v9 = vcombine.high %v1369_v63, %v1369_v63 }
  0xd3   :  { %4637 = vmatmul.mubr.f32.vlgmr.msra.gmra.mrb[0].mxu1 %v1335_v49  ;;  %v301_v49 = vld [vmem:[#allocation5 + $0x168] sm:$0xff] }
  0xd4   :  { %17633 = vmatpush1.bf16.xpose.msra.mxu1 %v17632_v14  ;;  %4706 = vmatprep.mubr.f32.mxu1 %v1344_v15  ;;  %v17642_v58 = vpack.c.bf16 %v706_v50, %v301_v49  ;;  %v18048_v15 = vpack.c.bf16 %v907_v6, %v502_v5  ;;  %v509_v50 = vld [vmem:[#allocation5 + $0x7e8] sm:$0xff]  ;;  %v511_v5 = vld [vmem:[#allocation5 + $0x7f8] sm:$0xff]  ;;  %v916_v6 = vld [vmem:[#allocation5 + $0x14a0] sm:$0x3] }
  0xd5   :  { %11707 = vmatmul.mubr.f32.vlgmr.msra.gmra.mrb[0].mxu0 %v2192_v52  ;;  %17635 = vmatprep.subr.bf16.mxu1 %v17634_v19  ;;  %v905_v52 = vld [vmem:[#allocation5 + $0x1448] sm:$0x3]  ;;  %v1376_v19 = vrot.slane %v1362_v13, %v18940_v12  ;;  %v18062_v13 = vpack.c.bf16 %v916_v6, %v511_v5  ;;  %v219_v6 = vmax.f32 %v117_v61, 0.0 }
  0xd6   :  { %18037 = vmatpush1.bf16.xpose.msra.mxu0 %v18036_v20  ;;  %11776 = vmatprep.mubr.f32.mxu0 %v2210_v21  ;;  %v18044_v59 = vpack.c.bf16 %v905_v52, %v500_v51  ;;  %v302_v20 = vld [vmem:[#allocation5 + $0x170] sm:$0xff]  ;;  %v707_v21 = vld [vmem:[#allocation5 + $0xe18] sm:$0x3]  ;;  %v1379_v52 = vcombine.high %v166_v33, %v166_v33 }
  0xd7   :  { %18039 = vmatprep.subr.bf16.mxu0 %v18038_v24  ;;  %v2236_v24 = vrot.slane %v216_v17, %v18940_v12  ;;  %v17648_v29 = vpack.c.bf16 %v707_v21, %v302_v20  ;;  %v1378_v30 = vcombine.high %v1376_v19, %v1376_v19  ;;  %v914_v51 = vld [vmem:[#allocation5 + $0x1490] sm:$0x3]  ;;  %v2260_v17 = vrot.slane %v2246_v11, %v18940_v12  ;;  %v915_v21 = vld [vmem:[#allocation5 + $0x1498] sm:$0x3] }
  0xd8   :  { %v18058_v57 = vpack.c.bf16 %v914_v51, %v509_v50  ;;  %v510_v20 = vld [vmem:[#allocation5 + $0x7f0] sm:$0xff]  ;;  %v2263_v51 = vcombine.high %v218_v32, %v218_v32 }
  0xd9   :  { %v2244_v36 = vcombine.high %v2236_v24, %v2236_v24  ;;  %v2262_v31 = vcombine.high %v2260_v17, %v2260_v17  ;;  %v67_v11 = vld [vmem:[#allocation2 + $0x78] sm:$0xff] }
  0xda   :  { %v169_v22 = vmax.f32 %v67_v11, 0.0  ;;  %v119_v11 = vld [vmem:[#allocation2 + $0x218] sm:$0xff] }
  0xdb   :  { %4707 = vmatmul.mubr.f32.vlgmr.msra.gmra.mrb[0].mxu1 %v1342_v4  ;;  %v708_v4 = vld [vmem:[#allocation5 + $0xe20] sm:$0x3] }
  0xdc   :  { %17637 = vmatpush1.bf16.xpose.msra.mxu1 %v17636_v34  ;;  %4776 = vmatprep.mubr.f32.mxu1 %v1360_v35  ;;  %v17646_v14 = vpack.c.bf16 %v708_v4, %v303_v3 }
  0xdd   :  { %11777 = vmatmul.mubr.f32.vlgmr.msra.gmra.mrb[0].mxu0 %v2202_v8  ;;  %17639 = vmatprep.subr.bf16.mxu1 %v17638_v39  ;;  %v17644_v8 = vpack.c.bf16 %v705_v1, %v300_v0  ;;  %v1386_v39 = vrot.slane %v166_v33, %v18940_v12  ;;  %v714_v0 = vld [vmem:[#allocation5 + $0xe50] sm:$0x3]  ;;  %v508_v1 = vld [vmem:[#allocation5 + $0x7e0] sm:$0xff] }
  0xde   :  { %18041 = vmatpush1.bf16.xpose.msra.mxu0 %v18040_v40  ;;  %11846 = vmatprep.mubr.f32.mxu0 %v2211_v41  ;;  %v304_v40 = vld [vmem:[#allocation5 + $0x180] sm:$0xff]  ;;  %v709_v41 = vld [vmem:[#allocation5 + $0xe28] sm:$0x3] }
  0xdf   :  { %18043 = vmatprep.subr.bf16.mxu0 %v18042_v43  ;;  %v307_v43 = vld [vmem:[#allocation5 + $0x198] sm:$0xff]  ;;  %v1394_v49 = vcombine.high %v1386_v39, %v1386_v39 }
  0xe3   :  { %4777 = vmatmul.mubr.f32.vlgmr.msra.gmra.mrb[0].mxu1 %v1352_v25  ;;  %v305_v25 = vld [vmem:[#allocation5 + $0x188] sm:$0xff] }
  0xe4   :  { %17641 = vmatpush1.bf16.xpose.msra.mxu1 %v17640_v53  ;;  %4846 = vmatprep.mubr.f32.mxu1 %v1361_v54  ;;  %v17650_v34 = vpack.c.bf16 %v710_v26, %v305_v25  ;;  %v18056_v54 = vpack.c.bf16 %v911_v46, %v506_v45  ;;  %v513_v26 = vld [vmem:[#allocation5 + $0x808] sm:$0xff]  ;;  %v515_v45 = vld [vmem:[#allocation5 + $0x818] sm:$0xff]  ;;  %v920_v46 = vld [vmem:[#allocation5 + $0x14c0] sm:$0x3] }
  0xe5   :  { %11847 = vmatmul.mubr.f32.vlgmr.msra.gmra.mrb[0].mxu0 %v2209_v28  ;;  %17643 = vmatprep.subr.bf16.mxu1 %v17642_v58  ;;  %v909_v28 = vld [vmem:[#allocation5 + $0x1468] sm:$0x3]  ;;  %v1393_v58 = vrot.slane %v1379_v52, %v18940_v12  ;;  %v18070_v52 = vpack.c.bf16 %v920_v46, %v515_v45  ;;  %v220_v46 = vmax.f32 %v118_v37, 0.0 }
  0xe6   :  { %18045 = vmatpush1.bf16.xpose.msra.mxu0 %v18044_v59  ;;  %11916 = vmatprep.mubr.f32.mxu0 %v2227_v60  ;;  %v18052_v35 = vpack.c.bf16 %v909_v28, %v504_v27  ;;  %v306_v59 = vld [vmem:[#allocation5 + $0x190] sm:$0xff]  ;;  %v711_v60 = vld [vmem:[#allocation5 + $0xe38] sm:$0x3]  ;;  %v1396_v28 = vcombine.high %v167_v7, %v167_v7 }
  0xe7   :  { %18047 = vmatprep.subr.bf16.mxu0 %v18046_v62  ;;  %v2253_v62 = vrot.slane %v217_v56, %v18940_v12  ;;  %v17656_v3 = vpack.c.bf16 %v711_v60, %v306_v59  ;;  %v1395_v4 = vcombine.high %v1393_v58, %v1393_v58  ;;  %v918_v27 = vld [vmem:[#allocation5 + $0x14b0] sm:$0x3]  ;;  %v2277_v56 = vrot.slane %v2263_v51, %v18940_v12  ;;  %v919_v60 = vld [vmem:[#allocation5 + $0x14b8] sm:$0x3] }
  0xe8   :  { %v18066_v33 = vpack.c.bf16 %v918_v27, %v513_v26  ;;  %v514_v59 = vld [vmem:[#allocation5 + $0x810] sm:$0xff]  ;;  %v2280_v27 = vcombine.high %v219_v6, %v219_v6 }
  0xe9   :  { %v2261_v10 = vcombine.high %v2253_v62, %v2253_v62  ;;  %v2279_v5 = vcombine.high %v2277_v56, %v2277_v56  ;;  %v68_v51 = vld [vmem:[#allocation2 + $0x80] sm:$0xff] }
  0xea   :  { %v170_v61 = vmax.f32 %v68_v51, 0.0  ;;  %v120_v51 = vld [vmem:[#allocation2 + $0x220] sm:$0xff] }
  0xeb   :  { %4847 = vmatmul.mubr.f32.vlgmr.msra.gmra.mrb[0].mxu1 %v1359_v44  ;;  %v712_v44 = vld [vmem:[#allocation5 + $0xe40] sm:$0x3] }
  0xec   :  { %17645 = vmatpush1.bf16.xpose.msra.mxu1 %v17644_v8  ;;  %4916 = vmatprep.mubr.f32.mxu1 %v1377_v9  ;;  %v17654_v53 = vpack.c.bf16 %v712_v44, %v307_v43 }
  0xed   :  { %11917 = vmatmul.mubr.f32.vlgmr.msra.gmra.mrb[0].mxu0 %v2219_v48  ;;  %17647 = vmatprep.subr.bf16.mxu1 %v17646_v14  ;;  %v17652_v48 = vpack.c.bf16 %v709_v41, %v304_v40  ;;  %v1403_v14 = vrot.slane %v167_v7, %v18940_v12  ;;  %v718_v40 = vld [vmem:[#allocation5 + $0xe70] sm:$0x3]  ;;  %v512_v41 = vld [vmem:[#allocation5 + $0x800] sm:$0xff] }
  0xee   :  { %18049 = vmatpush1.bf16.xpose.msra.mxu0 %v18048_v15  ;;  %11986 = vmatprep.mubr.f32.mxu0 %v2228_v16  ;;  %v308_v15 = vld [vmem:[#allocation5 + $0x1a0] sm:$0xff]  ;;  %v713_v16 = vld [vmem:[#allocation5 + $0xe48] sm:$0x3] }
  0xef   :  { %18051 = vmatprep.subr.bf16.mxu0 %v18050_v18  ;;  %v311_v18 = vld [vmem:[#allocation5 + $0x1b8] sm:$0xff]  ;;  %v1411_v25 = vcombine.high %v1403_v14, %v1403_v14 }
  0xf3   :  { %4917 = vmatmul.mubr.f32.vlgmr.msra.gmra.mrb[0].mxu1 %v1369_v63  ;;  %v309_v63 = vld [vmem:[#allocation5 + $0x1a8] sm:$0xff] }
  0xf4   :  { %17649 = vmatpush1.bf16.xpose.msra.mxu1 %v17648_v29  ;;  %4986 = vmatprep.mubr.f32.mxu1 %v1378_v30  ;;  %v17658_v8 = vpack.c.bf16 %v714_v0, %v309_v63  ;;  %v18064_v30 = vpack.c.bf16 %v915_v21, %v510_v20  ;;  %v517_v0 = vld [vmem:[#allocation5 + $0x828] sm:$0xff]  ;;  %v519_v20 = vld [vmem:[#allocation5 + $0x838] sm:$0xff]  ;;  %v924_v21 = vld [vmem:[#allocation5 + $0x14e0] sm:$0x3] }
  0xf5   :  { %11987 = vmatmul.mubr.f32.vlgmr.msra.gmra.mrb[0].mxu0 %v2226_v2  ;;  %17651 = vmatprep.subr.bf16.mxu1 %v17650_v34  ;;  %v913_v2 = vld [vmem:[#allocation5 + $0x1488] sm:$0x3]  ;;  %v1410_v34 = vrot.slane %v1396_v28, %v18940_v12  ;;  %v18078_v28 = vpack.c.bf16 %v924_v21, %v519_v20  ;;  %v221_v21 = vmax.f32 %v119_v11, 0.0 }
  0xf6   :  { %18053 = vmatpush1.bf16.xpose.msra.mxu0 %v18052_v35  ;;  %12056 = vmatprep.mubr.f32.mxu0 %v2244_v36  ;;  %v18060_v9 = vpack.c.bf16 %v913_v2, %v508_v1  ;;  %v310_v35 = vld [vmem:[#allocation5 + $0x1b0] sm:$0xff]  ;;  %v715_v36 = vld [vmem:[#allocation5 + $0xe58] sm:$0x3]  ;;  %v1413_v2 = vcombine.high %v168_v47, %v168_v47 }
  0xf7   :  { %18055 = vmatprep.subr.bf16.mxu0 %v18054_v38  ;;  %v2270_v38 = vrot.slane %v218_v32, %v18940_v12  ;;  %v17664_v43 = vpack.c.bf16 %v715_v36, %v310_v35  ;;  %v1412_v44 = vcombine.high %v1410_v34, %v1410_v34  ;;  %v922_v1 = vld [vmem:[#allocation5 + $0x14d0] sm:$0x3]  ;;  %v2294_v32 = vrot.slane %v2280_v27, %v18940_v12  ;;  %v923_v36 = vld [vmem:[#allocation5 + $0x14d8] sm:$0x3]  ;;  %v69_v27 = vld [vmem:[#allocation2 + $0x88] sm:$0xff] }
  0xf8   :  { %v18074_v7 = vpack.c.bf16 %v922_v1, %v517_v0  ;;  %v518_v35 = vld [vmem:[#allocation5 + $0x830] sm:$0xff]  ;;  %v2297_v1 = vcombine.high %v220_v46, %v220_v46  ;;  %v171_v37 = vmax.f32 %v69_v27, 0.0  ;;  %v121_v27 = vld [vmem:[#allocation2 + $0x228] sm:$0xff] }
  0xf9   :  { %v2278_v50 = vcombine.high %v2270_v38, %v2270_v38  ;;  %v2296_v45 = vcombine.high %v2294_v32, %v2294_v32 }
  0xfb   :  { %4987 = vmatmul.mubr.f32.vlgmr.msra.gmra.mrb[0].mxu1 %v1376_v19  ;;  %v716_v19 = vld [vmem:[#allocation5 + $0xe60] sm:$0x3] }
  0xfc   :  { %17653 = vmatpush1.bf16.xpose.msra.mxu1 %v17652_v48  ;;  %5056 = vmatprep.mubr.f32.mxu1 %v1394_v49  ;;  %v17662_v29 = vpack.c.bf16 %v716_v19, %v311_v18 }
  0xfd   :  { %12057 = vmatmul.mubr.f32.vlgmr.msra.gmra.mrb[0].mxu0 %v2236_v24  ;;  %17655 = vmatprep.subr.bf16.mxu1 %v17654_v53  ;;  %v17660_v24 = vpack.c.bf16 %v713_v16, %v308_v15  ;;  %v1420_v53 = vrot.slane %v168_v47, %v18940_v12  ;;  %v722_v15 = vld [vmem:[#allocation5 + $0xe90] sm:$0x3]  ;;  %v516_v16 = vld [vmem:[#allocation5 + $0x820] sm:$0xff] }
  0xfe   :  { %18057 = vmatpush1.bf16.xpose.msra.mxu0 %v18056_v54  ;;  %12126 = vmatprep.mubr.f32.mxu0 %v2245_v55  ;;  %v312_v54 = vld [vmem:[#allocation5 + $0x1c0] sm:$0xff]  ;;  %v717_v55 = vld [vmem:[#allocation5 + $0xe68] sm:$0x3] }
  0xff   :  { %18059 = vmatprep.subr.bf16.mxu0 %v18058_v57  ;;  %v315_v57 = vld [vmem:[#allocation5 + $0x1d8] sm:$0xff]  ;;  %v1428_v63 = vcombine.high %v1420_v53, %v1420_v53 }
 0x103   :  { %5057 = vmatmul.mubr.f32.vlgmr.msra.gmra.mrb[0].mxu1 %v1386_v39  ;;  %v313_v39 = vld [vmem:[#allocation5 + $0x1c8] sm:$0xff] }
 0x104   :  { %17657 = vmatpush1.bf16.xpose.msra.mxu1 %v17656_v3  ;;  %5126 = vmatprep.mubr.f32.mxu1 %v1395_v4  ;;  %v17666_v48 = vpack.c.bf16 %v718_v40, %v313_v39  ;;  %v18072_v4 = vpack.c.bf16 %v919_v60, %v514_v59  ;;  %v521_v40 = vld [vmem:[#allocation5 + $0x848] sm:$0xff]  ;;  %v523_v59 = vld [vmem:[#allocation5 + $0x858] sm:$0xff]  ;;  %v928_v60 = vld [vmem:[#allocation5 + $0x1500] sm:$0x3] }
 0x105   :  { %12127 = vmatmul.mubr.f32.vlgmr.msra.gmra.mrb[0].mxu0 %v2243_v42  ;;  %17659 = vmatprep.subr.bf16.mxu1 %v17658_v8  ;;  %v917_v42 = vld [vmem:[#allocation5 + $0x14a8] sm:$0x3]  ;;  %v1427_v8 = vrot.slane %v1413_v2, %v18940_v12  ;;  %v18086_v2 = vpack.c.bf16 %v928_v60, %v523_v59  ;;  %v222_v60 = vmax.f32 %v120_v51, 0.0 }
 0x106   :  { %18061 = vmatpush1.bf16.xpose.msra.mxu0 %v18060_v9  ;;  %12196 = vmatprep.mubr.f32.mxu0 %v2261_v10  ;;  %v18068_v49 = vpack.c.bf16 %v917_v42, %v512_v41  ;;  %v314_v9 = vld [vmem:[#allocation5 + $0x1d0] sm:$0xff]  ;;  %v719_v10 = vld [vmem:[#allocation5 + $0xe78] sm:$0x3]  ;;  %v1430_v42 = vcombine.high %v169_v22, %v169_v22 }
 0x107   :  { %18063 = vmatprep.subr.bf16.mxu0 %v18062_v13  ;;  %v2287_v13 = vrot.slane %v219_v6, %v18940_v12  ;;  %v17672_v18 = vpack.c.bf16 %v719_v10, %v314_v9  ;;  %v1429_v19 = vcombine.high %v1427_v8, %v1427_v8  ;;  %v926_v41 = vld [vmem:[#allocation5 + $0x14f0] sm:$0x3]  ;;  %v2311_v6 = vrot.slane %v2297_v1, %v18940_v12  ;;  %v927_v10 = vld [vmem:[#allocation5 + $0x14f8] sm:$0x3]  ;;  %v70_v1 = vld [vmem:[#allocation2 + $0x90] sm:$0xff] }
 0x108   :  { %v18082_v47 = vpack.c.bf16 %v926_v41, %v521_v40  ;;  %v522_v9 = vld [vmem:[#allocation5 + $0x850] sm:$0xff]  ;;  %v2314_v41 = vcombine.high %v221_v21, %v221_v21  ;;  %v172_v11 = vmax.f32 %v70_v1, 0.0  ;;  %v122_v1 = vld [vmem:[#allocation2 + $0x230] sm:$0xff] }
 0x109   :  { %v2295_v26 = vcombine.high %v2287_v13, %v2287_v13  ;;  %v2313_v20 = vcombine.high %v2311_v6, %v2311_v6 }
 0x10b   :  { %5127 = vmatmul.mubr.f32.vlgmr.msra.gmra.mrb[0].mxu1 %v1393_v58  ;;  %v720_v58 = vld [vmem:[#allocation5 + $0xe80] sm:$0x3] }
 0x10c   :  { %17661 = vmatpush1.bf16.xpose.msra.mxu1 %v17660_v24  ;;  %5196 = vmatprep.mubr.f32.mxu1 %v1411_v25  ;;  %v17670_v3 = vpack.c.bf16 %v720_v58, %v315_v57 }
 0x10d   :  { %12197 = vmatmul.mubr.f32.vlgmr.msra.gmra.mrb[0].mxu0 %v2253_v62  ;;  %17663 = vmatprep.subr.bf16.mxu1 %v17662_v29  ;;  %v17668_v62 = vpack.c.bf16 %v717_v55, %v312_v54  ;;  %v1437_v29 = vrot.slane %v169_v22, %v18940_v12  ;;  %v726_v54 = vld [vmem:[#allocation5 + $0xeb0] sm:$0x3]  ;;  %v520_v55 = vld [vmem:[#allocation5 + $0x840] sm:$0xff] }
 0x10e   :  { %18065 = vmatpush1.bf16.xpose.msra.mxu0 %v18064_v30  ;;  %12266 = vmatprep.mubr.f32.mxu0 %v2262_v31  ;;  %v316_v30 = vld [vmem:[#allocation5 + $0x1e0] sm:$0xff]  ;;  %v721_v31 = vld [vmem:[#allocation5 + $0xe88] sm:$0x3] }
 0x10f   :  { %18067 = vmatprep.subr.bf16.mxu0 %v18066_v33  ;;  %v319_v33 = vld [vmem:[#allocation5 + $0x1f8] sm:$0xff]  ;;  %v1445_v39 = vcombine.high %v1437_v29, %v1437_v29 }
 0x113   :  { %5197 = vmatmul.mubr.f32.vlgmr.msra.gmra.mrb[0].mxu1 %v1403_v14  ;;  %v317_v14 = vld [vmem:[#allocation5 + $0x1e8] sm:$0xff] }
 0x114   :  { %17665 = vmatpush1.bf16.xpose.msra.mxu1 %v17664_v43  ;;  %5266 = vmatprep.mubr.f32.mxu1 %v1412_v44  ;;  %v17674_v24 = vpack.c.bf16 %v722_v15, %v317_v14  ;;  %v18080_v44 = vpack.c.bf16 %v923_v36, %v518_v35  ;;  %v525_v15 = vld [vmem:[#allocation5 + $0x868] sm:$0xff]  ;;  %v527_v35 = vld [vmem:[#allocation5 + $0x878] sm:$0xff]  ;;  %v932_v36 = vld [vmem:[#allocation5 + $0x1520] sm:$0x3] }
 0x115   :  { %12267 = vmatmul.mubr.f32.vlgmr.msra.gmra.mrb[0].mxu0 %v2260_v17  ;;  %17667 = vmatprep.subr.bf16.mxu1 %v17666_v48  ;;  %v921_v17 = vld [vmem:[#allocation5 + $0x14c8] sm:$0x3]  ;;  %v1444_v48 = vrot.slane %v1430_v42, %v18940_v12  ;;  %v18094_v42 = vpack.c.bf16 %v932_v36, %v527_v35  ;;  %v223_v36 = vmax.f32 %v121_v27, 0.0 }
 0x116   :  { %18069 = vmatpush1.bf16.xpose.msra.mxu0 %v18068_v49  ;;  %12336 = vmatprep.mubr.f32.mxu0 %v2278_v50  ;;  %v18076_v25 = vpack.c.bf16 %v921_v17, %v516_v16  ;;  %v318_v49 = vld [vmem:[#allocation5 + $0x1f0] sm:$0xff]  ;;  %v723_v50 = vld [vmem:[#allocation5 + $0xe98] sm:$0x3]  ;;  %v1447_v17 = vcombine.high %v170_v61, %v170_v61 }
 0x117   :  { %18071 = vmatprep.subr.bf16.mxu0 %v18070_v52  ;;  %v2304_v52 = vrot.slane %v220_v46, %v18940_v12  ;;  %v17680_v57 = vpack.c.bf16 %v723_v50, %v318_v49  ;;  %v1446_v58 = vcombine.high %v1444_v48, %v1444_v48  ;;  %v930_v16 = vld [vmem:[#allocation5 + $0x1510] sm:$0x3]  ;;  %v2328_v46 = vrot.slane %v2314_v41, %v18940_v12  ;;  %v931_v50 = vld [vmem:[#allocation5 + $0x1518] sm:$0x3] }
 0x118   :  { %v18090_v22 = vpack.c.bf16 %v930_v16, %v525_v15  ;;  %v526_v49 = vld [vmem:[#allocation5 + $0x870] sm:$0xff]  ;;  %v2331_v16 = vcombine.high %v222_v60, %v222_v60 }
 0x119   :  { %v2312_v0 = vcombine.high %v2304_v52, %v2304_v52  ;;  %v2330_v59 = vcombine.high %v2328_v46, %v2328_v46  ;;  %v71_v41 = vld [vmem:[#allocation2 + $0x98] sm:$0xff] }
 0x11a   :  { %v173_v51 = vmax.f32 %v71_v41, 0.0  ;;  %v123_v41 = vld [vmem:[#allocation2 + $0x238] sm:$0xff] }
 0x11b   :  { %5267 = vmatmul.mubr.f32.vlgmr.msra.gmra.mrb[0].mxu1 %v1410_v34  ;;  %v724_v34 = vld [vmem:[#allocation5 + $0xea0] sm:$0x3] }
 0x11c   :  { %17669 = vmatpush1.bf16.xpose.msra.mxu1 %v17668_v62  ;;  %5336 = vmatprep.mubr.f32.mxu1 %v1428_v63  ;;  %v17678_v43 = vpack.c.bf16 %v724_v34, %v319_v33 }
 0x11d   :  { %12337 = vmatmul.mubr.f32.vlgmr.msra.gmra.mrb[0].mxu0 %v2270_v38  ;;  %17671 = vmatprep.subr.bf16.mxu1 %v17670_v3  ;;  %v17676_v38 = vpack.c.bf16 %v721_v31, %v316_v30  ;;  %v1454_v3 = vrot.slane %v170_v61, %v18940_v12  ;;  %v730_v30 = vld [vmem:[#allocation5 + $0xed0] sm:$0x3]  ;;  %v524_v31 = vld [vmem:[#allocation5 + $0x860] sm:$0xff] }
 0x11e   :  { %18073 = vmatpush1.bf16.xpose.msra.mxu0 %v18072_v4  ;;  %12406 = vmatprep.mubr.f32.mxu0 %v2279_v5  ;;  %v320_v4 = vld [vmem:[#allocation5 + $0x200] sm:$0xff]  ;;  %v725_v5 = vld [vmem:[#allocation5 + $0xea8] sm:$0x3] }
 0x11f   :  { %18075 = vmatprep.subr.bf16.mxu0 %v18074_v7  ;;  %v323_v7 = vld [vmem:[#allocation5 + $0x218] sm:$0xff]  ;;  %v1462_v14 = vcombine.high %v1454_v3, %v1454_v3 }
 0x123   :  { %5337 = vmatmul.mubr.f32.vlgmr.msra.gmra.mrb[0].mxu1 %v1420_v53  ;;  %v321_v53 = vld [vmem:[#allocation5 + $0x208] sm:$0xff] }
 0x124   :  { %17673 = vmatpush1.bf16.xpose.msra.mxu1 %v17672_v18  ;;  %5406 = vmatprep.mubr.f32.mxu1 %v1429_v19  ;;  %v17682_v62 = vpack.c.bf16 %v726_v54, %v321_v53  ;;  %v18088_v19 = vpack.c.bf16 %v927_v10, %v522_v9  ;;  %v529_v54 = vld [vmem:[#allocation5 + $0x888] sm:$0xff]  ;;  %v531_v9 = vld [vmem:[#allocation5 + $0x898] sm:$0xff]  ;;  %v936_v10 = vld [vmem:[#allocation5 + $0x1540] sm:$0x3] }
 0x125   :  { %12407 = vmatmul.mubr.f32.vlgmr.msra.gmra.mrb[0].mxu0 %v2277_v56  ;;  %17675 = vmatprep.subr.bf16.mxu1 %v17674_v24  ;;  %v925_v56 = vld [vmem:[#allocation5 + $0x14e8] sm:$0x3]  ;;  %v1461_v24 = vrot.slane %v1447_v17, %v18940_v12  ;;  %v18102_v17 = vpack.c.bf16 %v936_v10, %v531_v9  ;;  %v224_v10 = vmax.f32 %v122_v1, 0.0 }
 0x126   :  { %18077 = vmatpush1.bf16.xpose.msra.mxu0 %v18076_v25  ;;  %12476 = vmatprep.mubr.f32.mxu0 %v2295_v26  ;;  %v18084_v63 = vpack.c.bf16 %v925_v56, %v520_v55  ;;  %v322_v25 = vld [vmem:[#allocation5 + $0x210] sm:$0xff]  ;;  %v727_v26 = vld [vmem:[#allocation5 + $0xeb8] sm:$0x3]  ;;  %v1464_v56 = vcombine.high %v171_v37, %v171_v37 }
 0x127   :  { %18079 = vmatprep.subr.bf16.mxu0 %v18078_v28  ;;  %v2321_v28 = vrot.slane %v221_v21, %v18940_v12  ;;  %v17688_v33 = vpack.c.bf16 %v727_v26, %v322_v25  ;;  %v1463_v34 = vcombine.high %v1461_v24, %v1461_v24  ;;  %v934_v55 = vld [vmem:[#allocation5 + $0x1530] sm:$0x3]  ;;  %v2345_v21 = vrot.slane %v2331_v16, %v18940_v12  ;;  %v935_v26 = vld [vmem:[#allocation5 + $0x1538] sm:$0x3] }
 0x128   :  { %v18098_v61 = vpack.c.bf16 %v934_v55, %v529_v54  ;;  %v530_v25 = vld [vmem:[#allocation5 + $0x890] sm:$0xff]  ;;  %v2348_v55 = vcombine.high %v223_v36, %v223_v36 }
 0x129   :  { %v2329_v40 = vcombine.high %v2321_v28, %v2321_v28  ;;  %v2347_v35 = vcombine.high %v2345_v21, %v2345_v21  ;;  %v72_v16 = vld [vmem:[#allocation2 + $0xa0] sm:$0xff] }
 0x12a   :  { %v174_v27 = vmax.f32 %v72_v16, 0.0  ;;  %v124_v16 = vld [vmem:[#allocation2 + $0x240] sm:$0xff] }
 0x12b   :  { %5407 = vmatmul.mubr.f32.vlgmr.msra.gmra.mrb[0].mxu1 %v1427_v8  ;;  %v728_v8 = vld [vmem:[#allocation5 + $0xec0] sm:$0x3] }
 0x12c   :  { %17677 = vmatpush1.bf16.xpose.msra.mxu1 %v17676_v38  ;;  %5476 = vmatprep.mubr.f32.mxu1 %v1445_v39  ;;  %v17686_v18 = vpack.c.bf16 %v728_v8, %v323_v7 }
 0x12d   :  { %12477 = vmatmul.mubr.f32.vlgmr.msra.gmra.mrb[0].mxu0 %v2287_v13  ;;  %17679 = vmatprep.subr.bf16.mxu1 %v17678_v43  ;;  %v17684_v13 = vpack.c.bf16 %v725_v5, %v320_v4  ;;  %v1471_v43 = vrot.slane %v171_v37, %v18940_v12  ;;  %v734_v4 = vld [vmem:[#allocation5 + $0xef0] sm:$0x3]  ;;  %v528_v5 = vld [vmem:[#allocation5 + $0x880] sm:$0xff] }
 0x12e   :  { %18081 = vmatpush1.bf16.xpose.msra.mxu0 %v18080_v44  ;;  %12546 = vmatprep.mubr.f32.mxu0 %v2296_v45  ;;  %v324_v44 = vld [vmem:[#allocation5 + $0x220] sm:$0xff]  ;;  %v729_v45 = vld [vmem:[#allocation5 + $0xec8] sm:$0x3] }
 0x12f   :  { %18083 = vmatprep.subr.bf16.mxu0 %v18082_v47  ;;  %v327_v47 = vld [vmem:[#allocation5 + $0x238] sm:$0xff]  ;;  %v1479_v53 = vcombine.high %v1471_v43, %v1471_v43 }
 0x133   :  { %5477 = vmatmul.mubr.f32.vlgmr.msra.gmra.mrb[0].mxu1 %v1437_v29  ;;  %v325_v29 = vld [vmem:[#allocation5 + $0x228] sm:$0xff] }
 0x134   :  { %17681 = vmatpush1.bf16.xpose.msra.mxu1 %v17680_v57  ;;  %5546 = vmatprep.mubr.f32.mxu1 %v1446_v58  ;;  %v17690_v38 = vpack.c.bf16 %v730_v30, %v325_v29  ;;  %v18096_v58 = vpack.c.bf16 %v931_v50, %v526_v49  ;;  %v533_v30 = vld [vmem:[#allocation5 + $0x8a8] sm:$0xff]  ;;  %v535_v49 = vld [vmem:[#allocation5 + $0x8b8] sm:$0xff]  ;;  %v940_v50 = vld [vmem:[#allocation5 + $0x1560] sm:$0x3] }
 0x135   :  { %12547 = vmatmul.mubr.f32.vlgmr.msra.gmra.mrb[0].mxu0 %v2294_v32  ;;  %17683 = vmatprep.subr.bf16.mxu1 %v17682_v62  ;;  %v929_v32 = vld [vmem:[#allocation5 + $0x1508] sm:$0x3]  ;;  %v1478_v62 = vrot.slane %v1464_v56, %v18940_v12  ;;  %v18110_v56 = vpack.c.bf16 %v940_v50, %v535_v49  ;;  %v225_v50 = vmax.f32 %v123_v41, 0.0 }
 0x136   :  { %18085 = vmatpush1.bf16.xpose.msra.mxu0 %v18084_v63  ;;  %12616 = vmatprep.mubr.f32.mxu0 %v2312_v0  ;;  %v18092_v39 = vpack.c.bf16 %v929_v32, %v524_v31  ;;  %v326_v63 = vld [vmem:[#allocation5 + $0x230] sm:$0xff]  ;;  %v731_v0 = vld [vmem:[#allocation5 + $0xed8] sm:$0x3]  ;;  %v1481_v32 = vcombine.high %v172_v11, %v172_v11 }
 0x137   :  { %18087 = vmatprep.subr.bf16.mxu0 %v18086_v2  ;;  %v2338_v2 = vrot.slane %v222_v60, %v18940_v12  ;;  %v17696_v7 = vpack.c.bf16 %v731_v0, %v326_v63  ;;  %v1480_v8 = vcombine.high %v1478_v62, %v1478_v62  ;;  %v938_v31 = vld [vmem:[#allocation5 + $0x1550] sm:$0x3]  ;;  %v2362_v60 = vrot.slane %v2348_v55, %v18940_v12  ;;  %v939_v0 = vld [vmem:[#allocation5 + $0x1558] sm:$0x3]  ;;  %v73_v55 = vld [vmem:[#allocation2 + $0xa8] sm:$0xff] }
 0x138   :  { %v18106_v37 = vpack.c.bf16 %v938_v31, %v533_v30  ;;  %v534_v63 = vld [vmem:[#allocation5 + $0x8b0] sm:$0xff]  ;;  %v2365_v31 = vcombine.high %v224_v10, %v224_v10  ;;  %v175_v1 = vmax.f32 %v73_v55, 0.0  ;;  %v125_v55 = vld [vmem:[#allocation2 + $0x248] sm:$0xff] }
 0x139   :  { %v2346_v15 = vcombine.high %v2338_v2, %v2338_v2  ;;  %v2364_v9 = vcombine.high %v2362_v60, %v2362_v60 }
 0x13b   :  { %5547 = vmatmul.mubr.f32.vlgmr.msra.gmra.mrb[0].mxu1 %v1444_v48  ;;  %v732_v48 = vld [vmem:[#allocation5 + $0xee0] sm:$0x3] }
 0x13c   :  { %17685 = vmatpush1.bf16.xpose.msra.mxu1 %v17684_v13  ;;  %5616 = vmatprep.mubr.f32.mxu1 %v1462_v14  ;;  %v17694_v57 = vpack.c.bf16 %v732_v48, %v327_v47 }
 0x13d   :  { %12617 = vmatmul.mubr.f32.vlgmr.msra.gmra.mrb[0].mxu0 %v2304_v52  ;;  %17687 = vmatprep.subr.bf16.mxu1 %v17686_v18  ;;  %v17692_v52 = vpack.c.bf16 %v729_v45, %v324_v44  ;;  %v1488_v18 = vrot.slane %v172_v11, %v18940_v12  ;;  %v738_v44 = vld [vmem:[#allocation5 + $0xf10] sm:$0x3]  ;;  %v532_v45 = vld [vmem:[#allocation5 + $0x8a0] sm:$0xff] }
 0x13e   :  { %18089 = vmatpush1.bf16.xpose.msra.mxu0 %v18088_v19  ;;  %12686 = vmatprep.mubr.f32.mxu0 %v2313_v20  ;;  %v328_v19 = vld [vmem:[#allocation5 + $0x240] sm:$0xff]  ;;  %v733_v20 = vld [vmem:[#allocation5 + $0xee8] sm:$0x3] }
 0x13f   :  { %18091 = vmatprep.subr.bf16.mxu0 %v18090_v22  ;;  %v331_v22 = vld [vmem:[#allocation5 + $0x258] sm:$0xff]  ;;  %v1496_v29 = vcombine.high %v1488_v18, %v1488_v18 }
 0x143   :  { %5617 = vmatmul.mubr.f32.vlgmr.msra.gmra.mrb[0].mxu1 %v1454_v3  ;;  %v329_v3 = vld [vmem:[#allocation5 + $0x248] sm:$0xff] }
 0x144   :  { %17689 = vmatpush1.bf16.xpose.msra.mxu1 %v17688_v33  ;;  %5686 = vmatprep.mubr.f32.mxu1 %v1463_v34  ;;  %v17698_v13 = vpack.c.bf16 %v734_v4, %v329_v3  ;;  %v18104_v34 = vpack.c.bf16 %v935_v26, %v530_v25  ;;  %v537_v4 = vld [vmem:[#allocation5 + $0x8c8] sm:$0xff]  ;;  %v539_v25 = vld [vmem:[#allocation5 + $0x8d8] sm:$0xff]  ;;  %v944_v26 = vld [vmem:[#allocation5 + $0x1580] sm:$0x3] }
 0x145   :  { %12687 = vmatmul.mubr.f32.vlgmr.msra.gmra.mrb[0].mxu0 %v2311_v6  ;;  %17691 = vmatprep.subr.bf16.mxu1 %v17690_v38  ;;  %v933_v6 = vld [vmem:[#allocation5 + $0x1528] sm:$0x3]  ;;  %v1495_v38 = vrot.slane %v1481_v32, %v18940_v12  ;;  %v18118_v32 = vpack.c.bf16 %v944_v26, %v539_v25  ;;  %v226_v26 = vmax.f32 %v124_v16, 0.0 }
 0x146   :  { %18093 = vmatpush1.bf16.xpose.msra.mxu0 %v18092_v39  ;;  %12756 = vmatprep.mubr.f32.mxu0 %v2329_v40  ;;  %v18100_v14 = vpack.c.bf16 %v933_v6, %v528_v5  ;;  %v330_v39 = vld [vmem:[#allocation5 + $0x250] sm:$0xff]  ;;  %v735_v40 = vld [vmem:[#allocation5 + $0xef8] sm:$0x3]  ;;  %v1498_v6 = vcombine.high %v173_v51, %v173_v51 }
 0x147   :  { %18095 = vmatprep.subr.bf16.mxu0 %v18094_v42  ;;  %v2355_v42 = vrot.slane %v223_v36, %v18940_v12  ;;  %v17704_v47 = vpack.c.bf16 %v735_v40, %v330_v39  ;;  %v1497_v48 = vcombine.high %v1495_v38, %v1495_v38  ;;  %v942_v5 = vld [vmem:[#allocation5 + $0x1570] sm:$0x3]  ;;  %v2379_v36 = vrot.slane %v2365_v31, %v18940_v12  ;;  %v943_v40 = vld [vmem:[#allocation5 + $0x1578] sm:$0x3]  ;;  %v74_v31 = vld [vmem:[#allocation2 + $0xb0] sm:$0xff] }
 0x148   :  { %v18114_v11 = vpack.c.bf16 %v942_v5, %v537_v4  ;;  %v538_v39 = vld [vmem:[#allocation5 + $0x8d0] sm:$0xff]  ;;  %v2382_v5 = vcombine.high %v225_v50, %v225_v50  ;;  %v176_v41 = vmax.f32 %v74_v31, 0.0  ;;  %v126_v31 = vld [vmem:[#allocation2 + $0x250] sm:$0xff] }
 0x149   :  { %v2363_v54 = vcombine.high %v2355_v42, %v2355_v42  ;;  %v2381_v49 = vcombine.high %v2379_v36, %v2379_v36 }
 0x14b   :  { %5687 = vmatmul.mubr.f32.vlgmr.msra.gmra.mrb[0].mxu1 %v1461_v24  ;;  %v736_v24 = vld [vmem:[#allocation5 + $0xf00] sm:$0x3] }
 0x14c   :  { %17693 = vmatpush1.bf16.xpose.msra.mxu1 %v17692_v52  ;;  %5756 = vmatprep.mubr.f32.mxu1 %v1479_v53  ;;  %v17702_v33 = vpack.c.bf16 %v736_v24, %v331_v22 }
 0x14d   :  { %12757 = vmatmul.mubr.f32.vlgmr.msra.gmra.mrb[0].mxu0 %v2321_v28  ;;  %17695 = vmatprep.subr.bf16.mxu1 %v17694_v57  ;;  %v17700_v28 = vpack.c.bf16 %v733_v20, %v328_v19  ;;  %v1505_v57 = vrot.slane %v173_v51, %v18940_v12  ;;  %v742_v19 = vld [vmem:[#allocation5 + $0xf30] sm:$0x3]  ;;  %v536_v20 = vld [vmem:[#allocation5 + $0x8c0] sm:$0xff] }
 0x14e   :  { %18097 = vmatpush1.bf16.xpose.msra.mxu0 %v18096_v58  ;;  %12826 = vmatprep.mubr.f32.mxu0 %v2330_v59  ;;  %v332_v58 = vld [vmem:[#allocation5 + $0x260] sm:$0xff]  ;;  %v737_v59 = vld [vmem:[#allocation5 + $0xf08] sm:$0x3] }
 0x14f   :  { %18099 = vmatprep.subr.bf16.mxu0 %v18098_v61  ;;  %v335_v61 = vld [vmem:[#allocation5 + $0x278] sm:$0xff]  ;;  %v1513_v3 = vcombine.high %v1505_v57, %v1505_v57 }
 0x153   :  { %5757 = vmatmul.mubr.f32.vlgmr.msra.gmra.mrb[0].mxu1 %v1471_v43  ;;  %v333_v43 = vld [vmem:[#allocation5 + $0x268] sm:$0xff] }
 0x154   :  { %17697 = vmatpush1.bf16.xpose.msra.mxu1 %v17696_v7  ;;  %5826 = vmatprep.mubr.f32.mxu1 %v1480_v8  ;;  %v17706_v52 = vpack.c.bf16 %v738_v44, %v333_v43  ;;  %v18112_v8 = vpack.c.bf16 %v939_v0, %v534_v63  ;;  %v541_v44 = vld [vmem:[#allocation5 + $0x8e8] sm:$0xff]  ;;  %v543_v63 = vld [vmem:[#allocation5 + $0x8f8] sm:$0xff]  ;;  %v948_v0 = vld [vmem:[#allocation5 + $0x15a0] sm:$0x3] }
 0x155   :  { %12827 = vmatmul.mubr.f32.vlgmr.msra.gmra.mrb[0].mxu0 %v2328_v46  ;;  %17699 = vmatprep.subr.bf16.mxu1 %v17698_v13  ;;  %v937_v46 = vld [vmem:[#allocation5 + $0x1548] sm:$0x3]  ;;  %v1512_v13 = vrot.slane %v1498_v6, %v18940_v12  ;;  %v18126_v6 = vpack.c.bf16 %v948_v0, %v543_v63  ;;  %v227_v0 = vmax.f32 %v125_v55, 0.0 }
 0x156   :  { %18101 = vmatpush1.bf16.xpose.msra.mxu0 %v18100_v14  ;;  %12896 = vmatprep.mubr.f32.mxu0 %v2346_v15  ;;  %v18108_v53 = vpack.c.bf16 %v937_v46, %v532_v45  ;;  %v334_v14 = vld [vmem:[#allocation5 + $0x270] sm:$0xff]  ;;  %v739_v15 = vld [vmem:[#allocation5 + $0xf18] sm:$0x3]  ;;  %v1515_v46 = vcombine.high %v174_v27, %v174_v27 }
 0x157   :  { %18103 = vmatprep.subr.bf16.mxu0 %v18102_v17  ;;  %v2372_v17 = vrot.slane %v224_v10, %v18940_v12  ;;  %v17712_v22 = vpack.c.bf16 %v739_v15, %v334_v14  ;;  %v1514_v24 = vcombine.high %v1512_v13, %v1512_v13  ;;  %v946_v45 = vld [vmem:[#allocation5 + $0x1590] sm:$0x3]  ;;  %v2396_v10 = vrot.slane %v2382_v5, %v18940_v12  ;;  %v947_v15 = vld [vmem:[#allocation5 + $0x1598] sm:$0x3] }
 0x158   :  { %v18122_v51 = vpack.c.bf16 %v946_v45, %v541_v44  ;;  %v542_v14 = vld [vmem:[#allocation5 + $0x8f0] sm:$0xff]  ;;  %v2399_v45 = vcombine.high %v226_v26, %v226_v26 }
 0x159   :  { %v2380_v30 = vcombine.high %v2372_v17, %v2372_v17  ;;  %v2398_v25 = vcombine.high %v2396_v10, %v2396_v10  ;;  %v75_v5 = vld [vmem:[#allocation2 + $0xb8] sm:$0xff] }
 0x15a   :  { %v177_v16 = vmax.f32 %v75_v5, 0.0  ;;  %v127_v5 = vld [vmem:[#allocation2 + $0x258] sm:$0xff] }
 0x15b   :  { %5827 = vmatmul.mubr.f32.vlgmr.msra.gmra.mrb[0].mxu1 %v1478_v62  ;;  %v740_v62 = vld [vmem:[#allocation5 + $0xf20] sm:$0x3] }
 0x15c   :  { %17701 = vmatpush1.bf16.xpose.msra.mxu1 %v17700_v28  ;;  %5896 = vmatprep.mubr.f32.mxu1 %v1496_v29  ;;  %v17710_v7 = vpack.c.bf16 %v740_v62, %v335_v61 }
 0x15d   :  { %12897 = vmatmul.mubr.f32.vlgmr.msra.gmra.mrb[0].mxu0 %v2338_v2  ;;  %17703 = vmatprep.subr.bf16.mxu1 %v17702_v33  ;;  %v17708_v2 = vpack.c.bf16 %v737_v59, %v332_v58  ;;  %v1522_v33 = vrot.slane %v174_v27, %v18940_v12  ;;  %v746_v58 = vld [vmem:[#allocation5 + $0xf50] sm:$0x3]  ;;  %v540_v59 = vld [vmem:[#allocation5 + $0x8e0] sm:$0xff] }
 0x15e   :  { %18105 = vmatpush1.bf16.xpose.msra.mxu0 %v18104_v34  ;;  %12966 = vmatprep.mubr.f32.mxu0 %v2347_v35  ;;  %v336_v34 = vld [vmem:[#allocation5 + $0x280] sm:$0xff]  ;;  %v741_v35 = vld [vmem:[#allocation5 + $0xf28] sm:$0x3] }
 0x15f   :  { %18107 = vmatprep.subr.bf16.mxu0 %v18106_v37  ;;  %v339_v37 = vld [vmem:[#allocation5 + $0x298] sm:$0xff]  ;;  %v1530_v43 = vcombine.high %v1522_v33, %v1522_v33 }
 0x163   :  { %5897 = vmatmul.mubr.f32.vlgmr.msra.gmra.mrb[0].mxu1 %v1488_v18  ;;  %v337_v18 = vld [vmem:[#allocation5 + $0x288] sm:$0xff] }
 0x164   :  { %17705 = vmatpush1.bf16.xpose.msra.mxu1 %v17704_v47  ;;  %5966 = vmatprep.mubr.f32.mxu1 %v1497_v48  ;;  %v17714_v28 = vpack.c.bf16 %v742_v19, %v337_v18  ;;  %v18120_v48 = vpack.c.bf16 %v943_v40, %v538_v39  ;;  %v545_v19 = vld [vmem:[#allocation5 + $0x908] sm:$0xff]  ;;  %v547_v39 = vld [vmem:[#allocation5 + $0x918] sm:$0xff]  ;;  %v952_v40 = vld [vmem:[#allocation5 + $0x15c0] sm:$0x3] }
 0x165   :  { %12967 = vmatmul.mubr.f32.vlgmr.msra.gmra.mrb[0].mxu0 %v2345_v21  ;;  %17707 = vmatprep.subr.bf16.mxu1 %v17706_v52  ;;  %v941_v21 = vld [vmem:[#allocation5 + $0x1568] sm:$0x3]  ;;  %v1529_v52 = vrot.slane %v1515_v46, %v18940_v12  ;;  %v18134_v46 = vpack.c.bf16 %v952_v40, %v547_v39  ;;  %v228_v40 = vmax.f32 %v126_v31, 0.0 }
 0x166   :  { %18109 = vmatpush1.bf16.xpose.msra.mxu0 %v18108_v53  ;;  %13036 = vmatprep.mubr.f32.mxu0 %v2363_v54  ;;  %v18116_v29 = vpack.c.bf16 %v941_v21, %v536_v20  ;;  %v338_v53 = vld [vmem:[#allocation5 + $0x290] sm:$0xff]  ;;  %v743_v54 = vld [vmem:[#allocation5 + $0xf38] sm:$0x3]  ;;  %v1532_v21 = vcombine.high %v175_v1, %v175_v1 }
 0x167   :  { %18111 = vmatprep.subr.bf16.mxu0 %v18110_v56  ;;  %v2389_v56 = vrot.slane %v225_v50, %v18940_v12  ;;  %v17720_v61 = vpack.c.bf16 %v743_v54, %v338_v53  ;;  %v1531_v62 = vcombine.high %v1529_v52, %v1529_v52  ;;  %v950_v20 = vld [vmem:[#allocation5 + $0x15b0] sm:$0x3]  ;;  %v2413_v50 = vrot.slane %v2399_v45, %v18940_v12  ;;  %v951_v54 = vld [vmem:[#allocation5 + $0x15b8] sm:$0x3] }
 0x168   :  { %v18130_v27 = vpack.c.bf16 %v950_v20, %v545_v19  ;;  %v546_v53 = vld [vmem:[#allocation5 + $0x910] sm:$0xff]  ;;  %v2416_v20 = vcombine.high %v227_v0, %v227_v0 }
 0x169   :  { %v2397_v4 = vcombine.high %v2389_v56, %v2389_v56  ;;  %v2415_v63 = vcombine.high %v2413_v50, %v2413_v50  ;;  %v76_v45 = vld [vmem:[#allocation2 + $0xc0] sm:$0xff] }
 0x16a   :  { %v178_v55 = vmax.f32 %v76_v45, 0.0  ;;  %v128_v45 = vld [vmem:[#allocation2 + $0x260] sm:$0xff] }
 0x16b   :  { %5967 = vmatmul.mubr.f32.vlgmr.msra.gmra.mrb[0].mxu1 %v1495_v38  ;;  %v744_v38 = vld [vmem:[#allocation5 + $0xf40] sm:$0x3] }
 0x16c   :  { %17709 = vmatpush1.bf16.xpose.msra.mxu1 %v17708_v2  ;;  %6036 = vmatprep.mubr.f32.mxu1 %v1513_v3  ;;  %v17718_v47 = vpack.c.bf16 %v744_v38, %v339_v37 }
 0x16d   :  { %13037 = vmatmul.mubr.f32.vlgmr.msra.gmra.mrb[0].mxu0 %v2355_v42  ;;  %17711 = vmatprep.subr.bf16.mxu1 %v17710_v7  ;;  %v17716_v42 = vpack.c.bf16 %v741_v35, %v336_v34  ;;  %v1539_v7 = vrot.slane %v175_v1, %v18940_v12  ;;  %v750_v34 = vld [vmem:[#allocation5 + $0xf70] sm:$0x3]  ;;  %v544_v35 = vld [vmem:[#allocation5 + $0x900] sm:$0xff] }
 0x16e   :  { %18113 = vmatpush1.bf16.xpose.msra.mxu0 %v18112_v8  ;;  %13106 = vmatprep.mubr.f32.mxu0 %v2364_v9  ;;  %v340_v8 = vld [vmem:[#allocation5 + $0x2a0] sm:$0xff]  ;;  %v745_v9 = vld [vmem:[#allocation5 + $0xf48] sm:$0x3] }
 0x16f   :  { %18115 = vmatprep.subr.bf16.mxu0 %v18114_v11  ;;  %v343_v11 = vld [vmem:[#allocation5 + $0x2b8] sm:$0xff]  ;;  %v1547_v18 = vcombine.high %v1539_v7, %v1539_v7 }
 0x173   :  { %6037 = vmatmul.mubr.f32.vlgmr.msra.gmra.mrb[0].mxu1 %v1505_v57  ;;  %v341_v57 = vld [vmem:[#allocation5 + $0x2a8] sm:$0xff] }
 0x174   :  { %17713 = vmatpush1.bf16.xpose.msra.mxu1 %v17712_v22  ;;  %6106 = vmatprep.mubr.f32.mxu1 %v1514_v24  ;;  %v17722_v2 = vpack.c.bf16 %v746_v58, %v341_v57  ;;  %v18128_v24 = vpack.c.bf16 %v947_v15, %v542_v14  ;;  %v549_v58 = vld [vmem:[#allocation5 + $0x928] sm:$0xff]  ;;  %v551_v14 = vld [vmem:[#allocation5 + $0x938] sm:$0xff]  ;;  %v956_v15 = vld [vmem:[#allocation5 + $0x15e0] sm:$0x3] }
 0x175   :  { %13107 = vmatmul.mubr.f32.vlgmr.msra.gmra.mrb[0].mxu0 %v2362_v60  ;;  %17715 = vmatprep.subr.bf16.mxu1 %v17714_v28  ;;  %v945_v60 = vld [vmem:[#allocation5 + $0x1588] sm:$0x3]  ;;  %v1546_v28 = vrot.slane %v1532_v21, %v18940_v12  ;;  %v18142_v21 = vpack.c.bf16 %v956_v15, %v551_v14  ;;  %v229_v15 = vmax.f32 %v127_v5, 0.0 }
 0x176   :  { %18117 = vmatpush1.bf16.xpose.msra.mxu0 %v18116_v29  ;;  %13176 = vmatprep.mubr.f32.mxu0 %v2380_v30  ;;  %v18124_v3 = vpack.c.bf16 %v945_v60, %v540_v59  ;;  %v342_v29 = vld [vmem:[#allocation5 + $0x2b0] sm:$0xff]  ;;  %v747_v30 = vld [vmem:[#allocation5 + $0xf58] sm:$0x3]  ;;  %v1549_v60 = vcombine.high %v176_v41, %v176_v41 }
 0x177   :  { %18119 = vmatprep.subr.bf16.mxu0 %v18118_v32  ;;  %v2406_v32 = vrot.slane %v226_v26, %v18940_v12  ;;  %v17728_v37 = vpack.c.bf16 %v747_v30, %v342_v29  ;;  %v1548_v38 = vcombine.high %v1546_v28, %v1546_v28  ;;  %v954_v59 = vld [vmem:[#allocation5 + $0x15d0] sm:$0x3]  ;;  %v2430_v26 = vrot.slane %v2416_v20, %v18940_v12  ;;  %v955_v30 = vld [vmem:[#allocation5 + $0x15d8] sm:$0x3]  ;;  %v77_v20 = vld [vmem:[#allocation2 + $0xc8] sm:$0xff] }
 0x178   :  { %v18138_v1 = vpack.c.bf16 %v954_v59, %v549_v58  ;;  %v550_v29 = vld [vmem:[#allocation5 + $0x930] sm:$0xff]  ;;  %v2433_v59 = vcombine.high %v228_v40, %v228_v40  ;;  %v179_v31 = vmax.f32 %v77_v20, 0.0  ;;  %v129_v20 = vld [vmem:[#allocation2 + $0x268] sm:$0xff] }
 0x179   :  { %v2414_v44 = vcombine.high %v2406_v32, %v2406_v32  ;;  %v2432_v39 = vcombine.high %v2430_v26, %v2430_v26 }
 0x17b   :  { %6107 = vmatmul.mubr.f32.vlgmr.msra.gmra.mrb[0].mxu1 %v1512_v13  ;;  %v748_v13 = vld [vmem:[#allocation5 + $0xf60] sm:$0x3] }
 0x17c   :  { %17717 = vmatpush1.bf16.xpose.msra.mxu1 %v17716_v42  ;;  %6176 = vmatprep.mubr.f32.mxu1 %v1530_v43  ;;  %v17726_v22 = vpack.c.bf16 %v748_v13, %v343_v11 }
 0x17d   :  { %13177 = vmatmul.mubr.f32.vlgmr.msra.gmra.mrb[0].mxu0 %v2372_v17  ;;  %17719 = vmatprep.subr.bf16.mxu1 %v17718_v47  ;;  %v17724_v17 = vpack.c.bf16 %v745_v9, %v340_v8  ;;  %v1556_v47 = vrot.slane %v176_v41, %v18940_v12  ;;  %v754_v8 = vld [vmem:[#allocation5 + $0xf90] sm:$0x3]  ;;  %v548_v9 = vld [vmem:[#allocation5 + $0x920] sm:$0xff] }
 0x17e   :  { %18121 = vmatpush1.bf16.xpose.msra.mxu0 %v18120_v48  ;;  %13246 = vmatprep.mubr.f32.mxu0 %v2381_v49  ;;  %v344_v48 = vld [vmem:[#allocation5 + $0x2c0] sm:$0xff]  ;;  %v749_v49 = vld [vmem:[#allocation5 + $0xf68] sm:$0x3] }
 0x17f   :  { %18123 = vmatprep.subr.bf16.mxu0 %v18122_v51  ;;  %v347_v51 = vld [vmem:[#allocation5 + $0x2d8] sm:$0xff]  ;;  %v1564_v57 = vcombine.high %v1556_v47, %v1556_v47 }
 0x183   :  { %6177 = vmatmul.mubr.f32.vlgmr.msra.gmra.mrb[0].mxu1 %v1522_v33  ;;  %v345_v33 = vld [vmem:[#allocation5 + $0x2c8] sm:$0xff] }
 0x184   :  { %17721 = vmatpush1.bf16.xpose.msra.mxu1 %v17720_v61  ;;  %6246 = vmatprep.mubr.f32.mxu1 %v1531_v62  ;;  %v17730_v42 = vpack.c.bf16 %v750_v34, %v345_v33  ;;  %v18136_v62 = vpack.c.bf16 %v951_v54, %v546_v53  ;;  %v553_v34 = vld [vmem:[#allocation5 + $0x948] sm:$0xff]  ;;  %v555_v53 = vld [vmem:[#allocation5 + $0x958] sm:$0xff]  ;;  %v960_v54 = vld [vmem:[#allocation5 + $0x1600] sm:$0x3] }
 0x185   :  { %13247 = vmatmul.mubr.f32.vlgmr.msra.gmra.mrb[0].mxu0 %v2379_v36  ;;  %17723 = vmatprep.subr.bf16.mxu1 %v17722_v2  ;;  %v949_v36 = vld [vmem:[#allocation5 + $0x15a8] sm:$0x3]  ;;  %v1563_v2 = vrot.slane %v1549_v60, %v18940_v12  ;;  %v18150_v60 = vpack.c.bf16 %v960_v54, %v555_v53  ;;  %v230_v54 = vmax.f32 %v128_v45, 0.0 }
 0x186   :  { %18125 = vmatpush1.bf16.xpose.msra.mxu0 %v18124_v3  ;;  %13316 = vmatprep.mubr.f32.mxu0 %v2397_v4  ;;  %v18132_v43 = vpack.c.bf16 %v949_v36, %v544_v35  ;;  %v346_v3 = vld [vmem:[#allocation5 + $0x2d0] sm:$0xff]  ;;  %v751_v4 = vld [vmem:[#allocation5 + $0xf78] sm:$0x3]  ;;  %v1566_v36 = vcombine.high %v177_v16, %v177_v16 }
 0x187   :  { %18127 = vmatprep.subr.bf16.mxu0 %v18126_v6  ;;  %v2423_v6 = vrot.slane %v227_v0, %v18940_v12  ;;  %v17736_v11 = vpack.c.bf16 %v751_v4, %v346_v3  ;;  %v1565_v13 = vcombine.high %v1563_v2, %v1563_v2  ;;  %v958_v35 = vld [vmem:[#allocation5 + $0x15f0] sm:$0x3]  ;;  %v2447_v0 = vrot.slane %v2433_v59, %v18940_v12  ;;  %v959_v4 = vld [vmem:[#allocation5 + $0x15f8] sm:$0x3]  ;;  %v78_v59 = vld [vmem:[#allocation2 + $0xd0] sm:$0xff] }
 0x188   :  { %v18146_v41 = vpack.c.bf16 %v958_v35, %v553_v34  ;;  %v554_v3 = vld [vmem:[#allocation5 + $0x950] sm:$0xff]  ;;  %v2450_v35 = vcombine.high %v229_v15, %v229_v15  ;;  %v180_v5 = vmax.f32 %v78_v59, 0.0  ;;  %v130_v59 = vld [vmem:[#allocation2 + $0x270] sm:$0xff] }
 0x189   :  { %v2431_v19 = vcombine.high %v2423_v6, %v2423_v6  ;;  %v2449_v14 = vcombine.high %v2447_v0, %v2447_v0 }
 0x18b   :  { %6247 = vmatmul.mubr.f32.vlgmr.msra.gmra.mrb[0].mxu1 %v1529_v52  ;;  %v752_v52 = vld [vmem:[#allocation5 + $0xf80] sm:$0x3] }
 0x18c   :  { %17725 = vmatpush1.bf16.xpose.msra.mxu1 %v17724_v17  ;;  %6316 = vmatprep.mubr.f32.mxu1 %v1547_v18  ;;  %v17734_v61 = vpack.c.bf16 %v752_v52, %v347_v51 }
 0x18d   :  { %13317 = vmatmul.mubr.f32.vlgmr.msra.gmra.mrb[0].mxu0 %v2389_v56  ;;  %17727 = vmatprep.subr.bf16.mxu1 %v17726_v22  ;;  %v17732_v56 = vpack.c.bf16 %v749_v49, %v344_v48  ;;  %v1573_v22 = vrot.slane %v177_v16, %v18940_v12  ;;  %v758_v48 = vld [vmem:[#allocation5 + $0xfb0] sm:$0x3]  ;;  %v552_v49 = vld [vmem:[#allocation5 + $0x940] sm:$0xff] }
 0x18e   :  { %18129 = vmatpush1.bf16.xpose.msra.mxu0 %v18128_v24  ;;  %13386 = vmatprep.mubr.f32.mxu0 %v2398_v25  ;;  %v348_v24 = vld [vmem:[#allocation5 + $0x2e0] sm:$0xff]  ;;  %v753_v25 = vld [vmem:[#allocation5 + $0xf88] sm:$0x3] }
 0x18f   :  { %18131 = vmatprep.subr.bf16.mxu0 %v18130_v27  ;;  %v351_v27 = vld [vmem:[#allocation5 + $0x2f8] sm:$0xff]  ;;  %v1581_v33 = vcombine.high %v1573_v22, %v1573_v22 }
 0x193   :  { %6317 = vmatmul.mubr.f32.vlgmr.msra.gmra.mrb[0].mxu1 %v1539_v7  ;;  %v349_v7 = vld [vmem:[#allocation5 + $0x2e8] sm:$0xff] }
 0x194   :  { %17729 = vmatpush1.bf16.xpose.msra.mxu1 %v17728_v37  ;;  %6386 = vmatprep.mubr.f32.mxu1 %v1548_v38  ;;  %v17738_v17 = vpack.c.bf16 %v754_v8, %v349_v7  ;;  %v18144_v38 = vpack.c.bf16 %v955_v30, %v550_v29  ;;  %v557_v8 = vld [vmem:[#allocation5 + $0x968] sm:$0xff]  ;;  %v559_v29 = vld [vmem:[#allocation5 + $0x978] sm:$0xff]  ;;  %v964_v30 = vld [vmem:[#allocation5 + $0x1620] sm:$0x3] }
 0x195   :  { %13387 = vmatmul.mubr.f32.vlgmr.msra.gmra.mrb[0].mxu0 %v2396_v10  ;;  %17731 = vmatprep.subr.bf16.mxu1 %v17730_v42  ;;  %v953_v10 = vld [vmem:[#allocation5 + $0x15c8] sm:$0x3]  ;;  %v1580_v42 = vrot.slane %v1566_v36, %v18940_v12  ;;  %v18158_v36 = vpack.c.bf16 %v964_v30, %v559_v29  ;;  %v231_v30 = vmax.f32 %v129_v20, 0.0 }
 0x196   :  { %18133 = vmatpush1.bf16.xpose.msra.mxu0 %v18132_v43  ;;  %13456 = vmatprep.mubr.f32.mxu0 %v2414_v44  ;;  %v18140_v18 = vpack.c.bf16 %v953_v10, %v548_v9  ;;  %v350_v43 = vld [vmem:[#allocation5 + $0x2f0] sm:$0xff]  ;;  %v755_v44 = vld [vmem:[#allocation5 + $0xf98] sm:$0x3]  ;;  %v1583_v10 = vcombine.high %v178_v55, %v178_v55 }
 0x197   :  { %18135 = vmatprep.subr.bf16.mxu0 %v18134_v46  ;;  %v2440_v46 = vrot.slane %v228_v40, %v18940_v12  ;;  %v17744_v51 = vpack.c.bf16 %v755_v44, %v350_v43  ;;  %v1582_v52 = vcombine.high %v1580_v42, %v1580_v42  ;;  %v962_v9 = vld [vmem:[#allocation5 + $0x1610] sm:$0x3]  ;;  %v2464_v40 = vrot.slane %v2450_v35, %v18940_v12  ;;  %v963_v44 = vld [vmem:[#allocation5 + $0x1618] sm:$0x3] }
 0x198   :  { %v18154_v16 = vpack.c.bf16 %v962_v9, %v557_v8  ;;  %v558_v43 = vld [vmem:[#allocation5 + $0x970] sm:$0xff]  ;;  %v2467_v9 = vcombine.high %v230_v54, %v230_v54 }
 0x199   :  { %v2448_v58 = vcombine.high %v2440_v46, %v2440_v46  ;;  %v2466_v53 = vcombine.high %v2464_v40, %v2464_v40  ;;  %v79_v35 = vld [vmem:[#allocation2 + $0xd8] sm:$0xff] }
 0x19a   :  { %v181_v45 = vmax.f32 %v79_v35, 0.0  ;;  %v131_v35 = vld [vmem:[#allocation2 + $0x278] sm:$0xff] }
 0x19b   :  { %6387 = vmatmul.mubr.f32.vlgmr.msra.gmra.mrb[0].mxu1 %v1546_v28  ;;  %v756_v28 = vld [vmem:[#allocation5 + $0xfa0] sm:$0x3] }
 0x19c   :  { %17733 = vmatpush1.bf16.xpose.msra.mxu1 %v17732_v56  ;;  %6456 = vmatprep.mubr.f32.mxu1 %v1564_v57  ;;  %v17742_v37 = vpack.c.bf16 %v756_v28, %v351_v27 }
 0x19d   :  { %13457 = vmatmul.mubr.f32.vlgmr.msra.gmra.mrb[0].mxu0 %v2406_v32  ;;  %17735 = vmatprep.subr.bf16.mxu1 %v17734_v61  ;;  %v17740_v32 = vpack.c.bf16 %v753_v25, %v348_v24  ;;  %v1590_v61 = vrot.slane %v178_v55, %v18940_v12  ;;  %v762_v24 = vld [vmem:[#allocation5 + $0xfd0] sm:$0x3]  ;;  %v556_v25 = vld [vmem:[#allocation5 + $0x960] sm:$0xff] }
 0x19e   :  { %18137 = vmatpush1.bf16.xpose.msra.mxu0 %v18136_v62  ;;  %13526 = vmatprep.mubr.f32.mxu0 %v2415_v63  ;;  %v352_v62 = vld [vmem:[#allocation5 + $0x300] sm:$0xff]  ;;  %v757_v63 = vld [vmem:[#allocation5 + $0xfa8] sm:$0x3] }
 0x19f   :  { %18139 = vmatprep.subr.bf16.mxu0 %v18138_v1  ;;  %v355_v1 = vld [vmem:[#allocation5 + $0x318] sm:$0xff]  ;;  %v1598_v7 = vcombine.high %v1590_v61, %v1590_v61 }
 0x1a3   :  { %6457 = vmatmul.mubr.f32.vlgmr.msra.gmra.mrb[0].mxu1 %v1556_v47  ;;  %v353_v47 = vld [vmem:[#allocation5 + $0x308] sm:$0xff] }
 0x1a4   :  { %17737 = vmatpush1.bf16.xpose.msra.mxu1 %v17736_v11  ;;  %6526 = vmatprep.mubr.f32.mxu1 %v1565_v13  ;;  %v17746_v56 = vpack.c.bf16 %v758_v48, %v353_v47  ;;  %v18152_v13 = vpack.c.bf16 %v959_v4, %v554_v3  ;;  %v561_v48 = vld [vmem:[#allocation5 + $0x988] sm:$0xff]  ;;  %v563_v3 = vld [vmem:[#allocation5 + $0x998] sm:$0xff]  ;;  %v968_v4 = vld [vmem:[#allocation5 + $0x1640] sm:$0x3] }
 0x1a5   :  { %13527 = vmatmul.mubr.f32.vlgmr.msra.gmra.mrb[0].mxu0 %v2413_v50  ;;  %17739 = vmatprep.subr.bf16.mxu1 %v17738_v17  ;;  %v957_v50 = vld [vmem:[#allocation5 + $0x15e8] sm:$0x3]  ;;  %v1597_v17 = vrot.slane %v1583_v10, %v18940_v12  ;;  %v18166_v10 = vpack.c.bf16 %v968_v4, %v563_v3  ;;  %v232_v4 = vmax.f32 %v130_v59, 0.0 }
 0x1a6   :  { %18141 = vmatpush1.bf16.xpose.msra.mxu0 %v18140_v18  ;;  %13596 = vmatprep.mubr.f32.mxu0 %v2431_v19  ;;  %v18148_v57 = vpack.c.bf16 %v957_v50, %v552_v49  ;;  %v354_v18 = vld [vmem:[#allocation5 + $0x310] sm:$0xff]  ;;  %v759_v19 = vld [vmem:[#allocation5 + $0xfb8] sm:$0x3]  ;;  %v1600_v50 = vcombine.high %v179_v31, %v179_v31 }
 0x1a7   :  { %18143 = vmatprep.subr.bf16.mxu0 %v18142_v21  ;;  %v2457_v21 = vrot.slane %v229_v15, %v18940_v12  ;;  %v17752_v27 = vpack.c.bf16 %v759_v19, %v354_v18  ;;  %v1599_v28 = vcombine.high %v1597_v17, %v1597_v17  ;;  %v966_v49 = vld [vmem:[#allocation5 + $0x1630] sm:$0x3]  ;;  %v2481_v15 = vrot.slane %v2467_v9, %v18940_v12  ;;  %v967_v19 = vld [vmem:[#allocation5 + $0x1638] sm:$0x3] }
 0x1a8   :  { %v18162_v55 = vpack.c.bf16 %v966_v49, %v561_v48  ;;  %v562_v18 = vld [vmem:[#allocation5 + $0x990] sm:$0xff]  ;;  %v2484_v49 = vcombine.high %v231_v30, %v231_v30 }
 0x1a9   :  { %v2465_v34 = vcombine.high %v2457_v21, %v2457_v21  ;;  %v2483_v29 = vcombine.high %v2481_v15, %v2481_v15  ;;  %v80_v9 = vld [vmem:[#allocation2 + $0xe0] sm:$0xff] }
 0x1aa   :  { %v182_v20 = vmax.f32 %v80_v9, 0.0  ;;  %v132_v9 = vld [vmem:[#allocation2 + $0x280] sm:$0xff] }
 0x1ab   :  { %6527 = vmatmul.mubr.f32.vlgmr.msra.gmra.mrb[0].mxu1 %v1563_v2  ;;  %v760_v2 = vld [vmem:[#allocation5 + $0xfc0] sm:$0x3] }
 0x1ac   :  { %17741 = vmatpush1.bf16.xpose.msra.mxu1 %v17740_v32  ;;  %6596 = vmatprep.mubr.f32.mxu1 %v1581_v33  ;;  %v17750_v11 = vpack.c.bf16 %v760_v2, %v355_v1 }
 0x1ad   :  { %13597 = vmatmul.mubr.f32.vlgmr.msra.gmra.mrb[0].mxu0 %v2423_v6  ;;  %17743 = vmatprep.subr.bf16.mxu1 %v17742_v37  ;;  %v17748_v6 = vpack.c.bf16 %v757_v63, %v352_v62  ;;  %v1607_v37 = vrot.slane %v179_v31, %v18940_v12  ;;  %v766_v62 = vld [vmem:[#allocation5 + $0xff0] sm:$0x3]  ;;  %v560_v63 = vld [vmem:[#allocation5 + $0x980] sm:$0xff] }
 0x1ae   :  { %18145 = vmatpush1.bf16.xpose.msra.mxu0 %v18144_v38  ;;  %13666 = vmatprep.mubr.f32.mxu0 %v2432_v39  ;;  %v356_v38 = vld [vmem:[#allocation5 + $0x320] sm:$0xff]  ;;  %v761_v39 = vld [vmem:[#allocation5 + $0xfc8] sm:$0x3] }
 0x1af   :  { %18147 = vmatprep.subr.bf16.mxu0 %v18146_v41  ;;  %v359_v41 = vld [vmem:[#allocation5 + $0x338] sm:$0xff]  ;;  %v1615_v47 = vcombine.high %v1607_v37, %v1607_v37 }
 0x1b3   :  { %6597 = vmatmul.mubr.f32.vlgmr.msra.gmra.mrb[0].mxu1 %v1573_v22  ;;  %v357_v22 = vld [vmem:[#allocation5 + $0x328] sm:$0xff] }
 0x1b4   :  { %17745 = vmatpush1.bf16.xpose.msra.mxu1 %v17744_v51  ;;  %6666 = vmatprep.mubr.f32.mxu1 %v1582_v52  ;;  %v17754_v32 = vpack.c.bf16 %v762_v24, %v357_v22  ;;  %v18160_v52 = vpack.c.bf16 %v963_v44, %v558_v43  ;;  %v565_v24 = vld [vmem:[#allocation5 + $0x9a8] sm:$0xff]  ;;  %v567_v43 = vld [vmem:[#allocation5 + $0x9b8] sm:$0xff]  ;;  %v972_v44 = vld [vmem:[#allocation5 + $0x1660] sm:$0x3] }
 0x1b5   :  { %13667 = vmatmul.mubr.f32.vlgmr.msra.gmra.mrb[0].mxu0 %v2430_v26  ;;  %17747 = vmatprep.subr.bf16.mxu1 %v17746_v56  ;;  %v961_v26 = vld [vmem:[#allocation5 + $0x1608] sm:$0x3]  ;;  %v1614_v56 = vrot.slane %v1600_v50, %v18940_v12  ;;  %v18174_v50 = vpack.c.bf16 %v972_v44, %v567_v43  ;;  %v233_v44 = vmax.f32 %v131_v35, 0.0 }
 0x1b6   :  { %18149 = vmatpush1.bf16.xpose.msra.mxu0 %v18148_v57  ;;  %13736 = vmatprep.mubr.f32.mxu0 %v2448_v58  ;;  %v18156_v33 = vpack.c.bf16 %v961_v26, %v556_v25  ;;  %v358_v57 = vld [vmem:[#allocation5 + $0x330] sm:$0xff]  ;;  %v763_v58 = vld [vmem:[#allocation5 + $0xfd8] sm:$0x3]  ;;  %v1617_v26 = vcombine.high %v180_v5, %v180_v5 }
 0x1b7   :  { %18151 = vmatprep.subr.bf16.mxu0 %v18150_v60  ;;  %v2474_v60 = vrot.slane %v230_v54, %v18940_v12  ;;  %v17760_v1 = vpack.c.bf16 %v763_v58, %v358_v57  ;;  %v1616_v2 = vcombine.high %v1614_v56, %v1614_v56  ;;  %v970_v25 = vld [vmem:[#allocation5 + $0x1650] sm:$0x3]  ;;  %v2498_v54 = vrot.slane %v2484_v49, %v18940_v12  ;;  %v971_v58 = vld [vmem:[#allocation5 + $0x1658] sm:$0x3]  ;;  %v81_v49 = vld [vmem:[#allocation2 + $0xe8] sm:$0xff] }
 0x1b8   :  { %v18170_v31 = vpack.c.bf16 %v970_v25, %v565_v24  ;;  %v566_v57 = vld [vmem:[#allocation5 + $0x9b0] sm:$0xff]  ;;  %v2501_v25 = vcombine.high %v232_v4, %v232_v4  ;;  %v183_v59 = vmax.f32 %v81_v49, 0.0  ;;  %v133_v49 = vld [vmem:[#allocation2 + $0x288] sm:$0xff] }
 0x1b9   :  { %v2482_v8 = vcombine.high %v2474_v60, %v2474_v60  ;;  %v2500_v3 = vcombine.high %v2498_v54, %v2498_v54 }
 0x1bb   :  { %6667 = vmatmul.mubr.f32.vlgmr.msra.gmra.mrb[0].mxu1 %v1580_v42  ;;  %v764_v42 = vld [vmem:[#allocation5 + $0xfe0] sm:$0x3] }
 0x1bc   :  { %17749 = vmatpush1.bf16.xpose.msra.mxu1 %v17748_v6  ;;  %6736 = vmatprep.mubr.f32.mxu1 %v1598_v7  ;;  %v17758_v51 = vpack.c.bf16 %v764_v42, %v359_v41 }
 0x1bd   :  { %13737 = vmatmul.mubr.f32.vlgmr.msra.gmra.mrb[0].mxu0 %v2440_v46  ;;  %17751 = vmatprep.subr.bf16.mxu1 %v17750_v11  ;;  %v17756_v46 = vpack.c.bf16 %v761_v39, %v356_v38  ;;  %v1624_v11 = vrot.slane %v180_v5, %v18940_v12  ;;  %v770_v38 = vld [vmem:[#allocation5 + $0x1010] sm:$0x3]  ;;  %v564_v39 = vld [vmem:[#allocation5 + $0x9a0] sm:$0xff] }
 0x1be   :  { %18153 = vmatpush1.bf16.xpose.msra.mxu0 %v18152_v13  ;;  %13806 = vmatprep.mubr.f32.mxu0 %v2449_v14  ;;  %v360_v13 = vld [vmem:[#allocation5 + $0x340] sm:$0xff]  ;;  %v765_v14 = vld [vmem:[#allocation5 + $0xfe8] sm:$0x3] }
 0x1bf   :  { %18155 = vmatprep.subr.bf16.mxu0 %v18154_v16  ;;  %v363_v16 = vld [vmem:[#allocation5 + $0x358] sm:$0xff]  ;;  %v1632_v22 = vcombine.high %v1624_v11, %v1624_v11 }
 0x1c3   :  { %6737 = vmatmul.mubr.f32.vlgmr.msra.gmra.mrb[0].mxu1 %v1590_v61  ;;  %v361_v61 = vld [vmem:[#allocation5 + $0x348] sm:$0xff] }
 0x1c4   :  { %17753 = vmatpush1.bf16.xpose.msra.mxu1 %v17752_v27  ;;  %6806 = vmatprep.mubr.f32.mxu1 %v1599_v28  ;;  %v17762_v6 = vpack.c.bf16 %v766_v62, %v361_v61  ;;  %v18168_v28 = vpack.c.bf16 %v967_v19, %v562_v18  ;;  %v569_v62 = vld [vmem:[#allocation5 + $0x9c8] sm:$0xff]  ;;  %v571_v18 = vld [vmem:[#allocation5 + $0x9d8] sm:$0xff]  ;;  %v976_v19 = vld [vmem:[#allocation5 + $0x1680] sm:$0x3] }
 0x1c5   :  { %13807 = vmatmul.mubr.f32.vlgmr.msra.gmra.mrb[0].mxu0 %v2447_v0  ;;  %17755 = vmatprep.subr.bf16.mxu1 %v17754_v32  ;;  %v965_v0 = vld [vmem:[#allocation5 + $0x1628] sm:$0x3]  ;;  %v1631_v32 = vrot.slane %v1617_v26, %v18940_v12  ;;  %v18182_v26 = vpack.c.bf16 %v976_v19, %v571_v18  ;;  %v234_v19 = vmax.f32 %v132_v9, 0.0 }
 0x1c6   :  { %18157 = vmatpush1.bf16.xpose.msra.mxu0 %v18156_v33  ;;  %13876 = vmatprep.mubr.f32.mxu0 %v2465_v34  ;;  %v18164_v7 = vpack.c.bf16 %v965_v0, %v560_v63  ;;  %v362_v33 = vld [vmem:[#allocation5 + $0x350] sm:$0xff]  ;;  %v767_v34 = vld [vmem:[#allocation5 + $0xff8] sm:$0x3]  ;;  %v1634_v0 = vcombine.high %v181_v45, %v181_v45 }
 0x1c7   :  { %18159 = vmatprep.subr.bf16.mxu0 %v18158_v36  ;;  %v2491_v36 = vrot.slane %v231_v30, %v18940_v12  ;;  %v17768_v41 = vpack.c.bf16 %v767_v34, %v362_v33  ;;  %v1633_v42 = vcombine.high %v1631_v32, %v1631_v32  ;;  %v974_v63 = vld [vmem:[#allocation5 + $0x1670] sm:$0x3]  ;;  %v2515_v30 = vrot.slane %v2501_v25, %v18940_v12  ;;  %v975_v34 = vld [vmem:[#allocation5 + $0x1678] sm:$0x3]  ;;  %v82_v25 = vld [vmem:[#allocation2 + $0xf0] sm:$0xff] }
 0x1c8   :  { %v18178_v5 = vpack.c.bf16 %v974_v63, %v569_v62  ;;  %v570_v33 = vld [vmem:[#allocation5 + $0x9d0] sm:$0xff]  ;;  %v2518_v63 = vcombine.high %v233_v44, %v233_v44  ;;  %v184_v35 = vmax.f32 %v82_v25, 0.0  ;;  %v134_v25 = vld [vmem:[#allocation2 + $0x290] sm:$0xff] }
 0x1c9   :  { %v2499_v48 = vcombine.high %v2491_v36, %v2491_v36  ;;  %v2517_v43 = vcombine.high %v2515_v30, %v2515_v30 }
 0x1cb   :  { %6807 = vmatmul.mubr.f32.vlgmr.msra.gmra.mrb[0].mxu1 %v1597_v17  ;;  %v768_v17 = vld [vmem:[#allocation5 + $0x1000] sm:$0x3] }
 0x1cc   :  { %17757 = vmatpush1.bf16.xpose.msra.mxu1 %v17756_v46  ;;  %6876 = vmatprep.mubr.f32.mxu1 %v1615_v47  ;;  %v17766_v27 = vpack.c.bf16 %v768_v17, %v363_v16 }
 0x1cd   :  { %13877 = vmatmul.mubr.f32.vlgmr.msra.gmra.mrb[0].mxu0 %v2457_v21  ;;  %17759 = vmatprep.subr.bf16.mxu1 %v17758_v51  ;;  %v17764_v21 = vpack.c.bf16 %v765_v14, %v360_v13  ;;  %v1641_v51 = vrot.slane %v181_v45, %v18940_v12  ;;  %v774_v13 = vld [vmem:[#allocation5 + $0x1030] sm:$0x3]  ;;  %v568_v14 = vld [vmem:[#allocation5 + $0x9c0] sm:$0xff] }
 0x1ce   :  { %18161 = vmatpush1.bf16.xpose.msra.mxu0 %v18160_v52  ;;  %13946 = vmatprep.mubr.f32.mxu0 %v2466_v53  ;;  %v364_v52 = vld [vmem:[#allocation5 + $0x360] sm:$0xff]  ;;  %v769_v53 = vld [vmem:[#allocation5 + $0x1008] sm:$0x3] }
 0x1cf   :  { %18163 = vmatprep.subr.bf16.mxu0 %v18162_v55  ;;  %v367_v55 = vld [vmem:[#allocation5 + $0x378] sm:$0xff]  ;;  %v1649_v61 = vcombine.high %v1641_v51, %v1641_v51 }
 0x1d3   :  { %6877 = vmatmul.mubr.f32.vlgmr.msra.gmra.mrb[0].mxu1 %v1607_v37  ;;  %v365_v37 = vld [vmem:[#allocation5 + $0x368] sm:$0xff] }
 0x1d4   :  { %17761 = vmatpush1.bf16.xpose.msra.mxu1 %v17760_v1  ;;  %6946 = vmatprep.mubr.f32.mxu1 %v1616_v2  ;;  %v17770_v46 = vpack.c.bf16 %v770_v38, %v365_v37  ;;  %v18176_v2 = vpack.c.bf16 %v971_v58, %v566_v57  ;;  %v573_v38 = vld [vmem:[#allocation5 + $0x9e8] sm:$0xff]  ;;  %v575_v57 = vld [vmem:[#allocation5 + $0x9f8] sm:$0xff]  ;;  %v980_v58 = vld [vmem:[#allocation5 + $0x16a0] sm:$0x3] }
 0x1d5   :  { %13947 = vmatmul.mubr.f32.vlgmr.msra.gmra.mrb[0].mxu0 %v2464_v40  ;;  %17763 = vmatprep.subr.bf16.mxu1 %v17762_v6  ;;  %v969_v40 = vld [vmem:[#allocation5 + $0x1648] sm:$0x3]  ;;  %v1648_v6 = vrot.slane %v1634_v0, %v18940_v12  ;;  %v18190_v0 = vpack.c.bf16 %v980_v58, %v575_v57  ;;  %v235_v58 = vmax.f32 %v133_v49, 0.0 }
 0x1d6   :  { %18165 = vmatpush1.bf16.xpose.msra.mxu0 %v18164_v7  ;;  %14016 = vmatprep.mubr.f32.mxu0 %v2482_v8  ;;  %v18172_v47 = vpack.c.bf16 %v969_v40, %v564_v39  ;;  %v366_v7 = vld [vmem:[#allocation5 + $0x370] sm:$0xff]  ;;  %v771_v8 = vld [vmem:[#allocation5 + $0x1018] sm:$0x3]  ;;  %v1651_v40 = vcombine.high %v182_v20, %v182_v20 }
 0x1d7   :  { %18167 = vmatprep.subr.bf16.mxu0 %v18166_v10  ;;  %v2508_v10 = vrot.slane %v232_v4, %v18940_v12  ;;  %v17776_v16 = vpack.c.bf16 %v771_v8, %v366_v7  ;;  %v1650_v17 = vcombine.high %v1648_v6, %v1648_v6  ;;  %v978_v39 = vld [vmem:[#allocation5 + $0x1690] sm:$0x3]  ;;  %v2532_v4 = vrot.slane %v2518_v63, %v18940_v12  ;;  %v979_v8 = vld [vmem:[#allocation5 + $0x1698] sm:$0x3] }
 0x1d8   :  { %v18186_v45 = vpack.c.bf16 %v978_v39, %v573_v38  ;;  %v574_v7 = vld [vmem:[#allocation5 + $0x9f0] sm:$0xff]  ;;  %v2535_v39 = vcombine.high %v234_v19, %v234_v19 }
 0x1d9   :  { %v2516_v24 = vcombine.high %v2508_v10, %v2508_v10  ;;  %v2534_v18 = vcombine.high %v2532_v4, %v2532_v4  ;;  %v83_v63 = vld [vmem:[#allocation2 + $0xf8] sm:$0xff] }
 0x1da   :  { %v185_v9 = vmax.f32 %v83_v63, 0.0  ;;  %v135_v63 = vld [vmem:[#allocation2 + $0x298] sm:$0xff] }
 0x1db   :  { %6947 = vmatmul.mubr.f32.vlgmr.msra.gmra.mrb[0].mxu1 %v1614_v56  ;;  %v772_v56 = vld [vmem:[#allocation5 + $0x1020] sm:$0x3] }
 0x1dc   :  { %17765 = vmatpush1.bf16.xpose.msra.mxu1 %v17764_v21  ;;  %7016 = vmatprep.mubr.f32.mxu1 %v1632_v22  ;;  %v17774_v1 = vpack.c.bf16 %v772_v56, %v367_v55 }
 0x1dd   :  { %14017 = vmatmul.mubr.f32.vlgmr.msra.gmra.mrb[0].mxu0 %v2474_v60  ;;  %17767 = vmatprep.subr.bf16.mxu1 %v17766_v27  ;;  %v17772_v60 = vpack.c.bf16 %v769_v53, %v364_v52  ;;  %v1658_v27 = vrot.slane %v182_v20, %v18940_v12  ;;  %v778_v52 = vld [vmem:[#allocation5 + $0x1050] sm:$0x3]  ;;  %v572_v53 = vld [vmem:[#allocation5 + $0x9e0] sm:$0xff] }
 0x1de   :  { %18169 = vmatpush1.bf16.xpose.msra.mxu0 %v18168_v28  ;;  %14086 = vmatprep.mubr.f32.mxu0 %v2483_v29  ;;  %v368_v28 = vld [vmem:[#allocation5 + $0x380] sm:$0xff]  ;;  %v773_v29 = vld [vmem:[#allocation5 + $0x1028] sm:$0x3] }
 0x1df   :  { %18171 = vmatprep.subr.bf16.mxu0 %v18170_v31  ;;  %v371_v31 = vld [vmem:[#allocation5 + $0x398] sm:$0xff]  ;;  %v1666_v37 = vcombine.high %v1658_v27, %v1658_v27 }
 0x1e3   :  { %7017 = vmatmul.mubr.f32.vlgmr.msra.gmra.mrb[0].mxu1 %v1624_v11  ;;  %v369_v11 = vld [vmem:[#allocation5 + $0x388] sm:$0xff] }
 0x1e4   :  { %17769 = vmatpush1.bf16.xpose.msra.mxu1 %v17768_v41  ;;  %7086 = vmatprep.mubr.f32.mxu1 %v1633_v42  ;;  %v17778_v21 = vpack.c.bf16 %v774_v13, %v369_v11  ;;  %v18184_v42 = vpack.c.bf16 %v975_v34, %v570_v33  ;;  %v577_v13 = vld [vmem:[#allocation5 + $0xa08] sm:$0xff]  ;;  %v579_v33 = vld [vmem:[#allocation5 + $0xa18] sm:$0xff]  ;;  %v984_v34 = vld [vmem:[#allocation5 + $0x16c0] sm:$0x3] }
 0x1e5   :  { %14087 = vmatmul.mubr.f32.vlgmr.msra.gmra.mrb[0].mxu0 %v2481_v15  ;;  %17771 = vmatprep.subr.bf16.mxu1 %v17770_v46  ;;  %v973_v15 = vld [vmem:[#allocation5 + $0x1668] sm:$0x3]  ;;  %v1665_v46 = vrot.slane %v1651_v40, %v18940_v12  ;;  %v18198_v40 = vpack.c.bf16 %v984_v34, %v579_v33  ;;  %v236_v34 = vmax.f32 %v134_v25, 0.0 }
 0x1e6   :  { %18173 = vmatpush1.bf16.xpose.msra.mxu0 %v18172_v47  ;;  %14156 = vmatprep.mubr.f32.mxu0 %v2499_v48  ;;  %v18180_v22 = vpack.c.bf16 %v973_v15, %v568_v14  ;;  %v370_v47 = vld [vmem:[#allocation5 + $0x390] sm:$0xff]  ;;  %v775_v48 = vld [vmem:[#allocation5 + $0x1038] sm:$0x3]  ;;  %v1668_v15 = vcombine.high %v183_v59, %v183_v59 }
 0x1e7   :  { %18175 = vmatprep.subr.bf16.mxu0 %v18174_v50  ;;  %v2525_v50 = vrot.slane %v233_v44, %v18940_v12  ;;  %v17784_v55 = vpack.c.bf16 %v775_v48, %v370_v47  ;;  %v1667_v56 = vcombine.high %v1665_v46, %v1665_v46  ;;  %v982_v14 = vld [vmem:[#allocation5 + $0x16b0] sm:$0x3]  ;;  %v2549_v44 = vrot.slane %v2535_v39, %v18940_v12  ;;  %v983_v48 = vld [vmem:[#allocation5 + $0x16b8] sm:$0x3] }
 0x1e8   :  { %v18194_v20 = vpack.c.bf16 %v982_v14, %v577_v13  ;;  %v578_v47 = vld [vmem:[#allocation5 + $0xa10] sm:$0xff]  ;;  %v2552_v14 = vcombine.high %v235_v58, %v235_v58 }
 0x1e9   :  { %v2533_v62 = vcombine.high %v2525_v50, %v2525_v50  ;;  %v2551_v57 = vcombine.high %v2549_v44, %v2549_v44  ;;  %v84_v39 = vld [vmem:[#allocation2 + $0x100] sm:$0xff] }
 0x1ea   :  { %v186_v49 = vmax.f32 %v84_v39, 0.0  ;;  %v136_v39 = vld [vmem:[#allocation2 + $0x2a0] sm:$0xff] }
 0x1eb   :  { %7087 = vmatmul.mubr.f32.vlgmr.msra.gmra.mrb[0].mxu1 %v1631_v32  ;;  %v776_v32 = vld [vmem:[#allocation5 + $0x1040] sm:$0x3] }
 0x1ec   :  { %17773 = vmatpush1.bf16.xpose.msra.mxu1 %v17772_v60  ;;  %7156 = vmatprep.mubr.f32.mxu1 %v1649_v61  ;;  %v17782_v41 = vpack.c.bf16 %v776_v32, %v371_v31 }
 0x1ed   :  { %14157 = vmatmul.mubr.f32.vlgmr.msra.gmra.mrb[0].mxu0 %v2491_v36  ;;  %17775 = vmatprep.subr.bf16.mxu1 %v17774_v1  ;;  %v17780_v36 = vpack.c.bf16 %v773_v29, %v368_v28  ;;  %v1675_v1 = vrot.slane %v183_v59, %v18940_v12  ;;  %v782_v28 = vld [vmem:[#allocation5 + $0x1070] sm:$0x3]  ;;  %v576_v29 = vld [vmem:[#allocation5 + $0xa00] sm:$0xff] }
 0x1ee   :  { %18177 = vmatpush1.bf16.xpose.msra.mxu0 %v18176_v2  ;;  %14226 = vmatprep.mubr.f32.mxu0 %v2500_v3  ;;  %v372_v2 = vld [vmem:[#allocation5 + $0x3a0] sm:$0xff]  ;;  %v777_v3 = vld [vmem:[#allocation5 + $0x1048] sm:$0x3] }
 0x1ef   :  { %18179 = vmatprep.subr.bf16.mxu0 %v18178_v5  ;;  %v375_v5 = vld [vmem:[#allocation5 + $0x3b8] sm:$0xff]  ;;  %v1683_v11 = vcombine.high %v1675_v1, %v1675_v1 }
 0x1f3   :  { %7157 = vmatmul.mubr.f32.vlgmr.msra.gmra.mrb[0].mxu1 %v1641_v51  ;;  %v373_v51 = vld [vmem:[#allocation5 + $0x3a8] sm:$0xff] }
 0x1f4   :  { %17777 = vmatpush1.bf16.xpose.msra.mxu1 %v17776_v16  ;;  %7226 = vmatprep.mubr.f32.mxu1 %v1650_v17  ;;  %v17786_v60 = vpack.c.bf16 %v778_v52, %v373_v51  ;;  %v18192_v17 = vpack.c.bf16 %v979_v8, %v574_v7  ;;  %v581_v52 = vld [vmem:[#allocation5 + $0xa28] sm:$0xff]  ;;  %v583_v7 = vld [vmem:[#allocation5 + $0xa38] sm:$0xff]  ;;  %v988_v8 = vld [vmem:[#allocation5 + $0x16e0] sm:$0x3] }
 0x1f5   :  { %14227 = vmatmul.mubr.f32.vlgmr.msra.gmra.mrb[0].mxu0 %v2498_v54  ;;  %17779 = vmatprep.subr.bf16.mxu1 %v17778_v21  ;;  %v977_v54 = vld [vmem:[#allocation5 + $0x1688] sm:$0x3]  ;;  %v1682_v21 = vrot.slane %v1668_v15, %v18940_v12  ;;  %v18206_v15 = vpack.c.bf16 %v988_v8, %v583_v7  ;;  %v237_v8 = vmax.f32 %v135_v63, 0.0 }
 0x1f6   :  { %18181 = vmatpush1.bf16.xpose.msra.mxu0 %v18180_v22  ;;  %14296 = vmatprep.mubr.f32.mxu0 %v2516_v24  ;;  %v18188_v61 = vpack.c.bf16 %v977_v54, %v572_v53  ;;  %v374_v22 = vld [vmem:[#allocation5 + $0x3b0] sm:$0xff]  ;;  %v779_v24 = vld [vmem:[#allocation5 + $0x1058] sm:$0x3]  ;;  %v1685_v54 = vcombine.high %v184_v35, %v184_v35 }
 0x1f7   :  { %18183 = vmatprep.subr.bf16.mxu0 %v18182_v26  ;;  %v2542_v26 = vrot.slane %v234_v19, %v18940_v12  ;;  %v17792_v31 = vpack.c.bf16 %v779_v24, %v374_v22  ;;  %v1684_v32 = vcombine.high %v1682_v21, %v1682_v21  ;;  %v986_v53 = vld [vmem:[#allocation5 + $0x16d0] sm:$0x3]  ;;  %v2566_v19 = vrot.slane %v2552_v14, %v18940_v12  ;;  %v987_v24 = vld [vmem:[#allocation5 + $0x16d8] sm:$0x3]  ;;  %v85_v14 = vld [vmem:[#allocation2 + $0x108] sm:$0xff] }
 0x1f8   :  { %v18202_v59 = vpack.c.bf16 %v986_v53, %v581_v52  ;;  %v582_v22 = vld [vmem:[#allocation5 + $0xa30] sm:$0xff]  ;;  %v2569_v53 = vcombine.high %v236_v34, %v236_v34  ;;  %v187_v25 = vmax.f32 %v85_v14, 0.0  ;;  %v137_v14 = vld [vmem:[#allocation2 + $0x2a8] sm:$0xff] }
 0x1f9   :  { %v2550_v38 = vcombine.high %v2542_v26, %v2542_v26  ;;  %v2568_v33 = vcombine.high %v2566_v19, %v2566_v19 }
 0x1fb   :  { %7227 = vmatmul.mubr.f32.vlgmr.msra.gmra.mrb[0].mxu1 %v1648_v6  ;;  %v780_v6 = vld [vmem:[#allocation5 + $0x1060] sm:$0x3] }
 0x1fc   :  { %17781 = vmatpush1.bf16.xpose.msra.mxu1 %v17780_v36  ;;  %7296 = vmatprep.mubr.f32.mxu1 %v1666_v37  ;;  %v17790_v16 = vpack.c.bf16 %v780_v6, %v375_v5 }
 0x1fd   :  { %14297 = vmatmul.mubr.f32.vlgmr.msra.gmra.mrb[0].mxu0 %v2508_v10  ;;  %17783 = vmatprep.subr.bf16.mxu1 %v17782_v41  ;;  %v17788_v10 = vpack.c.bf16 %v777_v3, %v372_v2  ;;  %v1692_v41 = vrot.slane %v184_v35, %v18940_v12  ;;  %v786_v2 = vld [vmem:[#allocation5 + $0x1090] sm:$0x3]  ;;  %v580_v3 = vld [vmem:[#allocation5 + $0xa20] sm:$0xff] }
 0x1fe   :  { %18185 = vmatpush1.bf16.xpose.msra.mxu0 %v18184_v42  ;;  %14366 = vmatprep.mubr.f32.mxu0 %v2517_v43  ;;  %v376_v42 = vld [vmem:[#allocation5 + $0x3c0] sm:$0xff]  ;;  %v781_v43 = vld [vmem:[#allocation5 + $0x1068] sm:$0x3] }
 0x1ff   :  { %18187 = vmatprep.subr.bf16.mxu0 %v18186_v45  ;;  %v379_v45 = vld [vmem:[#allocation5 + $0x3d8] sm:$0xff]  ;;  %v1700_v51 = vcombine.high %v1692_v41, %v1692_v41 }
 0x203   :  { %7297 = vmatmul.mubr.f32.vlgmr.msra.gmra.mrb[0].mxu1 %v1658_v27  ;;  %v377_v27 = vld [vmem:[#allocation5 + $0x3c8] sm:$0xff] }
 0x204   :  { %17785 = vmatpush1.bf16.xpose.msra.mxu1 %v17784_v55  ;;  %7366 = vmatprep.mubr.f32.mxu1 %v1667_v56  ;;  %v17794_v36 = vpack.c.bf16 %v782_v28, %v377_v27  ;;  %v18200_v56 = vpack.c.bf16 %v983_v48, %v578_v47  ;;  %v585_v28 = vld [vmem:[#allocation5 + $0xa48] sm:$0xff]  ;;  %v587_v47 = vld [vmem:[#allocation5 + $0xa58] sm:$0xff]  ;;  %v992_v48 = vld [vmem:[#allocation5 + $0x1700] sm:$0x3] }
 0x205   :  { %14367 = vmatmul.mubr.f32.vlgmr.msra.gmra.mrb[0].mxu0 %v2515_v30  ;;  %17787 = vmatprep.subr.bf16.mxu1 %v17786_v60  ;;  %v981_v30 = vld [vmem:[#allocation5 + $0x16a8] sm:$0x3]  ;;  %v1699_v60 = vrot.slane %v1685_v54, %v18940_v12  ;;  %v18214_v54 = vpack.c.bf16 %v992_v48, %v587_v47  ;;  %v238_v48 = vmax.f32 %v136_v39, 0.0 }
 0x206   :  { %18189 = vmatpush1.bf16.xpose.msra.mxu0 %v18188_v61  ;;  %14436 = vmatprep.mubr.f32.mxu0 %v2533_v62  ;;  %v18196_v37 = vpack.c.bf16 %v981_v30, %v576_v29  ;;  %v378_v61 = vld [vmem:[#allocation5 + $0x3d0] sm:$0xff]  ;;  %v783_v62 = vld [vmem:[#allocation5 + $0x1078] sm:$0x3]  ;;  %v1702_v30 = vcombine.high %v185_v9, %v185_v9 }
 0x207   :  { %18191 = vmatprep.subr.bf16.mxu0 %v18190_v0  ;;  %v2559_v0 = vrot.slane %v235_v58, %v18940_v12  ;;  %v17800_v5 = vpack.c.bf16 %v783_v62, %v378_v61  ;;  %v1701_v6 = vcombine.high %v1699_v60, %v1699_v60  ;;  %v990_v29 = vld [vmem:[#allocation5 + $0x16f0] sm:$0x3]  ;;  %v2583_v58 = vrot.slane %v2569_v53, %v18940_v12  ;;  %v991_v62 = vld [vmem:[#allocation5 + $0x16f8] sm:$0x3]  ;;  %v86_v53 = vld [vmem:[#allocation2 + $0x110] sm:$0xff] }
 0x208   :  { %v18210_v35 = vpack.c.bf16 %v990_v29, %v585_v28  ;;  %v586_v61 = vld [vmem:[#allocation5 + $0xa50] sm:$0xff]  ;;  %v2586_v29 = vcombine.high %v237_v8, %v237_v8  ;;  %v188_v63 = vmax.f32 %v86_v53, 0.0  ;;  %v138_v53 = vld [vmem:[#allocation2 + $0x2b0] sm:$0xff] }
 0x209   :  { %v2567_v13 = vcombine.high %v2559_v0, %v2559_v0  ;;  %v2585_v7 = vcombine.high %v2583_v58, %v2583_v58 }
 0x20b   :  { %7367 = vmatmul.mubr.f32.vlgmr.msra.gmra.mrb[0].mxu1 %v1665_v46  ;;  %v784_v46 = vld [vmem:[#allocation5 + $0x1080] sm:$0x3] }
 0x20c   :  { %17789 = vmatpush1.bf16.xpose.msra.mxu1 %v17788_v10  ;;  %7436 = vmatprep.mubr.f32.mxu1 %v1683_v11  ;;  %v17798_v55 = vpack.c.bf16 %v784_v46, %v379_v45 }
 0x20d   :  { %14437 = vmatmul.mubr.f32.vlgmr.msra.gmra.mrb[0].mxu0 %v2525_v50  ;;  %17791 = vmatprep.subr.bf16.mxu1 %v17790_v16  ;;  %v17796_v50 = vpack.c.bf16 %v781_v43, %v376_v42  ;;  %v1709_v16 = vrot.slane %v185_v9, %v18940_v12  ;;  %v790_v42 = vld [vmem:[#allocation5 + $0x10b0] sm:$0x3]  ;;  %v584_v43 = vld [vmem:[#allocation5 + $0xa40] sm:$0xff] }
 0x20e   :  { %18193 = vmatpush1.bf16.xpose.msra.mxu0 %v18192_v17  ;;  %14506 = vmatprep.mubr.f32.mxu0 %v2534_v18  ;;  %v380_v17 = vld [vmem:[#allocation5 + $0x3e0] sm:$0xff]  ;;  %v785_v18 = vld [vmem:[#allocation5 + $0x1088] sm:$0x3] }
 0x20f   :  { %18195 = vmatprep.subr.bf16.mxu0 %v18194_v20  ;;  %v383_v20 = vld [vmem:[#allocation5 + $0x3f8] sm:$0xff]  ;;  %v1717_v27 = vcombine.high %v1709_v16, %v1709_v16 }
 0x213   :  { %7437 = vmatmul.mubr.f32.vlgmr.msra.gmra.mrb[0].mxu1 %v1675_v1  ;;  %v381_v1 = vld [vmem:[#allocation5 + $0x3e8] sm:$0xff] }
 0x214   :  { %17793 = vmatpush1.bf16.xpose.msra.mxu1 %v17792_v31  ;;  %7506 = vmatprep.mubr.f32.mxu1 %v1684_v32  ;;  %v17802_v10 = vpack.c.bf16 %v786_v2, %v381_v1  ;;  %v18208_v32 = vpack.c.bf16 %v987_v24, %v582_v22  ;;  %v589_v2 = vld [vmem:[#allocation5 + $0xa68] sm:$0xff]  ;;  %v591_v22 = vld [vmem:[#allocation5 + $0xa78] sm:$0xff]  ;;  %v996_v24 = vld [vmem:[#allocation5 + $0x1720] sm:$0x3] }
 0x215   :  { %14507 = vmatmul.mubr.f32.vlgmr.msra.gmra.mrb[0].mxu0 %v2532_v4  ;;  %17795 = vmatprep.subr.bf16.mxu1 %v17794_v36  ;;  %v985_v4 = vld [vmem:[#allocation5 + $0x16c8] sm:$0x3]  ;;  %v1716_v36 = vrot.slane %v1702_v30, %v18940_v12  ;;  %v18222_v30 = vpack.c.bf16 %v996_v24, %v591_v22  ;;  %v239_v24 = vmax.f32 %v137_v14, 0.0 }
 0x216   :  { %18197 = vmatpush1.bf16.xpose.msra.mxu0 %v18196_v37  ;;  %14576 = vmatprep.mubr.f32.mxu0 %v2550_v38  ;;  %v18204_v11 = vpack.c.bf16 %v985_v4, %v580_v3  ;;  %v382_v37 = vld [vmem:[#allocation5 + $0x3f0] sm:$0xff]  ;;  %v787_v38 = vld [vmem:[#allocation5 + $0x1098] sm:$0x3]  ;;  %v1719_v4 = vcombine.high %v186_v49, %v186_v49 }
 0x217   :  { %18199 = vmatprep.subr.bf16.mxu0 %v18198_v40  ;;  %v2576_v40 = vrot.slane %v236_v34, %v18940_v12  ;;  %v17808_v45 = vpack.c.bf16 %v787_v38, %v382_v37  ;;  %v1718_v46 = vcombine.high %v1716_v36, %v1716_v36  ;;  %v994_v3 = vld [vmem:[#allocation5 + $0x1710] sm:$0x3]  ;;  %v2600_v34 = vrot.slane %v2586_v29, %v18940_v12  ;;  %v995_v38 = vld [vmem:[#allocation5 + $0x1718] sm:$0x3] }
 0x218   :  { %v18218_v9 = vpack.c.bf16 %v994_v3, %v589_v2  ;;  %v590_v37 = vld [vmem:[#allocation5 + $0xa70] sm:$0xff]  ;;  %v2603_v3 = vcombine.high %v238_v48, %v238_v48 }
 0x219   :  { %v2584_v52 = vcombine.high %v2576_v40, %v2576_v40  ;;  %v2602_v47 = vcombine.high %v2600_v34, %v2600_v34  ;;  %v87_v29 = vld [vmem:[#allocation2 + $0x118] sm:$0xff] }
 0x21a   :  { %v189_v39 = vmax.f32 %v87_v29, 0.0  ;;  %v139_v29 = vld [vmem:[#allocation2 + $0x2b8] sm:$0xff] }
 0x21b   :  { %7507 = vmatmul.mubr.f32.vlgmr.msra.gmra.mrb[0].mxu1 %v1682_v21  ;;  %v788_v21 = vld [vmem:[#allocation5 + $0x10a0] sm:$0x3] }
 0x21c   :  { %17797 = vmatpush1.bf16.xpose.msra.mxu1 %v17796_v50  ;;  %7576 = vmatprep.mubr.f32.mxu1 %v1700_v51  ;;  %v17806_v31 = vpack.c.bf16 %v788_v21, %v383_v20 }
 0x21d   :  { %14577 = vmatmul.mubr.f32.vlgmr.msra.gmra.mrb[0].mxu0 %v2542_v26  ;;  %17799 = vmatprep.subr.bf16.mxu1 %v17798_v55  ;;  %v17804_v26 = vpack.c.bf16 %v785_v18, %v380_v17  ;;  %v1726_v55 = vrot.slane %v186_v49, %v18940_v12  ;;  %v794_v17 = vld [vmem:[#allocation5 + $0x10d0] sm:$0x3]  ;;  %v588_v18 = vld [vmem:[#allocation5 + $0xa60] sm:$0xff] }
 0x21e   :  { %18201 = vmatpush1.bf16.xpose.msra.mxu0 %v18200_v56  ;;  %14646 = vmatprep.mubr.f32.mxu0 %v2551_v57  ;;  %v384_v56 = vld [vmem:[#allocation5 + $0x400] sm:$0xff]  ;;  %v789_v57 = vld [vmem:[#allocation5 + $0x10a8] sm:$0x3] }
 0x21f   :  { %18203 = vmatprep.subr.bf16.mxu0 %v18202_v59  ;;  %v387_v59 = vld [vmem:[#allocation5 + $0x418] sm:$0xff]  ;;  %v1734_v1 = vcombine.high %v1726_v55, %v1726_v55 }
 0x223   :  { %7577 = vmatmul.mubr.f32.vlgmr.msra.gmra.mrb[0].mxu1 %v1692_v41  ;;  %v385_v41 = vld [vmem:[#allocation5 + $0x408] sm:$0xff] }
 0x224   :  { %17801 = vmatpush1.bf16.xpose.msra.mxu1 %v17800_v5  ;;  %7646 = vmatprep.mubr.f32.mxu1 %v1701_v6  ;;  %v17810_v50 = vpack.c.bf16 %v790_v42, %v385_v41  ;;  %v18216_v6 = vpack.c.bf16 %v991_v62, %v586_v61  ;;  %v593_v42 = vld [vmem:[#allocation5 + $0xa88] sm:$0xff]  ;;  %v595_v61 = vld [vmem:[#allocation5 + $0xa98] sm:$0xff]  ;;  %v1000_v62 = vld [vmem:[#allocation5 + $0x1740] sm:$0x3] }
 0x225   :  { %14647 = vmatmul.mubr.f32.vlgmr.msra.gmra.mrb[0].mxu0 %v2549_v44  ;;  %17803 = vmatprep.subr.bf16.mxu1 %v17802_v10  ;;  %v989_v44 = vld [vmem:[#allocation5 + $0x16e8] sm:$0x3]  ;;  %v1733_v10 = vrot.slane %v1719_v4, %v18940_v12  ;;  %v18230_v4 = vpack.c.bf16 %v1000_v62, %v595_v61  ;;  %v240_v62 = vmax.f32 %v138_v53, 0.0 }
 0x226   :  { %18205 = vmatpush1.bf16.xpose.msra.mxu0 %v18204_v11  ;;  %14716 = vmatprep.mubr.f32.mxu0 %v2567_v13  ;;  %v18212_v51 = vpack.c.bf16 %v989_v44, %v584_v43  ;;  %v386_v11 = vld [vmem:[#allocation5 + $0x410] sm:$0xff]  ;;  %v791_v13 = vld [vmem:[#allocation5 + $0x10b8] sm:$0x3]  ;;  %v1736_v44 = vcombine.high %v187_v25, %v187_v25 }
 0x227   :  { %18207 = vmatprep.subr.bf16.mxu0 %v18206_v15  ;;  %v2593_v15 = vrot.slane %v237_v8, %v18940_v12  ;;  %v17816_v20 = vpack.c.bf16 %v791_v13, %v386_v11  ;;  %v1735_v21 = vcombine.high %v1733_v10, %v1733_v10  ;;  %v998_v43 = vld [vmem:[#allocation5 + $0x1730] sm:$0x3]  ;;  %v2617_v8 = vrot.slane %v2603_v3, %v18940_v12  ;;  %v999_v13 = vld [vmem:[#allocation5 + $0x1738] sm:$0x3] }
 0x228   :  { %v18226_v49 = vpack.c.bf16 %v998_v43, %v593_v42  ;;  %v594_v11 = vld [vmem:[#allocation5 + $0xa90] sm:$0xff]  ;;  %v2620_v43 = vcombine.high %v239_v24, %v239_v24 }
 0x229   :  { %v2601_v28 = vcombine.high %v2593_v15, %v2593_v15  ;;  %v2619_v22 = vcombine.high %v2617_v8, %v2617_v8  ;;  %v88_v3 = vld [vmem:[#allocation2 + $0x120] sm:$0xff] }
 0x22a   :  { %v190_v14 = vmax.f32 %v88_v3, 0.0  ;;  %v140_v3 = vld [vmem:[#allocation2 + $0x2c0] sm:$0xff] }
 0x22b   :  { %7647 = vmatmul.mubr.f32.vlgmr.msra.gmra.mrb[0].mxu1 %v1699_v60  ;;  %v792_v60 = vld [vmem:[#allocation5 + $0x10c0] sm:$0x3] }
 0x22c   :  { %17805 = vmatpush1.bf16.xpose.msra.mxu1 %v17804_v26  ;;  %7716 = vmatprep.mubr.f32.mxu1 %v1717_v27  ;;  %v17814_v5 = vpack.c.bf16 %v792_v60, %v387_v59 }
 0x22d   :  { %14717 = vmatmul.mubr.f32.vlgmr.msra.gmra.mrb[0].mxu0 %v2559_v0  ;;  %17807 = vmatprep.subr.bf16.mxu1 %v17806_v31  ;;  %v17812_v0 = vpack.c.bf16 %v789_v57, %v384_v56  ;;  %v1743_v31 = vrot.slane %v187_v25, %v18940_v12  ;;  %v798_v56 = vld [vmem:[#allocation5 + $0x10f0] sm:$0x3]  ;;  %v592_v57 = vld [vmem:[#allocation5 + $0xa80] sm:$0xff] }
 0x22e   :  { %18209 = vmatpush1.bf16.xpose.msra.mxu0 %v18208_v32  ;;  %14786 = vmatprep.mubr.f32.mxu0 %v2568_v33  ;;  %v388_v32 = vld [vmem:[#allocation5 + $0x420] sm:$0xff]  ;;  %v793_v33 = vld [vmem:[#allocation5 + $0x10c8] sm:$0x3] }
 0x22f   :  { %18211 = vmatprep.subr.bf16.mxu0 %v18210_v35  ;;  %v391_v35 = vld [vmem:[#allocation5 + $0x438] sm:$0xff]  ;;  %v1751_v41 = vcombine.high %v1743_v31, %v1743_v31 }
 0x233   :  { %7717 = vmatmul.mubr.f32.vlgmr.msra.gmra.mrb[0].mxu1 %v1709_v16  ;;  %v389_v16 = vld [vmem:[#allocation5 + $0x428] sm:$0xff] }
 0x234   :  { %17809 = vmatpush1.bf16.xpose.msra.mxu1 %v17808_v45  ;;  %7786 = vmatprep.mubr.f32.mxu1 %v1718_v46  ;;  %v17818_v26 = vpack.c.bf16 %v794_v17, %v389_v16  ;;  %v18224_v46 = vpack.c.bf16 %v995_v38, %v590_v37  ;;  %v597_v17 = vld [vmem:[#allocation5 + $0xaa8] sm:$0xff]  ;;  %v599_v37 = vld [vmem:[#allocation5 + $0xab8] sm:$0xff]  ;;  %v1004_v38 = vld [vmem:[#allocation5 + $0x1760] sm:$0x3] }
 0x235   :  { %14787 = vmatmul.mubr.f32.vlgmr.msra.gmra.mrb[0].mxu0 %v2566_v19  ;;  %17811 = vmatprep.subr.bf16.mxu1 %v17810_v50  ;;  %v993_v19 = vld [vmem:[#allocation5 + $0x1708] sm:$0x3]  ;;  %v1750_v50 = vrot.slane %v1736_v44, %v18940_v12  ;;  %v18238_v44 = vpack.c.bf16 %v1004_v38, %v599_v37  ;;  %v241_v38 = vmax.f32 %v139_v29, 0.0 }
 0x236   :  { %18213 = vmatpush1.bf16.xpose.msra.mxu0 %v18212_v51  ;;  %14856 = vmatprep.mubr.f32.mxu0 %v2584_v52  ;;  %v18220_v27 = vpack.c.bf16 %v993_v19, %v588_v18  ;;  %v390_v51 = vld [vmem:[#allocation5 + $0x430] sm:$0xff]  ;;  %v795_v52 = vld [vmem:[#allocation5 + $0x10d8] sm:$0x3]  ;;  %v1753_v19 = vcombine.high %v188_v63, %v188_v63 }
 0x237   :  { %18215 = vmatprep.subr.bf16.mxu0 %v18214_v54  ;;  %v2610_v54 = vrot.slane %v238_v48, %v18940_v12  ;;  %v17824_v59 = vpack.c.bf16 %v795_v52, %v390_v51  ;;  %v1752_v60 = vcombine.high %v1750_v50, %v1750_v50  ;;  %v1002_v18 = vld [vmem:[#allocation5 + $0x1750] sm:$0x3]  ;;  %v2634_v48 = vrot.slane %v2620_v43, %v18940_v12  ;;  %v1003_v52 = vld [vmem:[#allocation5 + $0x1758] sm:$0x3]  ;;  %v89_v43 = vld [vmem:[#allocation2 + $0x128] sm:$0xff] }
 0x238   :  { %v18234_v25 = vpack.c.bf16 %v1002_v18, %v597_v17  ;;  %v598_v51 = vld [vmem:[#allocation5 + $0xab0] sm:$0xff]  ;;  %v2637_v18 = vcombine.high %v240_v62, %v240_v62  ;;  %v191_v53 = vmax.f32 %v89_v43, 0.0  ;;  %v141_v43 = vld [vmem:[#allocation2 + $0x2c8] sm:$0xff] }
 0x239   :  { %v2618_v2 = vcombine.high %v2610_v54, %v2610_v54  ;;  %v2636_v61 = vcombine.high %v2634_v48, %v2634_v48 }
 0x23b   :  { %7787 = vmatmul.mubr.f32.vlgmr.msra.gmra.mrb[0].mxu1 %v1716_v36  ;;  %v796_v36 = vld [vmem:[#allocation5 + $0x10e0] sm:$0x3] }
 0x23c   :  { %17813 = vmatpush1.bf16.xpose.msra.mxu1 %v17812_v0  ;;  %7856 = vmatprep.mubr.f32.mxu1 %v1734_v1  ;;  %v17822_v45 = vpack.c.bf16 %v796_v36, %v391_v35 }
 0x23d   :  { %14857 = vmatmul.mubr.f32.vlgmr.msra.gmra.mrb[0].mxu0 %v2576_v40  ;;  %17815 = vmatprep.subr.bf16.mxu1 %v17814_v5  ;;  %v17820_v40 = vpack.c.bf16 %v793_v33, %v388_v32  ;;  %v1760_v5 = vrot.slane %v188_v63, %v18940_v12  ;;  %v802_v32 = vld [vmem:[#allocation5 + $0x1110] sm:$0x3]  ;;  %v596_v33 = vld [vmem:[#allocation5 + $0xaa0] sm:$0xff] }
 0x23e   :  { %18217 = vmatpush1.bf16.xpose.msra.mxu0 %v18216_v6  ;;  %14926 = vmatprep.mubr.f32.mxu0 %v2585_v7  ;;  %v392_v6 = vld [vmem:[#allocation5 + $0x440] sm:$0xff]  ;;  %v797_v7 = vld [vmem:[#allocation5 + $0x10e8] sm:$0x3] }
 0x23f   :  { %18219 = vmatprep.subr.bf16.mxu0 %v18218_v9  ;;  %v395_v9 = vld [vmem:[#allocation5 + $0x458] sm:$0xff]  ;;  %v1768_v16 = vcombine.high %v1760_v5, %v1760_v5 }
 0x243   :  { %7857 = vmatmul.mubr.f32.vlgmr.msra.gmra.mrb[0].mxu1 %v1726_v55  ;;  %v393_v55 = vld [vmem:[#allocation5 + $0x448] sm:$0xff] }
 0x244   :  { %17817 = vmatpush1.bf16.xpose.msra.mxu1 %v17816_v20  ;;  %7926 = vmatprep.mubr.f32.mxu1 %v1735_v21  ;;  %v17826_v0 = vpack.c.bf16 %v798_v56, %v393_v55  ;;  %v18232_v21 = vpack.c.bf16 %v999_v13, %v594_v11  ;;  %v601_v56 = vld [vmem:[#allocation5 + $0xac8] sm:$0xff]  ;;  %v603_v11 = vld [vmem:[#allocation5 + $0xad8] sm:$0xff]  ;;  %v1008_v13 = vld [vmem:[#allocation5 + $0x1780] sm:$0x3] }
 0x245   :  { %14927 = vmatmul.mubr.f32.vlgmr.msra.gmra.mrb[0].mxu0 %v2583_v58  ;;  %17819 = vmatprep.subr.bf16.mxu1 %v17818_v26  ;;  %v997_v58 = vld [vmem:[#allocation5 + $0x1728] sm:$0x3]  ;;  %v1767_v26 = vrot.slane %v1753_v19, %v18940_v12  ;;  %v18246_v19 = vpack.c.bf16 %v1008_v13, %v603_v11  ;;  %v242_v13 = vmax.f32 %v140_v3, 0.0 }
 0x246   :  { %18221 = vmatpush1.bf16.xpose.msra.mxu0 %v18220_v27  ;;  %14996 = vmatprep.mubr.f32.mxu0 %v2601_v28  ;;  %v18228_v1 = vpack.c.bf16 %v997_v58, %v592_v57  ;;  %v394_v27 = vld [vmem:[#allocation5 + $0x450] sm:$0xff]  ;;  %v799_v28 = vld [vmem:[#allocation5 + $0x10f8] sm:$0x3]  ;;  %v1770_v58 = vcombine.high %v189_v39, %v189_v39 }
 0x247   :  { %18223 = vmatprep.subr.bf16.mxu0 %v18222_v30  ;;  %v2627_v30 = vrot.slane %v239_v24, %v18940_v12  ;;  %v17832_v35 = vpack.c.bf16 %v799_v28, %v394_v27  ;;  %v1769_v36 = vcombine.high %v1767_v26, %v1767_v26  ;;  %v1006_v57 = vld [vmem:[#allocation5 + $0x1770] sm:$0x3]  ;;  %v2651_v24 = vrot.slane %v2637_v18, %v18940_v12  ;;  %v1007_v28 = vld [vmem:[#allocation5 + $0x1778] sm:$0x3]  ;;  %v90_v18 = vld [vmem:[#allocation2 + $0x130] sm:$0xff] }
 0x248   :  { %v18242_v63 = vpack.c.bf16 %v1006_v57, %v601_v56  ;;  %v602_v27 = vld [vmem:[#allocation5 + $0xad0] sm:$0xff]  ;;  %v2654_v57 = vcombine.high %v241_v38, %v241_v38  ;;  %v192_v29 = vmax.f32 %v90_v18, 0.0  ;;  %v142_v18 = vld [vmem:[#allocation2 + $0x2d0] sm:$0xff] }
 0x249   :  { %v2635_v42 = vcombine.high %v2627_v30, %v2627_v30  ;;  %v2653_v37 = vcombine.high %v2651_v24, %v2651_v24 }
 0x24b   :  { %7927 = vmatmul.mubr.f32.vlgmr.msra.gmra.mrb[0].mxu1 %v1733_v10  ;;  %v800_v10 = vld [vmem:[#allocation5 + $0x1100] sm:$0x3] }
 0x24c   :  { %17821 = vmatpush1.bf16.xpose.msra.mxu1 %v17820_v40  ;;  %7996 = vmatprep.mubr.f32.mxu1 %v1751_v41  ;;  %v17830_v20 = vpack.c.bf16 %v800_v10, %v395_v9 }
 0x24d   :  { %14997 = vmatmul.mubr.f32.vlgmr.msra.gmra.mrb[0].mxu0 %v2593_v15  ;;  %17823 = vmatprep.subr.bf16.mxu1 %v17822_v45  ;;  %v17828_v15 = vpack.c.bf16 %v797_v7, %v392_v6  ;;  %v1777_v45 = vrot.slane %v189_v39, %v18940_v12  ;;  %v806_v6 = vld [vmem:[#allocation5 + $0x1130] sm:$0x3]  ;;  %v600_v7 = vld [vmem:[#allocation5 + $0xac0] sm:$0xff] }
 0x24e   :  { %18225 = vmatpush1.bf16.xpose.msra.mxu0 %v18224_v46  ;;  %15066 = vmatprep.mubr.f32.mxu0 %v2602_v47  ;;  %v396_v46 = vld [vmem:[#allocation5 + $0x460] sm:$0xff]  ;;  %v801_v47 = vld [vmem:[#allocation5 + $0x1108] sm:$0x3] }
 0x24f   :  { %18227 = vmatprep.subr.bf16.mxu0 %v18226_v49  ;;  %v399_v49 = vld [vmem:[#allocation5 + $0x478] sm:$0xff]  ;;  %v1785_v55 = vcombine.high %v1777_v45, %v1777_v45 }
 0x253   :  { %7997 = vmatmul.mubr.f32.vlgmr.msra.gmra.mrb[0].mxu1 %v1743_v31  ;;  %v397_v31 = vld [vmem:[#allocation5 + $0x468] sm:$0xff] }
 0x254   :  { %17825 = vmatpush1.bf16.xpose.msra.mxu1 %v17824_v59  ;;  %8066 = vmatprep.mubr.f32.mxu1 %v1752_v60  ;;  %v17834_v40 = vpack.c.bf16 %v802_v32, %v397_v31  ;;  %v18240_v60 = vpack.c.bf16 %v1003_v52, %v598_v51  ;;  %v605_v32 = vld [vmem:[#allocation5 + $0xae8] sm:$0xff]  ;;  %v607_v51 = vld [vmem:[#allocation5 + $0xaf8] sm:$0xff]  ;;  %v1012_v52 = vld [vmem:[#allocation5 + $0x17a0] sm:$0x3] }
 0x255   :  { %15067 = vmatmul.mubr.f32.vlgmr.msra.gmra.mrb[0].mxu0 %v2600_v34  ;;  %17827 = vmatprep.subr.bf16.mxu1 %v17826_v0  ;;  %v1001_v34 = vld [vmem:[#allocation5 + $0x1748] sm:$0x3]  ;;  %v1784_v0 = vrot.slane %v1770_v58, %v18940_v12  ;;  %v18254_v58 = vpack.c.bf16 %v1012_v52, %v607_v51  ;;  %v243_v52 = vmax.f32 %v141_v43, 0.0 }
 0x256   :  { %18229 = vmatpush1.bf16.xpose.msra.mxu0 %v18228_v1  ;;  %15136 = vmatprep.mubr.f32.mxu0 %v2618_v2  ;;  %v18236_v41 = vpack.c.bf16 %v1001_v34, %v596_v33  ;;  %v398_v1 = vld [vmem:[#allocation5 + $0x470] sm:$0xff]  ;;  %v803_v2 = vld [vmem:[#allocation5 + $0x1118] sm:$0x3]  ;;  %v1787_v34 = vcombine.high %v190_v14, %v190_v14 }
 0x257   :  { %18231 = vmatprep.subr.bf16.mxu0 %v18230_v4  ;;  %v2644_v4 = vrot.slane %v240_v62, %v18940_v12  ;;  %v17840_v9 = vpack.c.bf16 %v803_v2, %v398_v1  ;;  %v1786_v10 = vcombine.high %v1784_v0, %v1784_v0  ;;  %v1010_v33 = vld [vmem:[#allocation5 + $0x1790] sm:$0x3]  ;;  %v2668_v62 = vrot.slane %v2654_v57, %v18940_v12  ;;  %v1011_v2 = vld [vmem:[#allocation5 + $0x1798] sm:$0x3] }
 0x258   :  { %v18250_v39 = vpack.c.bf16 %v1010_v33, %v605_v32  ;;  %v606_v1 = vld [vmem:[#allocation5 + $0xaf0] sm:$0xff]  ;;  %v2671_v33 = vcombine.high %v242_v13, %v242_v13 }
 0x259   :  { %v2652_v17 = vcombine.high %v2644_v4, %v2644_v4  ;;  %v2670_v11 = vcombine.high %v2668_v62, %v2668_v62  ;;  %v91_v57 = vld [vmem:[#allocation2 + $0x138] sm:$0xff] }
 0x25a   :  { %v193_v3 = vmax.f32 %v91_v57, 0.0  ;;  %v143_v57 = vld [vmem:[#allocation2 + $0x2d8] sm:$0xff] }
 0x25b   :  { %8067 = vmatmul.mubr.f32.vlgmr.msra.gmra.mrb[0].mxu1 %v1750_v50  ;;  %v804_v50 = vld [vmem:[#allocation5 + $0x1120] sm:$0x3] }
 0x25c   :  { %17829 = vmatpush1.bf16.xpose.msra.mxu1 %v17828_v15  ;;  %8136 = vmatprep.mubr.f32.mxu1 %v1768_v16  ;;  %v17838_v59 = vpack.c.bf16 %v804_v50, %v399_v49 }
 0x25d   :  { %15137 = vmatmul.mubr.f32.vlgmr.msra.gmra.mrb[0].mxu0 %v2610_v54  ;;  %17831 = vmatprep.subr.bf16.mxu1 %v17830_v20  ;;  %v17836_v54 = vpack.c.bf16 %v801_v47, %v396_v46  ;;  %v1794_v20 = vrot.slane %v190_v14, %v18940_v12  ;;  %v810_v46 = vld [vmem:[#allocation5 + $0x1150] sm:$0x3]  ;;  %v604_v47 = vld [vmem:[#allocation5 + $0xae0] sm:$0xff] }
 0x25e   :  { %18233 = vmatpush1.bf16.xpose.msra.mxu0 %v18232_v21  ;;  %15206 = vmatprep.mubr.f32.mxu0 %v2619_v22  ;;  %v400_v21 = vld [vmem:[#allocation5 + $0x480] sm:$0xff]  ;;  %v805_v22 = vld [vmem:[#allocation5 + $0x1128] sm:$0x3] }
 0x25f   :  { %18235 = vmatprep.subr.bf16.mxu0 %v18234_v25  ;;  %v403_v25 = vld [vmem:[#allocation5 + $0x498] sm:$0xff]  ;;  %v1802_v31 = vcombine.high %v1794_v20, %v1794_v20 }
 0x263   :  { %8137 = vmatmul.mubr.f32.vlgmr.msra.gmra.mrb[0].mxu1 %v1760_v5  ;;  %v401_v5 = vld [vmem:[#allocation5 + $0x488] sm:$0xff] }
 0x264   :  { %17833 = vmatpush1.bf16.xpose.msra.mxu1 %v17832_v35  ;;  %8206 = vmatprep.mubr.f32.mxu1 %v1769_v36  ;;  %v17842_v15 = vpack.c.bf16 %v806_v6, %v401_v5  ;;  %v18248_v36 = vpack.c.bf16 %v1007_v28, %v602_v27  ;;  %v609_v6 = vld [vmem:[#allocation5 + $0xb08] sm:$0xff]  ;;  %v611_v27 = vld [vmem:[#allocation5 + $0xb18] sm:$0xff]  ;;  %v1016_v28 = vld [vmem:[#allocation5 + $0x17c0] sm:$0x3] }
 0x265   :  { %15207 = vmatmul.mubr.f32.vlgmr.msra.gmra.mrb[0].mxu0 %v2617_v8  ;;  %17835 = vmatprep.subr.bf16.mxu1 %v17834_v40  ;;  %v1005_v8 = vld [vmem:[#allocation5 + $0x1768] sm:$0x3]  ;;  %v1801_v40 = vrot.slane %v1787_v34, %v18940_v12  ;;  %v18262_v34 = vpack.c.bf16 %v1016_v28, %v611_v27  ;;  %v244_v28 = vmax.f32 %v142_v18, 0.0 }
 0x266   :  { %18237 = vmatpush1.bf16.xpose.msra.mxu0 %v18236_v41  ;;  %15276 = vmatprep.mubr.f32.mxu0 %v2635_v42  ;;  %v18244_v16 = vpack.c.bf16 %v1005_v8, %v600_v7  ;;  %v402_v41 = vld [vmem:[#allocation5 + $0x490] sm:$0xff]  ;;  %v807_v42 = vld [vmem:[#allocation5 + $0x1138] sm:$0x3]  ;;  %v1804_v8 = vcombine.high %v191_v53, %v191_v53 }
 0x267   :  { %18239 = vmatprep.subr.bf16.mxu0 %v18238_v44  ;;  %v2661_v44 = vrot.slane %v241_v38, %v18940_v12  ;;  %v17848_v49 = vpack.c.bf16 %v807_v42, %v402_v41  ;;  %v1803_v50 = vcombine.high %v1801_v40, %v1801_v40  ;;  %v1014_v7 = vld [vmem:[#allocation5 + $0x17b0] sm:$0x3]  ;;  %v2685_v38 = vrot.slane %v2671_v33, %v18940_v12  ;;  %v1015_v42 = vld [vmem:[#allocation5 + $0x17b8] sm:$0x3] }
 0x268   :  { %v18258_v14 = vpack.c.bf16 %v1014_v7, %v609_v6  ;;  %v610_v41 = vld [vmem:[#allocation5 + $0xb10] sm:$0xff]  ;;  %v2688_v7 = vcombine.high %v243_v52, %v243_v52 }
 0x269   :  { %v2669_v56 = vcombine.high %v2661_v44, %v2661_v44  ;;  %v2687_v51 = vcombine.high %v2685_v38, %v2685_v38  ;;  %v92_v33 = vld [vmem:[#allocation2 + $0x140] sm:$0xff] }
 0x26a   :  { %v194_v43 = vmax.f32 %v92_v33, 0.0  ;;  %v144_v33 = vld [vmem:[#allocation2 + $0x2e0] sm:$0xff] }
 0x26b   :  { %8207 = vmatmul.mubr.f32.vlgmr.msra.gmra.mrb[0].mxu1 %v1767_v26  ;;  %v808_v26 = vld [vmem:[#allocation5 + $0x1140] sm:$0x3] }
 0x26c   :  { %17837 = vmatpush1.bf16.xpose.msra.mxu1 %v17836_v54  ;;  %8276 = vmatprep.mubr.f32.mxu1 %v1785_v55  ;;  %v17846_v35 = vpack.c.bf16 %v808_v26, %v403_v25 }
 0x26d   :  { %15277 = vmatmul.mubr.f32.vlgmr.msra.gmra.mrb[0].mxu0 %v2627_v30  ;;  %17839 = vmatprep.subr.bf16.mxu1 %v17838_v59  ;;  %v17844_v30 = vpack.c.bf16 %v805_v22, %v400_v21  ;;  %v1811_v59 = vrot.slane %v191_v53, %v18940_v12  ;;  %v814_v21 = vld [vmem:[#allocation5 + $0x1170] sm:$0x3]  ;;  %v608_v22 = vld [vmem:[#allocation5 + $0xb00] sm:$0xff] }
 0x26e   :  { %18241 = vmatpush1.bf16.xpose.msra.mxu0 %v18240_v60  ;;  %15346 = vmatprep.mubr.f32.mxu0 %v2636_v61  ;;  %v404_v60 = vld [vmem:[#allocation5 + $0x4a0] sm:$0xff]  ;;  %v809_v61 = vld [vmem:[#allocation5 + $0x1148] sm:$0x3] }
 0x26f   :  { %18243 = vmatprep.subr.bf16.mxu0 %v18242_v63  ;;  %v407_v63 = vld [vmem:[#allocation5 + $0x4b8] sm:$0xff]  ;;  %v1819_v5 = vcombine.high %v1811_v59, %v1811_v59 }
 0x273   :  { %8277 = vmatmul.mubr.f32.vlgmr.msra.gmra.mrb[0].mxu1 %v1777_v45  ;;  %v405_v45 = vld [vmem:[#allocation5 + $0x4a8] sm:$0xff] }
 0x274   :  { %17841 = vmatpush1.bf16.xpose.msra.mxu1 %v17840_v9  ;;  %8346 = vmatprep.mubr.f32.mxu1 %v1786_v10  ;;  %v17850_v54 = vpack.c.bf16 %v810_v46, %v405_v45  ;;  %v18256_v10 = vpack.c.bf16 %v1011_v2, %v606_v1  ;;  %v613_v46 = vld [vmem:[#allocation5 + $0xb28] sm:$0xff]  ;;  %v615_v1 = vld [vmem:[#allocation5 + $0xb38] sm:$0xff]  ;;  %v1020_v2 = vld [vmem:[#allocation5 + $0x17e0] sm:$0x3] }
 0x275   :  { %15347 = vmatmul.mubr.f32.vlgmr.msra.gmra.mrb[0].mxu0 %v2634_v48  ;;  %17843 = vmatprep.subr.bf16.mxu1 %v17842_v15  ;;  %v1009_v48 = vld [vmem:[#allocation5 + $0x1788] sm:$0x3]  ;;  %v1818_v15 = vrot.slane %v1804_v8, %v18940_v12  ;;  %v18270_v8 = vpack.c.bf16 %v1020_v2, %v615_v1  ;;  %v245_v2 = vmax.f32 %v143_v57, 0.0 }
 0x276   :  { %18245 = vmatpush1.bf16.xpose.msra.mxu0 %v18244_v16  ;;  %15416 = vmatprep.mubr.f32.mxu0 %v2652_v17  ;;  %v18252_v55 = vpack.c.bf16 %v1009_v48, %v604_v47  ;;  %v406_v16 = vld [vmem:[#allocation5 + $0x4b0] sm:$0xff]  ;;  %v811_v17 = vld [vmem:[#allocation5 + $0x1158] sm:$0x3]  ;;  %v1821_v48 = vcombine.high %v192_v29, %v192_v29 }
 0x277   :  { %18247 = vmatprep.subr.bf16.mxu0 %v18246_v19  ;;  %v2678_v19 = vrot.slane %v242_v13, %v18940_v12  ;;  %v17856_v25 = vpack.c.bf16 %v811_v17, %v406_v16  ;;  %v1820_v26 = vcombine.high %v1818_v15, %v1818_v15  ;;  %v1018_v47 = vld [vmem:[#allocation5 + $0x17d0] sm:$0x3]  ;;  %v2702_v13 = vrot.slane %v2688_v7, %v18940_v12  ;;  %v1019_v17 = vld [vmem:[#allocation5 + $0x17d8] sm:$0x3]  ;;  %v93_v7 = vld [vmem:[#allocation2 + $0x148] sm:$0xff] }
 0x278   :  { %v18266_v53 = vpack.c.bf16 %v1018_v47, %v613_v46  ;;  %v614_v16 = vld [vmem:[#allocation5 + $0xb30] sm:$0xff]  ;;  %v2705_v47 = vcombine.high %v244_v28, %v244_v28  ;;  %v195_v18 = vmax.f32 %v93_v7, 0.0  ;;  %v145_v7 = vld [vmem:[#allocation2 + $0x2e8] sm:$0xff] }
 0x279   :  { %v2686_v32 = vcombine.high %v2678_v19, %v2678_v19  ;;  %v2704_v27 = vcombine.high %v2702_v13, %v2702_v13 }
 0x27b   :  { %8347 = vmatmul.mubr.f32.vlgmr.msra.gmra.mrb[0].mxu1 %v1784_v0  ;;  %v812_v0 = vld [vmem:[#allocation5 + $0x1160] sm:$0x3] }
 0x27c   :  { %17845 = vmatpush1.bf16.xpose.msra.mxu1 %v17844_v30  ;;  %8416 = vmatprep.mubr.f32.mxu1 %v1802_v31  ;;  %v17854_v9 = vpack.c.bf16 %v812_v0, %v407_v63 }
 0x27d   :  { %15417 = vmatmul.mubr.f32.vlgmr.msra.gmra.mrb[0].mxu0 %v2644_v4  ;;  %17847 = vmatprep.subr.bf16.mxu1 %v17846_v35  ;;  %v17852_v4 = vpack.c.bf16 %v809_v61, %v404_v60  ;;  %v1828_v35 = vrot.slane %v192_v29, %v18940_v12  ;;  %v818_v60 = vld [vmem:[#allocation5 + $0x1190] sm:$0x3]  ;;  %v612_v61 = vld [vmem:[#allocation5 + $0xb20] sm:$0xff] }
 0x27e   :  { %18249 = vmatpush1.bf16.xpose.msra.mxu0 %v18248_v36  ;;  %15486 = vmatprep.mubr.f32.mxu0 %v2653_v37  ;;  %v408_v36 = vld [vmem:[#allocation5 + $0x4c0] sm:$0xff]  ;;  %v813_v37 = vld [vmem:[#allocation5 + $0x1168] sm:$0x3] }
 0x27f   :  { %18251 = vmatprep.subr.bf16.mxu0 %v18250_v39  ;;  %v411_v39 = vld [vmem:[#allocation5 + $0x4d8] sm:$0xff]  ;;  %v1836_v45 = vcombine.high %v1828_v35, %v1828_v35 }
 0x283   :  { %8417 = vmatmul.mubr.f32.vlgmr.msra.gmra.mrb[0].mxu1 %v1794_v20  ;;  %v409_v20 = vld [vmem:[#allocation5 + $0x4c8] sm:$0xff] }
 0x284   :  { %17849 = vmatpush1.bf16.xpose.msra.mxu1 %v17848_v49  ;;  %8486 = vmatprep.mubr.f32.mxu1 %v1803_v50  ;;  %v17858_v30 = vpack.c.bf16 %v814_v21, %v409_v20  ;;  %v18264_v50 = vpack.c.bf16 %v1015_v42, %v610_v41  ;;  %v617_v21 = vld [vmem:[#allocation5 + $0xb48] sm:$0xff]  ;;  %v619_v41 = vld [vmem:[#allocation5 + $0xb58] sm:$0xff]  ;;  %v1024_v42 = vld [vmem:[#allocation5 + $0x1800] sm:$0x3] }
 0x285   :  { %15487 = vmatmul.mubr.f32.vlgmr.msra.gmra.mrb[0].mxu0 %v2651_v24  ;;  %17851 = vmatprep.subr.bf16.mxu1 %v17850_v54  ;;  %v1013_v24 = vld [vmem:[#allocation5 + $0x17a8] sm:$0x3]  ;;  %v1835_v54 = vrot.slane %v1821_v48, %v18940_v12  ;;  %v18278_v48 = vpack.c.bf16 %v1024_v42, %v619_v41  ;;  %v246_v42 = vmax.f32 %v144_v33, 0.0 }
 0x286   :  { %18253 = vmatpush1.bf16.xpose.msra.mxu0 %v18252_v55  ;;  %15556 = vmatprep.mubr.f32.mxu0 %v2669_v56  ;;  %v18260_v31 = vpack.c.bf16 %v1013_v24, %v608_v22  ;;  %v410_v55 = vld [vmem:[#allocation5 + $0x4d0] sm:$0xff]  ;;  %v815_v56 = vld [vmem:[#allocation5 + $0x1178] sm:$0x3]  ;;  %v1838_v24 = vcombine.high %v193_v3, %v193_v3 }
 0x287   :  { %18255 = vmatprep.subr.bf16.mxu0 %v18254_v58  ;;  %v2695_v58 = vrot.slane %v243_v52, %v18940_v12  ;;  %v17864_v63 = vpack.c.bf16 %v815_v56, %v410_v55  ;;  %v1837_v0 = vcombine.high %v1835_v54, %v1835_v54  ;;  %v1022_v22 = vld [vmem:[#allocation5 + $0x17f0] sm:$0x3]  ;;  %v2719_v52 = vrot.slane %v2705_v47, %v18940_v12  ;;  %v1023_v56 = vld [vmem:[#allocation5 + $0x17f8] sm:$0x3]  ;;  %v94_v47 = vld [vmem:[#allocation2 + $0x150] sm:$0xff] }
 0x288   :  { %v18274_v29 = vpack.c.bf16 %v1022_v22, %v617_v21  ;;  %v618_v55 = vld [vmem:[#allocation5 + $0xb50] sm:$0xff]  ;;  %v2722_v22 = vcombine.high %v245_v2, %v245_v2  ;;  %v196_v57 = vmax.f32 %v94_v47, 0.0  ;;  %v146_v47 = vld [vmem:[#allocation2 + $0x2f0] sm:$0xff] }
 0x289   :  { %v2703_v6 = vcombine.high %v2695_v58, %v2695_v58  ;;  %v2721_v1 = vcombine.high %v2719_v52, %v2719_v52 }
 0x28b   :  { %8487 = vmatmul.mubr.f32.vlgmr.msra.gmra.mrb[0].mxu1 %v1801_v40  ;;  %v816_v40 = vld [vmem:[#allocation5 + $0x1180] sm:$0x3] }
 0x28c   :  { %17853 = vmatpush1.bf16.xpose.msra.mxu1 %v17852_v4  ;;  %8556 = vmatprep.mubr.f32.mxu1 %v1819_v5  ;;  %v17862_v49 = vpack.c.bf16 %v816_v40, %v411_v39 }
 0x28d   :  { %15557 = vmatmul.mubr.f32.vlgmr.msra.gmra.mrb[0].mxu0 %v2661_v44  ;;  %17855 = vmatprep.subr.bf16.mxu1 %v17854_v9  ;;  %v17860_v44 = vpack.c.bf16 %v813_v37, %v408_v36  ;;  %v1845_v9 = vrot.slane %v193_v3, %v18940_v12  ;;  %v822_v36 = vld [vmem:[#allocation5 + $0x11b0] sm:$0x3]  ;;  %v616_v37 = vld [vmem:[#allocation5 + $0xb40] sm:$0xff] }
 0x28e   :  { %18257 = vmatpush1.bf16.xpose.msra.mxu0 %v18256_v10  ;;  %15626 = vmatprep.mubr.f32.mxu0 %v2670_v11  ;;  %v412_v10 = vld [vmem:[#allocation5 + $0x4e0] sm:$0xff]  ;;  %v817_v11 = vld [vmem:[#allocation5 + $0x1188] sm:$0x3] }
 0x28f   :  { %18259 = vmatprep.subr.bf16.mxu0 %v18258_v14  ;;  %v415_v14 = vld [vmem:[#allocation5 + $0x4f8] sm:$0xff]  ;;  %v1853_v20 = vcombine.high %v1845_v9, %v1845_v9 }
 0x293   :  { %8557 = vmatmul.mubr.f32.vlgmr.msra.gmra.mrb[0].mxu1 %v1811_v59  ;;  %v413_v59 = vld [vmem:[#allocation5 + $0x4e8] sm:$0xff] }
 0x294   :  { %17857 = vmatpush1.bf16.xpose.msra.mxu1 %v17856_v25  ;;  %8626 = vmatprep.mubr.f32.mxu1 %v1820_v26  ;;  %v17866_v4 = vpack.c.bf16 %v818_v60, %v413_v59  ;;  %v18272_v26 = vpack.c.bf16 %v1019_v17, %v614_v16  ;;  %v621_v60 = vld [vmem:[#allocation5 + $0xb68] sm:$0xff]  ;;  %v623_v16 = vld [vmem:[#allocation5 + $0xb78] sm:$0xff]  ;;  %v1028_v17 = vld [vmem:[#allocation5 + $0x1820] sm:$0x3] }
 0x295   :  { %15627 = vmatmul.mubr.f32.vlgmr.msra.gmra.mrb[0].mxu0 %v2668_v62  ;;  %17859 = vmatprep.subr.bf16.mxu1 %v17858_v30  ;;  %v1017_v62 = vld [vmem:[#allocation5 + $0x17c8] sm:$0x3]  ;;  %v1852_v30 = vrot.slane %v1838_v24, %v18940_v12  ;;  %v18286_v24 = vpack.c.bf16 %v1028_v17, %v623_v16  ;;  %v247_v17 = vmax.f32 %v145_v7, 0.0 }
 0x296   :  { %18261 = vmatpush1.bf16.xpose.msra.mxu0 %v18260_v31  ;;  %15696 = vmatprep.mubr.f32.mxu0 %v2686_v32  ;;  %v18268_v5 = vpack.c.bf16 %v1017_v62, %v612_v61  ;;  %v414_v31 = vld [vmem:[#allocation5 + $0x4f0] sm:$0xff]  ;;  %v819_v32 = vld [vmem:[#allocation5 + $0x1198] sm:$0x3]  ;;  %v1855_v62 = vcombine.high %v194_v43, %v194_v43 }
 0x297   :  { %18263 = vmatprep.subr.bf16.mxu0 %v18262_v34  ;;  %v2712_v34 = vrot.slane %v244_v28, %v18940_v12  ;;  %v17872_v39 = vpack.c.bf16 %v819_v32, %v414_v31  ;;  %v1854_v40 = vcombine.high %v1852_v30, %v1852_v30  ;;  %v1026_v61 = vld [vmem:[#allocation5 + $0x1810] sm:$0x3]  ;;  %v2736_v28 = vrot.slane %v2722_v22, %v18940_v12  ;;  %v1027_v32 = vld [vmem:[#allocation5 + $0x1818] sm:$0x3] }
 0x298   :  { %v18282_v3 = vpack.c.bf16 %v1026_v61, %v621_v60  ;;  %v622_v31 = vld [vmem:[#allocation5 + $0xb70] sm:$0xff]  ;;  %v2739_v61 = vcombine.high %v246_v42, %v246_v42 }
 0x299   :  { %v2720_v46 = vcombine.high %v2712_v34, %v2712_v34  ;;  %v2738_v41 = vcombine.high %v2736_v28, %v2736_v28  ;;  %v95_v22 = vld [vmem:[#allocation2 + $0x158] sm:$0xff] }
 0x29a   :  { %v197_v33 = vmax.f32 %v95_v22, 0.0  ;;  %v147_v22 = vld [vmem:[#allocation2 + $0x2f8] sm:$0xff] }
 0x29b   :  { %8627 = vmatmul.mubr.f32.vlgmr.msra.gmra.mrb[0].mxu1 %v1818_v15  ;;  %v820_v15 = vld [vmem:[#allocation5 + $0x11a0] sm:$0x3] }
 0x29c   :  { %17861 = vmatpush1.bf16.xpose.msra.mxu1 %v17860_v44  ;;  %8696 = vmatprep.mubr.f32.mxu1 %v1836_v45  ;;  %v17870_v25 = vpack.c.bf16 %v820_v15, %v415_v14 }
 0x29d   :  { %15697 = vmatmul.mubr.f32.vlgmr.msra.gmra.mrb[0].mxu0 %v2678_v19  ;;  %17863 = vmatprep.subr.bf16.mxu1 %v17862_v49  ;;  %v17868_v19 = vpack.c.bf16 %v817_v11, %v412_v10  ;;  %v1862_v49 = vrot.slane %v194_v43, %v18940_v12  ;;  %v826_v10 = vld [vmem:[#allocation5 + $0x11d0] sm:$0x3]  ;;  %v620_v11 = vld [vmem:[#allocation5 + $0xb60] sm:$0xff] }
 0x29e   :  { %18265 = vmatpush1.bf16.xpose.msra.mxu0 %v18264_v50  ;;  %15766 = vmatprep.mubr.f32.mxu0 %v2687_v51  ;;  %v416_v50 = vld [vmem:[#allocation5 + $0x500] sm:$0xff]  ;;  %v821_v51 = vld [vmem:[#allocation5 + $0x11a8] sm:$0x3] }
 0x29f   :  { %18267 = vmatprep.subr.bf16.mxu0 %v18266_v53  ;;  %v419_v53 = vld [vmem:[#allocation5 + $0x518] sm:$0xff]  ;;  %v1870_v59 = vcombine.high %v1862_v49, %v1862_v49 }
 0x2a3   :  { %8697 = vmatmul.mubr.f32.vlgmr.msra.gmra.mrb[0].mxu1 %v1828_v35  ;;  %v417_v35 = vld [vmem:[#allocation5 + $0x508] sm:$0xff] }
 0x2a4   :  { %17865 = vmatpush1.bf16.xpose.msra.mxu1 %v17864_v63  ;;  %8766 = vmatprep.mubr.f32.mxu1 %v1837_v0  ;;  %v17874_v44 = vpack.c.bf16 %v822_v36, %v417_v35  ;;  %v18280_v0 = vpack.c.bf16 %v1023_v56, %v618_v55  ;;  %v625_v36 = vld [vmem:[#allocation5 + $0xb88] sm:$0xff]  ;;  %v627_v55 = vld [vmem:[#allocation5 + $0xb98] sm:$0xff]  ;;  %v1032_v56 = vld [vmem:[#allocation5 + $0x1840] sm:$0x3] }
 0x2a5   :  { %15767 = vmatmul.mubr.f32.vlgmr.msra.gmra.mrb[0].mxu0 %v2685_v38  ;;  %17867 = vmatprep.subr.bf16.mxu1 %v17866_v4  ;;  %v1021_v38 = vld [vmem:[#allocation5 + $0x17e8] sm:$0x3]  ;;  %v1869_v4 = vrot.slane %v1855_v62, %v18940_v12  ;;  %v18294_v62 = vpack.c.bf16 %v1032_v56, %v627_v55  ;;  %v248_v56 = vmax.f32 %v146_v47, 0.0 }
 0x2a6   :  { %18269 = vmatpush1.bf16.xpose.msra.mxu0 %v18268_v5  ;;  %15836 = vmatprep.mubr.f32.mxu0 %v2703_v6  ;;  %v18276_v45 = vpack.c.bf16 %v1021_v38, %v616_v37  ;;  %v418_v5 = vld [vmem:[#allocation5 + $0x510] sm:$0xff]  ;;  %v823_v6 = vld [vmem:[#allocation5 + $0x11b8] sm:$0x3]  ;;  %v1872_v38 = vcombine.high %v195_v18, %v195_v18 }
 0x2a7   :  { %18271 = vmatprep.subr.bf16.mxu0 %v18270_v8  ;;  %v2729_v8 = vrot.slane %v245_v2, %v18940_v12  ;;  %v17880_v14 = vpack.c.bf16 %v823_v6, %v418_v5  ;;  %v1871_v15 = vcombine.high %v1869_v4, %v1869_v4  ;;  %v1030_v37 = vld [vmem:[#allocation5 + $0x1830] sm:$0x3]  ;;  %v2753_v2 = vrot.slane %v2739_v61, %v18940_v12  ;;  %v1031_v6 = vld [vmem:[#allocation5 + $0x1838] sm:$0x3] }
 0x2a8   :  { %v18290_v43 = vpack.c.bf16 %v1030_v37, %v625_v36  ;;  %v626_v5 = vld [vmem:[#allocation5 + $0xb90] sm:$0xff]  ;;  %v2756_v37 = vcombine.high %v247_v17, %v247_v17 }
 0x2a9   :  { %v2737_v21 = vcombine.high %v2729_v8, %v2729_v8  ;;  %v2755_v16 = vcombine.high %v2753_v2, %v2753_v2  ;;  %v96_v61 = vld [vmem:[#allocation2 + $0x160] sm:$0xff] }
 0x2aa   :  { %v198_v7 = vmax.f32 %v96_v61, 0.0  ;;  %v148_v61 = vld [vmem:[#allocation2 + $0x300] sm:$0xff] }
 0x2ab   :  { %8767 = vmatmul.mubr.f32.vlgmr.msra.gmra.mrb[0].mxu1 %v1835_v54  ;;  %v824_v54 = vld [vmem:[#allocation5 + $0x11c0] sm:$0x3] }
 0x2ac   :  { %17869 = vmatpush1.bf16.xpose.msra.mxu1 %v17868_v19  ;;  %8836 = vmatprep.mubr.f32.mxu1 %v1853_v20  ;;  %v17878_v63 = vpack.c.bf16 %v824_v54, %v419_v53 }
 0x2ad   :  { %15837 = vmatmul.mubr.f32.vlgmr.msra.gmra.mrb[0].mxu0 %v2695_v58  ;;  %17871 = vmatprep.subr.bf16.mxu1 %v17870_v25  ;;  %v17876_v58 = vpack.c.bf16 %v821_v51, %v416_v50  ;;  %v1879_v25 = vrot.slane %v195_v18, %v18940_v12  ;;  %v830_v50 = vld [vmem:[#allocation5 + $0x11f0] sm:$0x3]  ;;  %v624_v51 = vld [vmem:[#allocation5 + $0xb80] sm:$0xff] }
 0x2ae   :  { %18273 = vmatpush1.bf16.xpose.msra.mxu0 %v18272_v26  ;;  %15906 = vmatprep.mubr.f32.mxu0 %v2704_v27  ;;  %v420_v26 = vld [vmem:[#allocation5 + $0x520] sm:$0xff]  ;;  %v825_v27 = vld [vmem:[#allocation5 + $0x11c8] sm:$0x3] }
 0x2af   :  { %18275 = vmatprep.subr.bf16.mxu0 %v18274_v29  ;;  %v423_v29 = vld [vmem:[#allocation5 + $0x538] sm:$0xff]  ;;  %v1887_v35 = vcombine.high %v1879_v25, %v1879_v25 }
 0x2b3   :  { %8837 = vmatmul.mubr.f32.vlgmr.msra.gmra.mrb[0].mxu1 %v1845_v9  ;;  %v421_v9 = vld [vmem:[#allocation5 + $0x528] sm:$0xff] }
 0x2b4   :  { %17873 = vmatpush1.bf16.xpose.msra.mxu1 %v17872_v39  ;;  %8906 = vmatprep.mubr.f32.mxu1 %v1854_v40  ;;  %v17882_v19 = vpack.c.bf16 %v826_v10, %v421_v9  ;;  %v18288_v40 = vpack.c.bf16 %v1027_v32, %v622_v31  ;;  %v629_v10 = vld [vmem:[#allocation5 + $0xba8] sm:$0xff]  ;;  %v631_v31 = vld [vmem:[#allocation5 + $0xbb8] sm:$0xff]  ;;  %v1036_v32 = vld [vmem:[#allocation5 + $0x1860] sm:$0x3] }
 0x2b5   :  { %15907 = vmatmul.mubr.f32.vlgmr.msra.gmra.mrb[0].mxu0 %v2702_v13  ;;  %17875 = vmatprep.subr.bf16.mxu1 %v17874_v44  ;;  %v1025_v13 = vld [vmem:[#allocation5 + $0x1808] sm:$0x3]  ;;  %v1886_v44 = vrot.slane %v1872_v38, %v18940_v12  ;;  %v18302_v38 = vpack.c.bf16 %v1036_v32, %v631_v31  ;;  %v249_v32 = vmax.f32 %v147_v22, 0.0 }
 0x2b6   :  { %18277 = vmatpush1.bf16.xpose.msra.mxu0 %v18276_v45  ;;  %15976 = vmatprep.mubr.f32.mxu0 %v2720_v46  ;;  %v18284_v20 = vpack.c.bf16 %v1025_v13, %v620_v11  ;;  %v422_v45 = vld [vmem:[#allocation5 + $0x530] sm:$0xff]  ;;  %v827_v46 = vld [vmem:[#allocation5 + $0x11d8] sm:$0x3]  ;;  %v1889_v13 = vcombine.high %v196_v57, %v196_v57 }
 0x2b7   :  { %18279 = vmatprep.subr.bf16.mxu0 %v18278_v48  ;;  %v2746_v48 = vrot.slane %v246_v42, %v18940_v12  ;;  %v17888_v53 = vpack.c.bf16 %v827_v46, %v422_v45  ;;  %v1888_v54 = vcombine.high %v1886_v44, %v1886_v44  ;;  %v1034_v11 = vld [vmem:[#allocation5 + $0x1850] sm:$0x3]  ;;  %v2770_v42 = vrot.slane %v2756_v37, %v18940_v12  ;;  %v1035_v46 = vld [vmem:[#allocation5 + $0x1858] sm:$0x3]  ;;  %v97_v37 = vld [vmem:[#allocation2 + $0x168] sm:$0xff] }
 0x2b8   :  { %v18298_v18 = vpack.c.bf16 %v1034_v11, %v629_v10  ;;  %v630_v45 = vld [vmem:[#allocation5 + $0xbb0] sm:$0xff]  ;;  %v2773_v11 = vcombine.high %v248_v56, %v248_v56  ;;  %v199_v47 = vmax.f32 %v97_v37, 0.0  ;;  %v149_v37 = vld [vmem:[#allocation2 + $0x308] sm:$0xff] }
 0x2b9   :  { %v2754_v60 = vcombine.high %v2746_v48, %v2746_v48  ;;  %v2772_v55 = vcombine.high %v2770_v42, %v2770_v42 }
 0x2bb   :  { %8907 = vmatmul.mubr.f32.vlgmr.msra.gmra.mrb[0].mxu1 %v1852_v30  ;;  %v828_v30 = vld [vmem:[#allocation5 + $0x11e0] sm:$0x3] }
 0x2bc   :  { %17877 = vmatpush1.bf16.xpose.msra.mxu1 %v17876_v58  ;;  %8976 = vmatprep.mubr.f32.mxu1 %v1870_v59  ;;  %v17886_v39 = vpack.c.bf16 %v828_v30, %v423_v29 }
 0x2bd   :  { %15977 = vmatmul.mubr.f32.vlgmr.msra.gmra.mrb[0].mxu0 %v2712_v34  ;;  %17879 = vmatprep.subr.bf16.mxu1 %v17878_v63  ;;  %v17884_v34 = vpack.c.bf16 %v825_v27, %v420_v26  ;;  %v1896_v63 = vrot.slane %v196_v57, %v18940_v12  ;;  %v834_v26 = vld [vmem:[#allocation5 + $0x1210] sm:$0x3]  ;;  %v628_v27 = vld [vmem:[#allocation5 + $0xba0] sm:$0xff] }
 0x2be   :  { %18281 = vmatpush1.bf16.xpose.msra.mxu0 %v18280_v0  ;;  %16046 = vmatprep.mubr.f32.mxu0 %v2721_v1  ;;  %v424_v0 = vld [vmem:[#allocation5 + $0x540] sm:$0xff]  ;;  %v829_v1 = vld [vmem:[#allocation5 + $0x11e8] sm:$0x3] }
 0x2bf   :  { %18283 = vmatprep.subr.bf16.mxu0 %v18282_v3  ;;  %v427_v3 = vld [vmem:[#allocation5 + $0x558] sm:$0xff]  ;;  %v1904_v9 = vcombine.high %v1896_v63, %v1896_v63 }
 0x2c3   :  { %8977 = vmatmul.mubr.f32.vlgmr.msra.gmra.mrb[0].mxu1 %v1862_v49  ;;  %v425_v49 = vld [vmem:[#allocation5 + $0x548] sm:$0xff] }
 0x2c4   :  { %17881 = vmatpush1.bf16.xpose.msra.mxu1 %v17880_v14  ;;  %9046 = vmatprep.mubr.f32.mxu1 %v1871_v15  ;;  %v17890_v58 = vpack.c.bf16 %v830_v50, %v425_v49  ;;  %v18296_v15 = vpack.c.bf16 %v1031_v6, %v626_v5  ;;  %v633_v50 = vld [vmem:[#allocation5 + $0xbc8] sm:$0xff]  ;;  %v635_v5 = vld [vmem:[#allocation5 + $0xbd8] sm:$0xff]  ;;  %v1040_v6 = vld [vmem:[#allocation5 + $0x1880] sm:$0x3] }
 0x2c5   :  { %16047 = vmatmul.mubr.f32.vlgmr.msra.gmra.mrb[0].mxu0 %v2719_v52  ;;  %17883 = vmatprep.subr.bf16.mxu1 %v17882_v19  ;;  %v1029_v52 = vld [vmem:[#allocation5 + $0x1828] sm:$0x3]  ;;  %v1903_v19 = vrot.slane %v1889_v13, %v18940_v12  ;;  %v18310_v13 = vpack.c.bf16 %v1040_v6, %v635_v5  ;;  %v250_v6 = vmax.f32 %v148_v61, 0.0 }
 0x2c6   :  { %18285 = vmatpush1.bf16.xpose.msra.mxu0 %v18284_v20  ;;  %16116 = vmatprep.mubr.f32.mxu0 %v2737_v21  ;;  %v18292_v59 = vpack.c.bf16 %v1029_v52, %v624_v51  ;;  %v426_v20 = vld [vmem:[#allocation5 + $0x550] sm:$0xff]  ;;  %v831_v21 = vld [vmem:[#allocation5 + $0x11f8] sm:$0x3]  ;;  %v1906_v52 = vcombine.high %v197_v33, %v197_v33 }
 0x2c7   :  { %18287 = vmatprep.subr.bf16.mxu0 %v18286_v24  ;;  %v2763_v24 = vrot.slane %v247_v17, %v18940_v12  ;;  %v17896_v29 = vpack.c.bf16 %v831_v21, %v426_v20  ;;  %v1905_v30 = vcombine.high %v1903_v19, %v1903_v19  ;;  %v1038_v51 = vld [vmem:[#allocation5 + $0x1870] sm:$0x3]  ;;  %v2787_v17 = vrot.slane %v2773_v11, %v18940_v12  ;;  %v1039_v21 = vld [vmem:[#allocation5 + $0x1878] sm:$0x3]  ;;  %v98_v11 = vld [vmem:[#allocation2 + $0x170] sm:$0xff] }
 0x2c8   :  { %v18306_v57 = vpack.c.bf16 %v1038_v51, %v633_v50  ;;  %v634_v20 = vld [vmem:[#allocation5 + $0xbd0] sm:$0xff]  ;;  %v2790_v51 = vcombine.high %v249_v32, %v249_v32  ;;  %v200_v22 = vmax.f32 %v98_v11, 0.0  ;;  %v150_v11 = vld [vmem:[#allocation2 + $0x310] sm:$0xff] }
 0x2c9   :  { %v2771_v36 = vcombine.high %v2763_v24, %v2763_v24  ;;  %v2789_v31 = vcombine.high %v2787_v17, %v2787_v17 }
 0x2cb   :  { %9047 = vmatmul.mubr.f32.vlgmr.msra.gmra.mrb[0].mxu1 %v1869_v4  ;;  %v832_v4 = vld [vmem:[#allocation5 + $0x1200] sm:$0x3] }
 0x2cc   :  { %17885 = vmatpush1.bf16.xpose.msra.mxu1 %v17884_v34  ;;  %9116 = vmatprep.mubr.f32.mxu1 %v1887_v35  ;;  %v17894_v14 = vpack.c.bf16 %v832_v4, %v427_v3 }
 0x2cd   :  { %16117 = vmatmul.mubr.f32.vlgmr.msra.gmra.mrb[0].mxu0 %v2729_v8  ;;  %17887 = vmatprep.subr.bf16.mxu1 %v17886_v39  ;;  %v17892_v8 = vpack.c.bf16 %v829_v1, %v424_v0  ;;  %v1913_v39 = vrot.slane %v197_v33, %v18940_v12  ;;  %v838_v0 = vld [vmem:[#allocation5 + $0x1230] sm:$0x3]  ;;  %v632_v1 = vld [vmem:[#allocation5 + $0xbc0] sm:$0xff] }
 0x2ce   :  { %18289 = vmatpush1.bf16.xpose.msra.mxu0 %v18288_v40  ;;  %16186 = vmatprep.mubr.f32.mxu0 %v2738_v41  ;;  %v428_v40 = vld [vmem:[#allocation5 + $0x560] sm:$0xff]  ;;  %v833_v41 = vld [vmem:[#allocation5 + $0x1208] sm:$0x3] }
 0x2cf   :  { %18291 = vmatprep.subr.bf16.mxu0 %v18290_v43  ;;  %v431_v43 = vld [vmem:[#allocation5 + $0x578] sm:$0xff]  ;;  %v1921_v49 = vcombine.high %v1913_v39, %v1913_v39 }
 0x2d3   :  { %9117 = vmatmul.mubr.f32.vlgmr.msra.gmra.mrb[0].mxu1 %v1879_v25  ;;  %v429_v25 = vld [vmem:[#allocation5 + $0x568] sm:$0xff] }
 0x2d4   :  { %17889 = vmatpush1.bf16.xpose.msra.mxu1 %v17888_v53  ;;  %9186 = vmatprep.mubr.f32.mxu1 %v1888_v54  ;;  %v17898_v34 = vpack.c.bf16 %v834_v26, %v429_v25  ;;  %v18304_v54 = vpack.c.bf16 %v1035_v46, %v630_v45  ;;  %v637_v26 = vld [vmem:[#allocation5 + $0xbe8] sm:$0xff]  ;;  %v639_v45 = vld [vmem:[#allocation5 + $0xbf8] sm:$0xff]  ;;  %v1044_v46 = vld [vmem:[#allocation5 + $0x18a0] sm:$0x3] }
 0x2d5   :  { %16187 = vmatmul.mubr.f32.vlgmr.msra.gmra.mrb[0].mxu0 %v2736_v28  ;;  %17891 = vmatprep.subr.bf16.mxu1 %v17890_v58  ;;  %v1033_v28 = vld [vmem:[#allocation5 + $0x1848] sm:$0x3]  ;;  %v1920_v58 = vrot.slane %v1906_v52, %v18940_v12  ;;  %v18318_v52 = vpack.c.bf16 %v1044_v46, %v639_v45  ;;  %v251_v46 = vmax.f32 %v149_v37, 0.0 }
 0x2d6   :  { %18293 = vmatpush1.bf16.xpose.msra.mxu0 %v18292_v59  ;;  %16256 = vmatprep.mubr.f32.mxu0 %v2754_v60  ;;  %v18300_v35 = vpack.c.bf16 %v1033_v28, %v628_v27  ;;  %v430_v59 = vld [vmem:[#allocation5 + $0x570] sm:$0xff]  ;;  %v835_v60 = vld [vmem:[#allocation5 + $0x1218] sm:$0x3]  ;;  %v1923_v28 = vcombine.high %v198_v7, %v198_v7 }
 0x2d7   :  { %18295 = vmatprep.subr.bf16.mxu0 %v18294_v62  ;;  %v2780_v62 = vrot.slane %v248_v56, %v18940_v12  ;;  %v17904_v3 = vpack.c.bf16 %v835_v60, %v430_v59  ;;  %v1922_v4 = vcombine.high %v1920_v58, %v1920_v58  ;;  %v1042_v27 = vld [vmem:[#allocation5 + $0x1890] sm:$0x3]  ;;  %v2804_v56 = vrot.slane %v2790_v51, %v18940_v12  ;;  %v1043_v60 = vld [vmem:[#allocation5 + $0x1898] sm:$0x3] }
 0x2d8   :  { %v18314_v33 = vpack.c.bf16 %v1042_v27, %v637_v26  ;;  %v638_v59 = vld [vmem:[#allocation5 + $0xbf0] sm:$0xff]  ;;  %v2807_v27 = vcombine.high %v250_v6, %v250_v6 }
 0x2d9   :  { %v2788_v10 = vcombine.high %v2780_v62, %v2780_v62  ;;  %v2806_v5 = vcombine.high %v2804_v56, %v2804_v56  ;;  %v99_v51 = vld [vmem:[#allocation2 + $0x178] sm:$0xff] }
 0x2da   :  { %v201_v61 = vmax.f32 %v99_v51, 0.0  ;;  %v151_v51 = vld [vmem:[#allocation2 + $0x318] sm:$0xff] }
 0x2db   :  { %9187 = vmatmul.mubr.f32.vlgmr.msra.gmra.mrb[0].mxu1 %v1886_v44  ;;  %v836_v44 = vld [vmem:[#allocation5 + $0x1220] sm:$0x3] }
 0x2dc   :  { %17893 = vmatpush1.bf16.xpose.msra.mxu1 %v17892_v8  ;;  %9256 = vmatprep.mubr.f32.mxu1 %v1904_v9  ;;  %v17902_v53 = vpack.c.bf16 %v836_v44, %v431_v43 }
 0x2dd   :  { %16257 = vmatmul.mubr.f32.vlgmr.msra.gmra.mrb[0].mxu0 %v2746_v48  ;;  %17895 = vmatprep.subr.bf16.mxu1 %v17894_v14  ;;  %v17900_v48 = vpack.c.bf16 %v833_v41, %v428_v40  ;;  %v1930_v14 = vrot.slane %v198_v7, %v18940_v12  ;;  %v842_v40 = vld [vmem:[#allocation5 + $0x1250] sm:$0x3]  ;;  %v636_v41 = vld [vmem:[#allocation5 + $0xbe0] sm:$0xff] }
 0x2de   :  { %18297 = vmatpush1.bf16.xpose.msra.mxu0 %v18296_v15  ;;  %16326 = vmatprep.mubr.f32.mxu0 %v2755_v16  ;;  %v432_v15 = vld [vmem:[#allocation5 + $0x580] sm:$0xff]  ;;  %v837_v16 = vld [vmem:[#allocation5 + $0x1228] sm:$0x3] }
 0x2df   :  { %18299 = vmatprep.subr.bf16.mxu0 %v18298_v18  ;;  %v435_v18 = vld [vmem:[#allocation5 + $0x598] sm:$0xff]  ;;  %v1938_v25 = vcombine.high %v1930_v14, %v1930_v14 }
 0x2e3   :  { %9257 = vmatmul.mubr.f32.vlgmr.msra.gmra.mrb[0].mxu1 %v1896_v63  ;;  %v433_v63 = vld [vmem:[#allocation5 + $0x588] sm:$0xff] }
 0x2e4   :  { %17897 = vmatpush1.bf16.xpose.msra.mxu1 %v17896_v29  ;;  %9326 = vmatprep.mubr.f32.mxu1 %v1905_v30  ;;  %v17906_v8 = vpack.c.bf16 %v838_v0, %v433_v63  ;;  %v18312_v30 = vpack.c.bf16 %v1039_v21, %v634_v20  ;;  %v641_v0 = vld [vmem:[#allocation5 + $0xc08] sm:$0xff]  ;;  %v643_v20 = vld [vmem:[#allocation5 + $0xc18] sm:$0xff]  ;;  %v1048_v21 = vld [vmem:[#allocation5 + $0x18c0] sm:$0x3] }
 0x2e5   :  { %16327 = vmatmul.mubr.f32.vlgmr.msra.gmra.mrb[0].mxu0 %v2753_v2  ;;  %17899 = vmatprep.subr.bf16.mxu1 %v17898_v34  ;;  %v1037_v2 = vld [vmem:[#allocation5 + $0x1868] sm:$0x3]  ;;  %v1937_v34 = vrot.slane %v1923_v28, %v18940_v12  ;;  %v18326_v28 = vpack.c.bf16 %v1048_v21, %v643_v20  ;;  %v252_v21 = vmax.f32 %v150_v11, 0.0 }
 0x2e6   :  { %18301 = vmatpush1.bf16.xpose.msra.mxu0 %v18300_v35  ;;  %16396 = vmatprep.mubr.f32.mxu0 %v2771_v36  ;;  %v18308_v9 = vpack.c.bf16 %v1037_v2, %v632_v1  ;;  %v434_v35 = vld [vmem:[#allocation5 + $0x590] sm:$0xff]  ;;  %v839_v36 = vld [vmem:[#allocation5 + $0x1238] sm:$0x3]  ;;  %v1940_v2 = vcombine.high %v199_v47, %v199_v47 }
 0x2e7   :  { %18303 = vmatprep.subr.bf16.mxu0 %v18302_v38  ;;  %v2797_v38 = vrot.slane %v249_v32, %v18940_v12  ;;  %v17912_v43 = vpack.c.bf16 %v839_v36, %v434_v35  ;;  %v1939_v44 = vcombine.high %v1937_v34, %v1937_v34  ;;  %v1046_v1 = vld [vmem:[#allocation5 + $0x18b0] sm:$0x3]  ;;  %v2821_v32 = vrot.slane %v2807_v27, %v18940_v12  ;;  %v1047_v36 = vld [vmem:[#allocation5 + $0x18b8] sm:$0x3] }
 0x2e8   :  { %v18322_v7 = vpack.c.bf16 %v1046_v1, %v641_v0  ;;  %v642_v35 = vld [vmem:[#allocation5 + $0xc10] sm:$0xff]  ;;  %v2824_v1 = vcombine.high %v251_v46, %v251_v46 }
 0x2e9   :  { %v2805_v50 = vcombine.high %v2797_v38, %v2797_v38  ;;  %v2823_v45 = vcombine.high %v2821_v32, %v2821_v32  ;;  %v100_v27 = vld [vmem:[#allocation2 + $0x180] sm:$0xff] }
 0x2ea   :  { %v202_v37 = vmax.f32 %v100_v27, 0.0  ;;  %v152_v27 = vld [vmem:[#allocation2 + $0x320] sm:$0xff] }
 0x2eb   :  { %9327 = vmatmul.mubr.f32.vlgmr.msra.gmra.mrb[0].mxu1 %v1903_v19  ;;  %v840_v19 = vld [vmem:[#allocation5 + $0x1240] sm:$0x3] }
 0x2ec   :  { %17901 = vmatpush1.bf16.xpose.msra.mxu1 %v17900_v48  ;;  %9396 = vmatprep.mubr.f32.mxu1 %v1921_v49  ;;  %v17910_v29 = vpack.c.bf16 %v840_v19, %v435_v18 }
 0x2ed   :  { %16397 = vmatmul.mubr.f32.vlgmr.msra.gmra.mrb[0].mxu0 %v2763_v24  ;;  %17903 = vmatprep.subr.bf16.mxu1 %v17902_v53  ;;  %v17908_v24 = vpack.c.bf16 %v837_v16, %v432_v15  ;;  %v1947_v53 = vrot.slane %v199_v47, %v18940_v12  ;;  %v846_v15 = vld [vmem:[#allocation5 + $0x1270] sm:$0x3]  ;;  %v640_v16 = vld [vmem:[#allocation5 + $0xc00] sm:$0xff] }
 0x2ee   :  { %18305 = vmatpush1.bf16.xpose.msra.mxu0 %v18304_v54  ;;  %16466 = vmatprep.mubr.f32.mxu0 %v2772_v55  ;;  %v436_v54 = vld [vmem:[#allocation5 + $0x5a0] sm:$0xff]  ;;  %v841_v55 = vld [vmem:[#allocation5 + $0x1248] sm:$0x3] }
 0x2ef   :  { %18307 = vmatprep.subr.bf16.mxu0 %v18306_v57  ;;  %v439_v57 = vld [vmem:[#allocation5 + $0x5b8] sm:$0xff]  ;;  %v1955_v63 = vcombine.high %v1947_v53, %v1947_v53 }
 0x2f3   :  { %9397 = vmatmul.mubr.f32.vlgmr.msra.gmra.mrb[0].mxu1 %v1913_v39  ;;  %v437_v39 = vld [vmem:[#allocation5 + $0x5a8] sm:$0xff] }
 0x2f4   :  { %17905 = vmatpush1.bf16.xpose.msra.mxu1 %v17904_v3  ;;  %9466 = vmatprep.mubr.f32.mxu1 %v1922_v4  ;;  %v17914_v48 = vpack.c.bf16 %v842_v40, %v437_v39  ;;  %v18320_v4 = vpack.c.bf16 %v1043_v60, %v638_v59  ;;  %v645_v40 = vld [vmem:[#allocation5 + $0xc28] sm:$0xff]  ;;  %v647_v59 = vld [vmem:[#allocation5 + $0xc38] sm:$0xff]  ;;  %v1052_v60 = vld [vmem:[#allocation5 + $0x18e0] sm:$0x3] }
 0x2f5   :  { %16467 = vmatmul.mubr.f32.vlgmr.msra.gmra.mrb[0].mxu0 %v2770_v42  ;;  %17907 = vmatprep.subr.bf16.mxu1 %v17906_v8  ;;  %v1041_v42 = vld [vmem:[#allocation5 + $0x1888] sm:$0x3]  ;;  %v1954_v8 = vrot.slane %v1940_v2, %v18940_v12  ;;  %v18334_v2 = vpack.c.bf16 %v1052_v60, %v647_v59  ;;  %v253_v60 = vmax.f32 %v151_v51, 0.0 }
 0x2f6   :  { %18309 = vmatpush1.bf16.xpose.msra.mxu0 %v18308_v9  ;;  %16536 = vmatprep.mubr.f32.mxu0 %v2788_v10  ;;  %v18316_v49 = vpack.c.bf16 %v1041_v42, %v636_v41  ;;  %v438_v9 = vld [vmem:[#allocation5 + $0x5b0] sm:$0xff]  ;;  %v843_v10 = vld [vmem:[#allocation5 + $0x1258] sm:$0x3]  ;;  %v1957_v42 = vcombine.high %v200_v22, %v200_v22 }
 0x2f7   :  { %18311 = vmatprep.subr.bf16.mxu0 %v18310_v13  ;;  %v2814_v13 = vrot.slane %v250_v6, %v18940_v12  ;;  %v17920_v18 = vpack.c.bf16 %v843_v10, %v438_v9  ;;  %v1956_v19 = vcombine.high %v1954_v8, %v1954_v8  ;;  %v1050_v41 = vld [vmem:[#allocation5 + $0x18d0] sm:$0x3]  ;;  %v2838_v6 = vrot.slane %v2824_v1, %v18940_v12  ;;  %v1051_v10 = vld [vmem:[#allocation5 + $0x18d8] sm:$0x3]  ;;  %v101_v1 = vld [vmem:[#allocation2 + $0x188] sm:$0xff] }
 0x2f8   :  { %v18330_v47 = vpack.c.bf16 %v1050_v41, %v645_v40  ;;  %v646_v9 = vld [vmem:[#allocation5 + $0xc30] sm:$0xff]  ;;  %v2841_v41 = vcombine.high %v252_v21, %v252_v21  ;;  %v203_v11 = vmax.f32 %v101_v1, 0.0  ;;  %v660_v1 = vld [vmem:[#allocation5 + $0xca0] sm:$0xff] }
 0x2f9   :  { %v2822_v26 = vcombine.high %v2814_v13, %v2814_v13  ;;  %v2840_v20 = vcombine.high %v2838_v6, %v2838_v6 }
 0x2fb   :  { %9467 = vmatmul.mubr.f32.vlgmr.msra.gmra.mrb[0].mxu1 %v1920_v58  ;;  %v844_v58 = vld [vmem:[#allocation5 + $0x1260] sm:$0x3] }
 0x2fc   :  { %17909 = vmatpush1.bf16.xpose.msra.mxu1 %v17908_v24  ;;  %9536 = vmatprep.mubr.f32.mxu1 %v1938_v25  ;;  %v17918_v3 = vpack.c.bf16 %v844_v58, %v439_v57 }
 0x2fd   :  { %16537 = vmatmul.mubr.f32.vlgmr.msra.gmra.mrb[0].mxu0 %v2780_v62  ;;  %17911 = vmatprep.subr.bf16.mxu1 %v17910_v29  ;;  %v17916_v62 = vpack.c.bf16 %v841_v55, %v436_v54  ;;  %v1964_v29 = vrot.slane %v200_v22, %v18940_v12  ;;  %v850_v54 = vld [vmem:[#allocation5 + $0x1290] sm:$0x3]  ;;  %v644_v55 = vld [vmem:[#allocation5 + $0xc20] sm:$0xff] }
 0x2fe   :  { %18313 = vmatpush1.bf16.xpose.msra.mxu0 %v18312_v30  ;;  %16606 = vmatprep.mubr.f32.mxu0 %v2789_v31  ;;  %v440_v30 = vld [vmem:[#allocation5 + $0x5c0] sm:$0xff]  ;;  %v845_v31 = vld [vmem:[#allocation5 + $0x1268] sm:$0x3] }
 0x2ff   :  { %18315 = vmatprep.subr.bf16.mxu0 %v18314_v33  ;;  %v443_v33 = vld [vmem:[#allocation5 + $0x5d8] sm:$0xff]  ;;  %v1972_v39 = vcombine.high %v1964_v29, %v1964_v29 }
 0x303   :  { %9537 = vmatmul.mubr.f32.vlgmr.msra.gmra.mrb[0].mxu1 %v1930_v14  ;;  %v441_v14 = vld [vmem:[#allocation5 + $0x5c8] sm:$0xff] }
 0x304   :  { %17913 = vmatpush1.bf16.xpose.msra.mxu1 %v17912_v43  ;;  %9606 = vmatprep.mubr.f32.mxu1 %v1939_v44  ;;  %v17922_v24 = vpack.c.bf16 %v846_v15, %v441_v14  ;;  %v18328_v44 = vpack.c.bf16 %v1047_v36, %v642_v35  ;;  %v649_v15 = vld [vmem:[#allocation5 + $0xc48] sm:$0xff]  ;;  %v651_v35 = vld [vmem:[#allocation5 + $0xc58] sm:$0xff]  ;;  %v1056_v36 = vld [vmem:[#allocation5 + $0x1900] sm:$0x3] }
 0x305   :  { %16607 = vmatmul.mubr.f32.vlgmr.msra.gmra.mrb[0].mxu0 %v2787_v17  ;;  %17915 = vmatprep.subr.bf16.mxu1 %v17914_v48  ;;  %v1045_v17 = vld [vmem:[#allocation5 + $0x18a8] sm:$0x3]  ;;  %v1971_v48 = vrot.slane %v1957_v42, %v18940_v12  ;;  %v18342_v42 = vpack.c.bf16 %v1056_v36, %v651_v35  ;;  %v254_v36 = vmax.f32 %v152_v27, 0.0 }
 0x306   :  { %18317 = vmatpush1.bf16.xpose.msra.mxu0 %v18316_v49  ;;  %16676 = vmatprep.mubr.f32.mxu0 %v2805_v50  ;;  %v18324_v25 = vpack.c.bf16 %v1045_v17, %v640_v16  ;;  %v442_v49 = vld [vmem:[#allocation5 + $0x5d0] sm:$0xff]  ;;  %v847_v50 = vld [vmem:[#allocation5 + $0x1278] sm:$0x3]  ;;  %v1974_v17 = vcombine.high %v201_v61, %v201_v61 }
 0x307   :  { %18319 = vmatprep.subr.bf16.mxu0 %v18318_v52  ;;  %v2831_v52 = vrot.slane %v251_v46, %v18940_v12  ;;  %v17928_v57 = vpack.c.bf16 %v847_v50, %v442_v49  ;;  %v1973_v58 = vcombine.high %v1971_v48, %v1971_v48  ;;  %v1054_v16 = vld [vmem:[#allocation5 + $0x18f0] sm:$0x3]  ;;  %v2855_v46 = vrot.slane %v2841_v41, %v18940_v12  ;;  %v1055_v50 = vld [vmem:[#allocation5 + $0x18f8] sm:$0x3] }
 0x308   :  { %v18338_v22 = vpack.c.bf16 %v1054_v16, %v649_v15  ;;  %v650_v49 = vld [vmem:[#allocation5 + $0xc50] sm:$0xff]  ;;  %v2858_v16 = vcombine.high %v253_v60, %v253_v60  ;;  %v2882_v41 = vrot.slane %v254_v36, %v18940_v12 }
 0x309   :  { %v2839_v0 = vcombine.high %v2831_v52, %v2831_v52  ;;  %v2857_v59 = vcombine.high %v2855_v46, %v2855_v46 }
 0x30b   :  { %9607 = vmatmul.mubr.f32.vlgmr.msra.gmra.mrb[0].mxu1 %v1937_v34  ;;  %v848_v34 = vld [vmem:[#allocation5 + $0x1280] sm:$0x3] }
 0x30c   :  { %17917 = vmatpush1.bf16.xpose.msra.mxu1 %v17916_v62  ;;  %9676 = vmatprep.mubr.f32.mxu1 %v1955_v63  ;;  %v17926_v43 = vpack.c.bf16 %v848_v34, %v443_v33 }
 0x30d   :  { %16677 = vmatmul.mubr.f32.vlgmr.msra.gmra.mrb[0].mxu0 %v2797_v38  ;;  %17919 = vmatprep.subr.bf16.mxu1 %v17918_v3  ;;  %v17924_v38 = vpack.c.bf16 %v845_v31, %v440_v30  ;;  %v1981_v3 = vrot.slane %v201_v61, %v18940_v12  ;;  %v854_v30 = vld [vmem:[#allocation5 + $0x12b0] sm:$0x3]  ;;  %v648_v31 = vld [vmem:[#allocation5 + $0xc40] sm:$0xff] }
 0x30e   :  { %18321 = vmatpush1.bf16.xpose.msra.mxu0 %v18320_v4  ;;  %16746 = vmatprep.mubr.f32.mxu0 %v2806_v5  ;;  %v444_v4 = vld [vmem:[#allocation5 + $0x5e0] sm:$0xff]  ;;  %v849_v5 = vld [vmem:[#allocation5 + $0x1288] sm:$0x3] }
 0x30f   :  { %18323 = vmatprep.subr.bf16.mxu0 %v18322_v7  ;;  %v447_v7 = vld [vmem:[#allocation5 + $0x5f8] sm:$0xff]  ;;  %v1989_v14 = vcombine.high %v1981_v3, %v1981_v3 }
 0x313   :  { %9677 = vmatmul.mubr.f32.vlgmr.msra.gmra.mrb[0].mxu1 %v1947_v53  ;;  %v445_v53 = vld [vmem:[#allocation5 + $0x5e8] sm:$0xff] }
 0x314   :  { %17921 = vmatpush1.bf16.xpose.msra.mxu1 %v17920_v18  ;;  %9746 = vmatprep.mubr.f32.mxu1 %v1956_v19  ;;  %v17930_v62 = vpack.c.bf16 %v850_v54, %v445_v53  ;;  %v18336_v19 = vpack.c.bf16 %v1051_v10, %v646_v9  ;;  %v653_v54 = vld [vmem:[#allocation5 + $0xc68] sm:$0xff]  ;;  %v655_v9 = vld [vmem:[#allocation5 + $0xc78] sm:$0xff]  ;;  %v1060_v10 = vld [vmem:[#allocation5 + $0x1920] sm:$0x3] }
 0x315   :  { %16747 = vmatmul.mubr.f32.vlgmr.msra.gmra.mrb[0].mxu0 %v2804_v56  ;;  %17923 = vmatprep.subr.bf16.mxu1 %v17922_v24  ;;  %v1049_v56 = vld [vmem:[#allocation5 + $0x18c8] sm:$0x3]  ;;  %v1988_v24 = vrot.slane %v1974_v17, %v18940_v12  ;;  %v18350_v17 = vpack.c.bf16 %v1060_v10, %v655_v9  ;;  %v17540_v10 = vld [vmem:[#allocation7] ss:$0 sm:$0xff] }
 0x316   :  { %18325 = vmatpush1.bf16.xpose.msra.mxu0 %v18324_v25  ;;  %16816 = vmatprep.mubr.f32.mxu0 %v2822_v26  ;;  %v18332_v63 = vpack.c.bf16 %v1049_v56, %v644_v55  ;;  %v446_v25 = vld [vmem:[#allocation5 + $0x5f0] sm:$0xff]  ;;  %v851_v26 = vld [vmem:[#allocation5 + $0x1298] sm:$0x3]  ;;  %v1991_v56 = vcombine.high %v202_v37, %v202_v37 }
 0x317   :  { %18327 = vmatprep.subr.bf16.mxu0 %v18326_v28  ;;  %v2848_v28 = vrot.slane %v252_v21, %v18940_v12  ;;  %v17936_v33 = vpack.c.bf16 %v851_v26, %v446_v25  ;;  %v1990_v34 = vcombine.high %v1988_v24, %v1988_v24  ;;  %v1058_v55 = vld [vmem:[#allocation5 + $0x1910] sm:$0x3]  ;;  %v2872_v21 = vrot.slane %v2858_v16, %v18940_v12  ;;  %v1059_v26 = vld [vmem:[#allocation5 + $0x1918] sm:$0x3] }
 0x318   :  { %v18346_v61 = vpack.c.bf16 %v1058_v55, %v653_v54  ;;  %v654_v25 = vld [vmem:[#allocation5 + $0xc70] sm:$0xff]  ;;  %v2032_v55 = vrot.slane %v18942_v23, %v18940_v12  ;;  %v18880_v23 = vmov 0.0|0.0  }
 0x319   :  { %v2856_v40 = vcombine.high %v2848_v28, %v2848_v28  ;;  %v2874_v35 = vcombine.high %v2872_v21, %v2872_v21 }
 0x31b   :  { %9747 = vmatmul.mubr.f32.vlgmr.msra.gmra.mrb[0].mxu1 %v1954_v8  ;;  %v852_v8 = vld [vmem:[#allocation5 + $0x12a0] sm:$0x3] }
 0x31c   :  { %17925 = vmatpush1.bf16.xpose.msra.mxu1 %v17924_v38  ;;  %9816 = vmatprep.mubr.f32.mxu1 %v1972_v39  ;;  %v17934_v18 = vpack.c.bf16 %v852_v8, %v447_v7 }
 0x31d   :  { %16817 = vmatmul.mubr.f32.vlgmr.msra.gmra.mrb[0].mxu0 %v2814_v13  ;;  %17927 = vmatprep.subr.bf16.mxu1 %v17926_v43  ;;  %v17932_v13 = vpack.c.bf16 %v849_v5, %v444_v4  ;;  %v1998_v43 = vrot.slane %v202_v37, %v18940_v12  ;;  %v858_v4 = vld [vmem:[#allocation5 + $0x12d0] sm:$0x3]  ;;  %v652_v5 = vld [vmem:[#allocation5 + $0xc60] sm:$0xff] }
 0x31e   :  { %18329 = vmatpush1.bf16.xpose.msra.mxu0 %v18328_v44  ;;  %16886 = vmatprep.mubr.f32.mxu0 %v2823_v45  ;;  %v448_v44 = vld [vmem:[#allocation5 + $0x600] sm:$0xff]  ;;  %v853_v45 = vld [vmem:[#allocation5 + $0x12a8] sm:$0x3] }
 0x31f   :  { %18331 = vmatprep.subr.bf16.mxu0 %v18330_v47  ;;  %v451_v47 = vld [vmem:[#allocation5 + $0x618] sm:$0xff]  ;;  %v2006_v53 = vcombine.high %v1998_v43, %v1998_v43 }
 0x323   :  { %9817 = vmatmul.mubr.f32.vlgmr.msra.gmra.mrb[0].mxu1 %v1964_v29  ;;  %v449_v29 = vld [vmem:[#allocation5 + $0x608] sm:$0xff] }
 0x324   :  { %17929 = vmatpush1.bf16.xpose.msra.mxu1 %v17928_v57  ;;  %9886 = vmatprep.mubr.f32.mxu1 %v1973_v58  ;;  %v17938_v38 = vpack.c.bf16 %v854_v30, %v449_v29  ;;  %v18344_v58 = vpack.c.bf16 %v1055_v50, %v650_v49  ;;  %v657_v30 = vld [vmem:[#allocation5 + $0xc88] sm:$0xff]  ;;  %v1064_v49 = vld [vmem:[#allocation5 + $0x1940] sm:$0x3] }
 0x325   :  { %16887 = vmatmul.mubr.f32.vlgmr.msra.gmra.mrb[0].mxu0 %v2821_v32  ;;  %17931 = vmatprep.subr.bf16.mxu1 %v17930_v62  ;;  %v1053_v32 = vld [vmem:[#allocation5 + $0x18e8] sm:$0x3]  ;;  %v2005_v62 = vrot.slane %v1991_v56, %v18940_v12  ;;  %v456_v56 = vld [vmem:[#allocation5 + $0x640] sm:$0xff] }
 0x326   :  { %18333 = vmatpush1.bf16.xpose.msra.mxu0 %v18332_v63  ;;  %16956 = vmatprep.mubr.f32.mxu0 %v2839_v0  ;;  %v18340_v39 = vpack.c.bf16 %v1053_v32, %v648_v31  ;;  %v450_v63 = vld [vmem:[#allocation5 + $0x610] sm:$0xff]  ;;  %v855_v0 = vld [vmem:[#allocation5 + $0x12b8] sm:$0x3]  ;;  %v2008_v32 = vcombine.high %v203_v11, %v203_v11 }
 0x327   :  { %18335 = vmatprep.subr.bf16.mxu0 %v18334_v2  ;;  %v2865_v2 = vrot.slane %v253_v60, %v18940_v12  ;;  %v17944_v7 = vpack.c.bf16 %v855_v0, %v450_v63  ;;  %v2007_v8 = vcombine.high %v2005_v62, %v2005_v62  ;;  %v1062_v31 = vld [vmem:[#allocation5 + $0x1930] sm:$0x3]  ;;  %v1063_v60 = vld [vmem:[#allocation5 + $0x1938] sm:$0x3] }
 0x328   :  { %v18354_v37 = vpack.c.bf16 %v1062_v31, %v657_v30 }
 0x329   :  { %v2873_v15 = vcombine.high %v2865_v2, %v2865_v2 }
 0x32b   :  { %9887 = vmatmul.mubr.f32.vlgmr.msra.gmra.mrb[0].mxu1 %v1971_v48  ;;  %v856_v48 = vld [vmem:[#allocation5 + $0x12c0] sm:$0x3] }
 0x32c   :  { %17933 = vmatpush1.bf16.xpose.msra.mxu1 %v17932_v13  ;;  %9956 = vmatprep.mubr.f32.mxu1 %v1989_v14  ;;  %v17942_v57 = vpack.c.bf16 %v856_v48, %v451_v47  ;;  %v659_v48 = vld [vmem:[#allocation5 + $0xc98] sm:$0xff] }
 0x32d   :  { %16957 = vmatmul.mubr.f32.vlgmr.msra.gmra.mrb[0].mxu0 %v2831_v52  ;;  %17935 = vmatprep.subr.bf16.mxu1 %v17934_v18  ;;  %v17940_v52 = vpack.c.bf16 %v853_v45, %v448_v44  ;;  %v2015_v18 = vrot.slane %v203_v11, %v18940_v12  ;;  %v656_v44 = vld [vmem:[#allocation5 + $0xc80] sm:$0xff]  ;;  %v1061_v45 = vld [vmem:[#allocation5 + $0x1928] sm:$0x3]  ;;  %v18358_v54 = vpack.c.bf16 %v1064_v49, %v659_v48 }
 0x32e   :  { %18337 = vmatpush1.bf16.xpose.msra.mxu0 %v18336_v19  ;;  %17026 = vmatprep.mubr.f32.mxu0 %v2840_v20  ;;  %v452_v19 = vld [vmem:[#allocation5 + $0x620] sm:$0xff]  ;;  %v857_v20 = vld [vmem:[#allocation5 + $0x12c8] sm:$0x3]  ;;  %v18356_v51 = vpack.c.bf16 %v1061_v45, %v656_v44 }
 0x32f   :  { %18339 = vmatprep.subr.bf16.mxu0 %v18338_v22  ;;  %v455_v22 = vld [vmem:[#allocation5 + $0x638] sm:$0xff]  ;;  %v2023_v29 = vcombine.high %v2015_v18, %v2015_v18 }
 0x333   :  { %9957 = vmatmul.mubr.f32.vlgmr.msra.gmra.mrb[0].mxu1 %v1981_v3  ;;  %v453_v3 = vld [vmem:[#allocation5 + $0x628] sm:$0xff] }
 0x334   :  { %17937 = vmatpush1.bf16.xpose.msra.mxu1 %v17936_v33  ;;  %10026 = vmatprep.mubr.f32.mxu1 %v1990_v34  ;;  %v17946_v13 = vpack.c.bf16 %v858_v4, %v453_v3  ;;  %v18352_v34 = vpack.c.bf16 %v1059_v26, %v654_v25  ;;  %v153_v4 = vld [vmem:[#allocation2 + $0x328] sm:$0x3] }
 0x335   :  { %17027 = vmatmul.mubr.f32.vlgmr.msra.gmra.mrb[0].mxu0 %v2838_v6  ;;  %17939 = vmatprep.subr.bf16.mxu1 %v17938_v38  ;;  %v1057_v6 = vld [vmem:[#allocation5 + $0x1908] sm:$0x3]  ;;  %v2022_v38 = vrot.slane %v2008_v32, %v18940_v12 }
 0x336   :  { %18341 = vmatpush1.bf16.xpose.msra.mxu0 %v18340_v39  ;;  %17096 = vmatprep.mubr.f32.mxu0 %v2856_v40  ;;  %v18348_v14 = vpack.c.bf16 %v1057_v6, %v652_v5  ;;  %v454_v39 = vld [vmem:[#allocation5 + $0x630] sm:$0xff]  ;;  %v859_v40 = vld [vmem:[#allocation5 + $0x12d8] sm:$0x3]  ;;  %v255_v5 = vmax.f32 %v153_v4, 0.0  ;;  %v18882_v6 = vmov 0.0  }
 0x337   :  { %18343 = vmatprep.subr.bf16.mxu0 %v18342_v42  ;;  %v457_v42 = vld [vmem:[#allocation5 + $0x648] sm:$0xff]  ;;  %v2024_v47 = vcombine.high %v2022_v38, %v2022_v38 }
 0x33b   :  { %10027 = vmatmul.mubr.f32.vlgmr.msra.gmra.mrb[0].mxu1 %v1988_v24  ;;  %v860_v24 = vld [vmem:[#allocation5 + $0x12e0] sm:$0x3] }
 0x33c   :  { %17941 = vmatpush1.bf16.xpose.msra.mxu1 %v17940_v52  ;;  %10096 = vmatprep.mubr.f32.mxu1 %v2006_v53  ;;  %v17950_v33 = vpack.c.bf16 %v860_v24, %v455_v22  ;;  %v2890_v52 = vcombine.high %v2882_v41, %v2882_v41  ;;  %v2875_v53 = vcombine.high %v254_v36, %v254_v36 }
 0x33d   :  { %17097 = vmatmul.mubr.f32.vlgmr.msra.gmra.mrb[0].mxu0 %v2848_v28  ;;  %17943 = vmatprep.subr.bf16.mxu1 %v17942_v57  ;;  %v17948_v28 = vpack.c.bf16 %v857_v20, %v452_v19  ;;  %v861_v57 = vld [vmem:[#allocation5 + $0x12e8] sm:$0x3] }
 0x33e   :  { %18345 = vmatpush1.bf16.xpose.msra.mxu0 %v18344_v58  ;;  %17166 = vmatprep.mubr.f32.mxu0 %v2857_v59  ;;  %v2889_v58 = vrot.slane %v2875_v53, %v18940_v12  ;;  %v658_v59 = vld [vmem:[#allocation5 + $0xc90] sm:$0xff] }
 0x33f   :  { %18347 = vmatprep.subr.bf16.mxu0 %v18346_v61  ;;  %v17956_v61 = vpack.c.bf16 %v861_v57, %v456_v56  ;;  %v18360_v63 = vpack.c.bf16 %v1063_v60, %v658_v59 }
 0x340   :  { %v2891_v0 = vcombine.high %v2889_v58, %v2889_v58 }
 0x343   :  { %10097 = vmatmul.mubr.f32.vlgmr.msra.gmra.mrb[0].mxu1 %v1998_v43  ;;  %v862_v43 = vld [vmem:[#allocation5 + $0x12f0] sm:$0x3] }
 0x344   :  { %17945 = vmatpush1.bf16.xpose.msra.mxu1 %v17944_v7  ;;  %10166 = vmatprep.mubr.f32.mxu1 %v2007_v8  ;;  %v17954_v50 = vpack.c.bf16 %v862_v43, %v457_v42  ;;  %v2898_v7 = vrot.slane %v255_v5, %v18940_v12 }
 0x345   :  { %17167 = vmatmul.mubr.f32.vlgmr.msra.gmra.mrb[0].mxu0 %v2855_v46  ;;  %17947 = vmatprep.subr.bf16.mxu1 %v17946_v13  ;;  %v17952_v46 = vpack.c.bf16 %v859_v40, %v454_v39 }
 0x346   :  { %18349 = vmatpush1.bf16.xpose.msra.mxu0 %v18348_v14  ;;  %17236 = vmatprep.mubr.f32.mxu0 %v2873_v15 }
 0x347   :  { %18351 = vmatprep.subr.bf16.mxu0 %v18350_v17 }
 0x34b   :  { %10167 = vmatmul.mubr.f32.vlgmr.msra.gmra.mrb[0].mxu1 %v2005_v62  ;;  %v2040_v62 = vcombine.high %v2032_v55, %v2032_v55 }
 0x34c   :  { %17949 = vmatpush1.bf16.xpose.msra.mxu1 %v17948_v28  ;;  %10236 = vmatprep.mubr.f32.mxu1 %v2023_v29 }
 0x34d   :  { %17237 = vmatmul.mubr.f32.vlgmr.msra.gmra.mrb[0].mxu0 %v2865_v2  ;;  %17951 = vmatprep.subr.bf16.mxu1 %v17950_v33  ;;  %v1065_v2 = vld [vmem:[#allocation5 + $0x1948] sm:$0x3] }
 0x34e   :  { %18353 = vmatpush1.bf16.xpose.msra.mxu0 %v18352_v34  ;;  %17306 = vmatprep.mubr.f32.mxu0 %v2874_v35  ;;  %v18363_v3 = vpack.c.bf16 %v1065_v2, %v660_v1 }
 0x34f   :  { %18355 = vmatprep.subr.bf16.mxu0 %v18354_v37 }
 0x353   :  { %10237 = vmatmul.mubr.f32.vlgmr.msra.gmra.mrb[0].mxu1 %v2015_v18 }
 0x354   :  { %17953 = vmatpush1.bf16.xpose.msra.mxu1 %v17952_v46  ;;  %10306 = vmatprep.mubr.f32.mxu1 %v2024_v47 }
 0x355   :  { %17307 = vmatmul.mubr.f32.vlgmr.msra.gmra.mrb[0].mxu0 %v2872_v21  ;;  %17955 = vmatprep.subr.bf16.mxu1 %v17954_v50 }
 0x356   :  { %18357 = vmatpush1.bf16.xpose.msra.mxu0 %v18356_v51  ;;  %17376 = vmatprep.mubr.f32.mxu0 %v2890_v52 }
 0x357   :  { %18359 = vmatprep.subr.bf16.mxu0 %v18358_v54 }
 0x35b   :  { %10307 = vmatmul.mubr.f32.vlgmr.msra.gmra.mrb[0].mxu1 %v2022_v38 }
 0x35c   :  { %17957 = vmatpush1.bf16.xpose.msra.mxu1 %v17956_v61  ;;  %10376 = vmatprep.mubr.f32.mxu1 %v2040_v62 }
 0x35d   :  { %17377 = vmatmul.mubr.f32.vlgmr.msra.gmra.mrb[0].mxu0 %v2882_v41 }
 0x35e   :  { %18361 = vmatpush1.bf16.xpose.msra.mxu0 %v18360_v63  ;;  %17446 = vmatprep.mubr.f32.mxu0 %v2891_v0 }
 0x35f   :  { %18362 = vmatprep.subr.bf16.mxu0 %v18880_v23 }
 0x363   :  { %10377 = vmatmul.mubr.f32.vlgmr.msra.gmra.mrb[0].mxu1 %v2032_v55 }
 0x365   :  { %17447 = vmatmul.mubr.f32.vlgmr.msra.gmra.mrb[0].mxu0 %v2889_v58 }
 0x366   :  { %18365 = vmatpush3.bf16.xpose.msk.msra.mxu0 %vm18364_vm1, %v18363_v3  ;;  %17551 = vmatprep.mubr.msk.f32.mxu0 %vm18881_vm2, %v18882_v6 }
 0x36d   :  { %17552 = vmatmul.mubr.msk.f32.vlgmr.msra.gmra.mrb[0].mxu0 %vm3303_vm0, %v2898_v7 }
 0x436   :  { %v10378_v8 = vpop.f32.mrb[0].mxu1 }
 0x437   :  { %v10380_v9 = vpop.f32.mrb[1].mxu1  ;;  %v18366_v11 = vadd.f32 %v17540_v10, %v10378_v8 }
 0x440   :  { %v17518_v13 = vpop.f32.mrb[0].mxu0 }
 0x441   :  { %v18367_v14 = vadd.f32 %v18366_v11, %v17518_v13  ;;  %v17553_v15 = vpop.f32.mrb[1].mxu0 }
 0x443   :  { %17523 = vst.msk [vmem:[#allocation8] sm:$0x3] %vm17522_vm3, %v18367_v14 }
 0x444   :  { %18857 = shalt.err (!%p18854_p0)
}
 0x445   :  { %s18858_s26 = scalar_lea.hbm %s19165_s3, 32 }
 0x446   :  { %p18859_p1 = scmp.ne.s32.totalorder %s19165_s3, %s18858_s26  ;;  %p18862_p2 = scmp.lt.u32.totalorder %s18858_s26, %s19165_s3 }
 0x448   :  { %p18864_p3 = pnand %p18862_p2, %p18859_p1 }
 0x44a   :  { %18867 = shalt.err (!%p18864_p3)
}
 0x44b   :  { %17533 = dma.vmem_to_hbm [thread:$0]  %s17531_s22, 32, %s19165_s3, [#allocation4]  }
 0x44c   :  { %18872 = dma.done.wait [#allocation4], 32  }
 0x44d   :  { %18873 = vsyncadd [#allocation4], 4294967264 }
 0x44e   :  { %17537 = vsyncpa [#allocation3], 1 }
 0x44f   :  { %17538 = vsyncpa [#allocation6], 1 }
 0x450   :  { %17539 = vsyncpa [#allocation4], 1 }

</bundles_post_ra>
